<compile_context>
chip_gen: v5e
topology: v5e:2x2
jax: 0.10.0
libtpu: 0.0.40
codegen_flags: <defaults>
</compile_context>

<pallas_src>
import functools

import jax
import jax.numpy as jnp
from jax import lax
from jax.experimental import pallas as pl
from jax.experimental.pallas import tpu as pltpu


# ---------------------------- in-kernel helpers ----------------------------

def _shift_rows(a, s):
    """result[r, :] = a[r + s, :], zero-filled outside [0, M).  s is static."""
    if s == 0:
        return a
    m, c = a.shape
    zeros = jnp.zeros((abs(s), c), a.dtype)
    if s > 0:
        return jnp.concatenate([a[s:, :], zeros], axis=0)
    return jnp.concatenate([zeros, a[:s, :]], axis=0)


def _conv3x3_relu_pool(act, wmat, bias, pool_sel, *, width):
    """Fused 3x3 same-conv + bias + ReLU + 2x2/2 max-pool for one sample.

    act      : (H*W, Cin) f32, rows in row-major (h, w) order; width = W is a
               power of two.
    wmat     : (9*Cin, Cout) f32  (HWIO conv weight reshaped, tap-major).
    bias     : (1, Cout) f32.
    pool_sel : (4*Q, H*W) f32 one-hot gather matrix, Q = (H//2)*(W//2); row
               k*Q + q selects window-corner k of pooling window q.
    returns  : (Q, Cout) f32, rows in row-major (ho, wo) order.
    """
    m, _ = act.shape
    w = width
    # w-coordinate of every output row (W is a power of two -> bitwise and).
    w_pos = lax.broadcasted_iota(jnp.int32, (m, 1), 0) & (w - 1)
    not_last = (w_pos != (w - 1)).astype(act.dtype)   # kill wrap for kw == 2 taps
    not_first = (w_pos != 0).astype(act.dtype)        # kill wrap for kw == 0 taps

    # im2col: 9 row-shifted taps concatenated along lanes -> one K=9*Cin matmul.
    # Vertical (h) padding is handled by the zero fill of the row shift; the
    # horizontal (w) padding by the column masks above.
    taps = []
    for kh in range(3):
        for kw in range(3):
            tap = _shift_rows(act, (kh - 1) * w + (kw - 1))
            if kw == 2:
                tap = tap * not_last
            elif kw == 0:
                tap = tap * not_first
            taps.append(tap)
    patches = jnp.concatenate(taps, axis=1)                            # (M, 9*Cin)

    y = jnp.dot(patches, wmat, preferred_element_type=jnp.float32)     # single MXU matmul
    y = jnp.maximum(y + bias, 0.0)                                     # (M, Cout)

    # 2x2/2 max-pool: exact one-hot gather of the 4 window corners (MXU),
    # then elementwise max over the four row blocks.
    g = jnp.dot(pool_sel, y, preferred_element_type=jnp.float32)       # (4Q, Cout)
    q = m // 4
    return jnp.maximum(jnp.maximum(g[0:q], g[q:2 * q]),
                       jnp.maximum(g[2 * q:3 * q], g[3 * q:4 * q]))


# ------------------------------- the kernel -------------------------------

def _nodenet_kernel(x_ref, w1_ref, b1_ref, p1_ref, w2_ref, b2_ref, p2_ref,
                    w3_ref, b3_ref, p3_ref, wl_ref, bl_ref, o_ref, *, widths):
    act = x_ref[0]                                                     # (H*W, Cin)
    act = _conv3x3_relu_pool(act, w1_ref[...], b1_ref[...], p1_ref[...], width=widths[0])
    act = _conv3x3_relu_pool(act, w2_ref[...], b2_ref[...], p2_ref[...], width=widths[1])
    act = _conv3x3_relu_pool(act, w3_ref[...], b3_ref[...], p3_ref[...], width=widths[2])

    # Linear layer: torch's NCHW flatten is absorbed into the host-side weight
    # permutation, so here  y = bias + sum_s act[s, :] @ WL[s]  (WL: (S3, C3, E)).
    wl = wl_ref[...]
    y = bl_ref[...].astype(jnp.float32)                                # (1, E)
    for r in range(wl.shape[0]):
        y = y + jnp.dot(act[r:r + 1, :], wl[r], preferred_element_type=jnp.float32)

    # L2 normalization via rsqrt (EUP) instead of sqrt + divide.
    nrm2 = jnp.sum(y * y, axis=1, keepdims=True)
    o_ref[0] = (y * lax.rsqrt(jnp.maximum(nrm2, 1e-24))).astype(o_ref.dtype)


# ----------------------------- host-side glue -----------------------------

def _make_pool_selector(h, w):
    """(4*Q, H*W) one-hot rows: row k*Q + q selects corner k of window q."""
    ho, wo = h // 2, w // 2
    q = jnp.arange(ho * wo)
    base = (q // wo) * (2 * w) + (q % wo) * 2
    offs = jnp.array([0, 1, w, w + 1])
    src = (offs[:, None] + base[None, :]).reshape(-1)                  # (4Q,)
    return (src[:, None] == jnp.arange(h * w)[None, :]).astype(jnp.float32)


def nodenet2d_forward(x_nchw, params):
    """NodeNet2D.forward with classifier=False (embedding + L2 normalization)."""
    x = jnp.transpose(x_nchw, (0, 2, 3, 1)).astype(jnp.float32)        # NCHW -> NHWC
    n, h, w, cin = x.shape
    x2d = x.reshape(n, h * w, cin)                                     # per-sample row-major slab
    e = params["bl"].shape[0]

    heights = (h, h // 2, h // 4)
    widths = (w, w // 2, w // 4)
    conv_w, conv_b, pools = [], [], []
    for i, (hh, ww) in enumerate(zip(heights, widths), start=1):
        wi = params[f"w{i}"]                                           # (3,3,Cin,Cout) HWIO
        kh, kw, ci, co = wi.shape
        conv_w.append(wi.reshape(kh * kw * ci, co))                    # tap-major (K=9*Cin)
        conv_b.append(params[f"b{i}"].reshape(1, co))
        pools.append(_make_pool_selector(hh, ww))

    # Linear weight: torch flattens NCHW, i.e. row f = c*S3 + s (s = ho*Wo + wo).
    # Rearrange to (S3, C3, E) so the kernel contracts over channels per spatial s.
    c3 = params["w3"].shape[-1]
    s3 = (h // 8) * (w // 8)
    wl_k = params["wl"].reshape(c3, s3, e).transpose(1, 0, 2)          # (S3, C3, E)
    bl_k = params["bl"].reshape(1, e)

    def const_spec(arr):
        zeros = (0,) * arr.ndim
        return pl.BlockSpec(arr.shape, lambda i, _z=zeros: _z)

    operands = (x2d,
                conv_w[0], conv_b[0], pools[0],
                conv_w[1], conv_b[1], pools[1],
                conv_w[2], conv_b[2], pools[2],
                wl_k, bl_k)

    out = pl.pallas_call(
        functools.partial(_nodenet_kernel, widths=widths),
        out_shape=jax.ShapeDtypeStruct((n, 1, e), jnp.float32),
        grid=(n,),
        in_specs=[pl.BlockSpec((1, h * w, cin), lambda i: (i, 0, 0))]
                 + [const_spec(a) for a in operands[1:]],
        out_specs=pl.BlockSpec((1, 1, e), lambda i: (i, 0, 0)),
        compiler_params=pltpu.CompilerParams(dimension_semantics=("parallel",)),
    )(*operands)
    return out.reshape(n, e)


# ---------------------------- params & reference ----------------------------

def init_params(key, input_channels=3, filters=(16, 16, 16), linear_in=64, embedding=128):
    # TODO(synk): torch.load(weights_path) branch has no Pallas/JAX equivalent;
    # parameters are deterministically synthesized instead.
    ks = jax.random.split(key, 8)
    p = {}
    cins = (input_channels,) + tuple(filters[:2])
    for i, (ci, co) in enumerate(zip(cins, filters), start=1):
        p[f"w{i}"] = 0.1 * jax.random.normal(ks[2 * (i - 1)], (3, 3, ci, co), jnp.float32)
        p[f"b{i}"] = 0.01 * jax.random.normal(ks[2 * (i - 1) + 1], (co,), jnp.float32)
    p["wl"] = 0.1 * jax.random.normal(ks[6], (linear_in, embedding), jnp.float32)
    p["bl"] = 0.01 * jax.random.normal(ks[7], (embedding,), jnp.float32)
    return p


def reference_forward(x_nchw, params):
    x = jnp.transpose(x_nchw, (0, 2, 3, 1)).astype(jnp.float32)
    for i in (1, 2, 3):
        x = lax.conv_general_dilated(x, params[f"w{i}"], (1, 1), "SAME",
                                     dimension_numbers=("NHWC", "HWIO", "NHWC"),
                                     precision=lax.Precision.HIGHEST)
        x = jnp.maximum(x + params[f"b{i}"], 0.0)
        n, h, w, c = x.shape
        x = x.reshape(n, h // 2, 2, w // 2, 2, c).max(axis=(2, 4))
    n = x.shape[0]
    feats = jnp.transpose(x, (0, 3, 1, 2)).reshape(n, -1)              # NCHW flatten (torch)
    y = jnp.dot(feats, params["wl"], precision=lax.Precision.HIGHEST) + params["bl"]
    nrm = jnp.sqrt(jnp.sum(y * y, axis=1, keepdims=True))
    return y / jnp.maximum(nrm, 1e-12)


if __name__ == "__main__":
    key = jax.random.PRNGKey(0)
    kx, kp = jax.random.split(key)

    N, Cin, S = 2, 3, 16                                   # batch=2, channels=3, spatial=16
    x = jax.random.normal(kx, (N, Cin, S, S), jnp.float32)
    params = init_params(kp, input_channels=Cin,
                         filters=(16, 16, 16),
                         linear_in=(S // 8) ** 2 * 16,
                         embedding=128)

    out = jax.jit(nodenet2d_forward)(x, params)
    out = jax.block_until_ready(out)

    ref = reference_forward(x, params)
    assert out.shape == (N, 128), out.shape
    assert bool(jnp.allclose(out, ref, atol=1e-3, rtol=1e-3)), \
        float(jnp.max(jnp.abs(out - ref)))

    print("KERNEL_OK")
</pallas_src>

<mosaic_0001>
module attributes {stable_mosaic.version = 11 : i64} {
  func.func @_nodenet_kernel(%arg0: i32, %arg1: memref<1x256x3xf32, #tpu.memory_space<vmem>>, %arg2: memref<27x16xf32, #tpu.memory_space<vmem>>, %arg3: memref<1x16xf32, #tpu.memory_space<vmem>>, %arg4: memref<256x256xf32, #tpu.memory_space<vmem>>, %arg5: memref<144x16xf32, #tpu.memory_space<vmem>>, %arg6: memref<1x16xf32, #tpu.memory_space<vmem>>, %arg7: memref<64x64xf32, #tpu.memory_space<vmem>>, %arg8: memref<144x16xf32, #tpu.memory_space<vmem>>, %arg9: memref<1x16xf32, #tpu.memory_space<vmem>>, %arg10: memref<16x16xf32, #tpu.memory_space<vmem>>, %arg11: memref<4x16x128xf32, #tpu.memory_space<vmem>>, %arg12: memref<1x128xf32, #tpu.memory_space<vmem>>, %arg13: memref<1x1x128xf32, #tpu.memory_space<vmem>>) attributes {dimension_semantics = [#tpu.dimension_semantics<parallel>], iteration_bounds = array<i64: 2>, scalar_prefetch = 0 : i64, scratch_operands = 0 : i64, tpu.core_type = #tpu.core_type<tc>, window_params = [{transform_indices = @transform_0, window_bounds = array<i64: 1, 256, 3>}, {pipeline_mode = #tpu.pipeline_mode<synchronous>, transform_indices = @transform_1, window_bounds = array<i64: 27, 16>}, {pipeline_mode = #tpu.pipeline_mode<synchronous>, transform_indices = @transform_2, window_bounds = array<i64: 1, 16>}, {pipeline_mode = #tpu.pipeline_mode<synchronous>, transform_indices = @transform_3, window_bounds = array<i64: 256, 256>}, {pipeline_mode = #tpu.pipeline_mode<synchronous>, transform_indices = @transform_4, window_bounds = array<i64: 144, 16>}, {pipeline_mode = #tpu.pipeline_mode<synchronous>, transform_indices = @transform_5, window_bounds = array<i64: 1, 16>}, {pipeline_mode = #tpu.pipeline_mode<synchronous>, transform_indices = @transform_6, window_bounds = array<i64: 64, 64>}, {pipeline_mode = #tpu.pipeline_mode<synchronous>, transform_indices = @transform_7, window_bounds = array<i64: 144, 16>}, {pipeline_mode = #tpu.pipeline_mode<synchronous>, transform_indices = @transform_8, window_bounds = array<i64: 1, 16>}, {pipeline_mode = #tpu.pipeline_mode<synchronous>, transform_indices = @transform_9, window_bounds = array<i64: 16, 16>}, {pipeline_mode = #tpu.pipeline_mode<synchronous>, transform_indices = @transform_10, window_bounds = array<i64: 4, 16, 128>}, {pipeline_mode = #tpu.pipeline_mode<synchronous>, transform_indices = @transform_11, window_bounds = array<i64: 1, 128>}, {transform_indices = @transform_12, window_bounds = array<i64: 1, 1, 128>}]} {
    %c0 = arith.constant 0 : index
    %c0_0 = arith.constant 0 : index
    %c0_1 = arith.constant 0 : index
    %0 = vector.load %arg1[%c0, %c0_0, %c0_1] : memref<1x256x3xf32, #tpu.memory_space<vmem>>, vector<1x256x3xf32>
    %1 = vector.shape_cast %0 : vector<1x256x3xf32> to vector<256x3xf32>
    %c0_2 = arith.constant 0 : index
    %c0_3 = arith.constant 0 : index
    %2 = vector.load %arg2[%c0_2, %c0_3] : memref<27x16xf32, #tpu.memory_space<vmem>>, vector<27x16xf32>
    %c0_4 = arith.constant 0 : index
    %c0_5 = arith.constant 0 : index
    %3 = vector.load %arg3[%c0_4, %c0_5] : memref<1x16xf32, #tpu.memory_space<vmem>>, vector<1x16xf32>
    %c0_6 = arith.constant 0 : index
    %c0_7 = arith.constant 0 : index
    %4 = vector.load %arg4[%c0_6, %c0_7] : memref<256x256xf32, #tpu.memory_space<vmem>>, vector<256x256xf32>
    %5 = tpu.iota {dimensions = array<i32: 0>} : vector<256x1xi32>
    %c15_i32 = arith.constant 15 : i32
    %6 = vector.broadcast %c15_i32 : i32 to vector<256x1xi32>
    %7 = arith.andi %5, %6 : vector<256x1xi32>
    %c15_i32_8 = arith.constant 15 : i32
    %8 = vector.broadcast %c15_i32_8 : i32 to vector<256x1xi32>
    %9 = arith.cmpi ne, %7, %8 : vector<256x1xi32>
    %10 = arith.extui %9 : vector<256x1xi1> to vector<256x1xi32>
    %11 = arith.sitofp %10 : vector<256x1xi32> to vector<256x1xf32>
    %c0_i32 = arith.constant 0 : i32
    %12 = vector.broadcast %c0_i32 : i32 to vector<256x1xi32>
    %13 = arith.cmpi ne, %7, %12 : vector<256x1xi32>
    %14 = arith.extui %13 : vector<256x1xi1> to vector<256x1xi32>
    %15 = arith.sitofp %14 : vector<256x1xi32> to vector<256x1xf32>
    %cst = arith.constant 0.000000e+00 : f32
    %16 = vector.broadcast %cst : f32 to vector<17x3xf32>
    %17 = vector.extract_strided_slice %1 {offsets = [0, 0], sizes = [239, 3], strides = [1, 1]} : vector<256x3xf32> to vector<239x3xf32>
    %18 = tpu.concatenate %16, %17 in 0 : vector<17x3xf32>, vector<239x3xf32> -> vector<256x3xf32>
    %19 = vector.broadcast %15 : vector<256x1xf32> to vector<256x3xf32>
    %20 = arith.mulf %18, %19 : vector<256x3xf32>
    %cst_9 = arith.constant 0.000000e+00 : f32
    %21 = vector.broadcast %cst_9 : f32 to vector<16x3xf32>
    %22 = vector.extract_strided_slice %1 {offsets = [0, 0], sizes = [240, 3], strides = [1, 1]} : vector<256x3xf32> to vector<240x3xf32>
    %23 = tpu.concatenate %21, %22 in 0 : vector<16x3xf32>, vector<240x3xf32> -> vector<256x3xf32>
    %cst_10 = arith.constant 0.000000e+00 : f32
    %24 = vector.broadcast %cst_10 : f32 to vector<15x3xf32>
    %25 = vector.extract_strided_slice %1 {offsets = [0, 0], sizes = [241, 3], strides = [1, 1]} : vector<256x3xf32> to vector<241x3xf32>
    %26 = tpu.concatenate %24, %25 in 0 : vector<15x3xf32>, vector<241x3xf32> -> vector<256x3xf32>
    %27 = vector.broadcast %11 : vector<256x1xf32> to vector<256x3xf32>
    %28 = arith.mulf %26, %27 : vector<256x3xf32>
    %cst_11 = arith.constant 0.000000e+00 : f32
    %29 = vector.broadcast %cst_11 : f32 to vector<1x3xf32>
    %30 = vector.extract_strided_slice %1 {offsets = [0, 0], sizes = [255, 3], strides = [1, 1]} : vector<256x3xf32> to vector<255x3xf32>
    %31 = tpu.concatenate %29, %30 in 0 : vector<1x3xf32>, vector<255x3xf32> -> vector<256x3xf32>
    %32 = vector.broadcast %15 : vector<256x1xf32> to vector<256x3xf32>
    %33 = arith.mulf %31, %32 : vector<256x3xf32>
    %cst_12 = arith.constant 0.000000e+00 : f32
    %34 = vector.broadcast %cst_12 : f32 to vector<1x3xf32>
    %35 = vector.extract_strided_slice %1 {offsets = [1, 0], sizes = [255, 3], strides = [1, 1]} : vector<256x3xf32> to vector<255x3xf32>
    %36 = tpu.concatenate %35, %34 in 0 : vector<255x3xf32>, vector<1x3xf32> -> vector<256x3xf32>
    %37 = vector.broadcast %11 : vector<256x1xf32> to vector<256x3xf32>
    %38 = arith.mulf %36, %37 : vector<256x3xf32>
    %cst_13 = arith.constant 0.000000e+00 : f32
    %39 = vector.broadcast %cst_13 : f32 to vector<15x3xf32>
    %40 = vector.extract_strided_slice %1 {offsets = [15, 0], sizes = [241, 3], strides = [1, 1]} : vector<256x3xf32> to vector<241x3xf32>
    %41 = tpu.concatenate %40, %39 in 0 : vector<241x3xf32>, vector<15x3xf32> -> vector<256x3xf32>
    %42 = vector.broadcast %15 : vector<256x1xf32> to vector<256x3xf32>
    %43 = arith.mulf %41, %42 : vector<256x3xf32>
    %cst_14 = arith.constant 0.000000e+00 : f32
    %44 = vector.broadcast %cst_14 : f32 to vector<16x3xf32>
    %45 = vector.extract_strided_slice %1 {offsets = [16, 0], sizes = [240, 3], strides = [1, 1]} : vector<256x3xf32> to vector<240x3xf32>
    %46 = tpu.concatenate %45, %44 in 0 : vector<240x3xf32>, vector<16x3xf32> -> vector<256x3xf32>
    %cst_15 = arith.constant 0.000000e+00 : f32
    %47 = vector.broadcast %cst_15 : f32 to vector<17x3xf32>
    %48 = vector.extract_strided_slice %1 {offsets = [17, 0], sizes = [239, 3], strides = [1, 1]} : vector<256x3xf32> to vector<239x3xf32>
    %49 = tpu.concatenate %48, %47 in 0 : vector<239x3xf32>, vector<17x3xf32> -> vector<256x3xf32>
    %50 = vector.broadcast %11 : vector<256x1xf32> to vector<256x3xf32>
    %51 = arith.mulf %49, %50 : vector<256x3xf32>
    %52 = tpu.concatenate %20, %23, %28, %33, %1, %38, %43, %46, %51 in 1 : vector<256x3xf32>, vector<256x3xf32>, vector<256x3xf32>, vector<256x3xf32>, vector<256x3xf32>, vector<256x3xf32>, vector<256x3xf32>, vector<256x3xf32>, vector<256x3xf32> -> vector<256x27xf32>
    %cst_16 = arith.constant dense<0.000000e+00> : vector<256x16xf32>
    %53 = tpu.matmul %52, %2, %cst_16 {dimension_numbers = #tpu.dot_dimension_numbers<[1], [0], [0], [1], [0, 0, 1, 1], [], []>} : vector<256x27xf32>, vector<27x16xf32>, vector<256x16xf32> -> vector<256x16xf32>
    %54 = vector.broadcast %3 : vector<1x16xf32> to vector<256x16xf32>
    %55 = arith.addf %53, %54 : vector<256x16xf32>
    %cst_17 = arith.constant 0.000000e+00 : f32
    %56 = vector.broadcast %cst_17 : f32 to vector<256x16xf32>
    %57 = arith.maximumf %55, %56 : vector<256x16xf32>
    %cst_18 = arith.constant dense<0.000000e+00> : vector<256x16xf32>
    %58 = tpu.matmul %4, %57, %cst_18 {dimension_numbers = #tpu.dot_dimension_numbers<[1], [0], [0], [1], [0, 0, 1, 1], [], []>} : vector<256x256xf32>, vector<256x16xf32>, vector<256x16xf32> -> vector<256x16xf32>
    %59 = vector.extract_strided_slice %58 {offsets = [0, 0], sizes = [64, 16], strides = [1, 1]} : vector<256x16xf32> to vector<64x16xf32>
    %60 = vector.extract_strided_slice %58 {offsets = [64, 0], sizes = [64, 16], strides = [1, 1]} : vector<256x16xf32> to vector<64x16xf32>
    %61 = arith.maximumf %59, %60 : vector<64x16xf32>
    %62 = vector.extract_strided_slice %58 {offsets = [128, 0], sizes = [64, 16], strides = [1, 1]} : vector<256x16xf32> to vector<64x16xf32>
    %63 = vector.extract_strided_slice %58 {offsets = [192, 0], sizes = [64, 16], strides = [1, 1]} : vector<256x16xf32> to vector<64x16xf32>
    %64 = arith.maximumf %62, %63 : vector<64x16xf32>
    %65 = arith.maximumf %61, %64 : vector<64x16xf32>
    %c0_19 = arith.constant 0 : index
    %c0_20 = arith.constant 0 : index
    %66 = vector.load %arg5[%c0_19, %c0_20] : memref<144x16xf32, #tpu.memory_space<vmem>>, vector<144x16xf32>
    %c0_21 = arith.constant 0 : index
    %c0_22 = arith.constant 0 : index
    %67 = vector.load %arg6[%c0_21, %c0_22] : memref<1x16xf32, #tpu.memory_space<vmem>>, vector<1x16xf32>
    %c0_23 = arith.constant 0 : index
    %c0_24 = arith.constant 0 : index
    %68 = vector.load %arg7[%c0_23, %c0_24] : memref<64x64xf32, #tpu.memory_space<vmem>>, vector<64x64xf32>
    %69 = tpu.iota {dimensions = array<i32: 0>} : vector<64x1xi32>
    %c7_i32 = arith.constant 7 : i32
    %70 = vector.broadcast %c7_i32 : i32 to vector<64x1xi32>
    %71 = arith.andi %69, %70 : vector<64x1xi32>
    %c7_i32_25 = arith.constant 7 : i32
    %72 = vector.broadcast %c7_i32_25 : i32 to vector<64x1xi32>
    %73 = arith.cmpi ne, %71, %72 : vector<64x1xi32>
    %74 = arith.extui %73 : vector<64x1xi1> to vector<64x1xi32>
    %75 = arith.sitofp %74 : vector<64x1xi32> to vector<64x1xf32>
    %c0_i32_26 = arith.constant 0 : i32
    %76 = vector.broadcast %c0_i32_26 : i32 to vector<64x1xi32>
    %77 = arith.cmpi ne, %71, %76 : vector<64x1xi32>
    %78 = arith.extui %77 : vector<64x1xi1> to vector<64x1xi32>
    %79 = arith.sitofp %78 : vector<64x1xi32> to vector<64x1xf32>
    %cst_27 = arith.constant 0.000000e+00 : f32
    %80 = vector.broadcast %cst_27 : f32 to vector<9x16xf32>
    %81 = vector.extract_strided_slice %65 {offsets = [0, 0], sizes = [55, 16], strides = [1, 1]} : vector<64x16xf32> to vector<55x16xf32>
    %82 = tpu.concatenate %80, %81 in 0 : vector<9x16xf32>, vector<55x16xf32> -> vector<64x16xf32>
    %83 = vector.broadcast %79 : vector<64x1xf32> to vector<64x16xf32>
    %84 = arith.mulf %82, %83 : vector<64x16xf32>
    %cst_28 = arith.constant 0.000000e+00 : f32
    %85 = vector.broadcast %cst_28 : f32 to vector<8x16xf32>
    %86 = vector.extract_strided_slice %65 {offsets = [0, 0], sizes = [56, 16], strides = [1, 1]} : vector<64x16xf32> to vector<56x16xf32>
    %87 = tpu.concatenate %85, %86 in 0 : vector<8x16xf32>, vector<56x16xf32> -> vector<64x16xf32>
    %cst_29 = arith.constant 0.000000e+00 : f32
    %88 = vector.broadcast %cst_29 : f32 to vector<7x16xf32>
    %89 = vector.extract_strided_slice %65 {offsets = [0, 0], sizes = [57, 16], strides = [1, 1]} : vector<64x16xf32> to vector<57x16xf32>
    %90 = tpu.concatenate %88, %89 in 0 : vector<7x16xf32>, vector<57x16xf32> -> vector<64x16xf32>
    %91 = vector.broadcast %75 : vector<64x1xf32> to vector<64x16xf32>
    %92 = arith.mulf %90, %91 : vector<64x16xf32>
    %cst_30 = arith.constant 0.000000e+00 : f32
    %93 = vector.broadcast %cst_30 : f32 to vector<1x16xf32>
    %94 = vector.extract_strided_slice %65 {offsets = [0, 0], sizes = [63, 16], strides = [1, 1]} : vector<64x16xf32> to vector<63x16xf32>
    %95 = tpu.concatenate %93, %94 in 0 : vector<1x16xf32>, vector<63x16xf32> -> vector<64x16xf32>
    %96 = vector.broadcast %79 : vector<64x1xf32> to vector<64x16xf32>
    %97 = arith.mulf %95, %96 : vector<64x16xf32>
    %cst_31 = arith.constant 0.000000e+00 : f32
    %98 = vector.broadcast %cst_31 : f32 to vector<1x16xf32>
    %99 = vector.extract_strided_slice %65 {offsets = [1, 0], sizes = [63, 16], strides = [1, 1]} : vector<64x16xf32> to vector<63x16xf32>
    %100 = tpu.concatenate %99, %98 in 0 : vector<63x16xf32>, vector<1x16xf32> -> vector<64x16xf32>
    %101 = vector.broadcast %75 : vector<64x1xf32> to vector<64x16xf32>
    %102 = arith.mulf %100, %101 : vector<64x16xf32>
    %cst_32 = arith.constant 0.000000e+00 : f32
    %103 = vector.broadcast %cst_32 : f32 to vector<7x16xf32>
    %104 = vector.extract_strided_slice %65 {offsets = [7, 0], sizes = [57, 16], strides = [1, 1]} : vector<64x16xf32> to vector<57x16xf32>
    %105 = tpu.concatenate %104, %103 in 0 : vector<57x16xf32>, vector<7x16xf32> -> vector<64x16xf32>
    %106 = vector.broadcast %79 : vector<64x1xf32> to vector<64x16xf32>
    %107 = arith.mulf %105, %106 : vector<64x16xf32>
    %cst_33 = arith.constant 0.000000e+00 : f32
    %108 = vector.broadcast %cst_33 : f32 to vector<8x16xf32>
    %109 = vector.extract_strided_slice %65 {offsets = [8, 0], sizes = [56, 16], strides = [1, 1]} : vector<64x16xf32> to vector<56x16xf32>
    %110 = tpu.concatenate %109, %108 in 0 : vector<56x16xf32>, vector<8x16xf32> -> vector<64x16xf32>
    %cst_34 = arith.constant 0.000000e+00 : f32
    %111 = vector.broadcast %cst_34 : f32 to vector<9x16xf32>
    %112 = vector.extract_strided_slice %65 {offsets = [9, 0], sizes = [55, 16], strides = [1, 1]} : vector<64x16xf32> to vector<55x16xf32>
    %113 = tpu.concatenate %112, %111 in 0 : vector<55x16xf32>, vector<9x16xf32> -> vector<64x16xf32>
    %114 = vector.broadcast %75 : vector<64x1xf32> to vector<64x16xf32>
    %115 = arith.mulf %113, %114 : vector<64x16xf32>
    %116 = tpu.concatenate %84, %87, %92, %97, %65, %102, %107, %110, %115 in 1 : vector<64x16xf32>, vector<64x16xf32>, vector<64x16xf32>, vector<64x16xf32>, vector<64x16xf32>, vector<64x16xf32>, vector<64x16xf32>, vector<64x16xf32>, vector<64x16xf32> -> vector<64x144xf32>
    %cst_35 = arith.constant dense<0.000000e+00> : vector<64x16xf32>
    %117 = tpu.matmul %116, %66, %cst_35 {dimension_numbers = #tpu.dot_dimension_numbers<[1], [0], [0], [1], [0, 0, 1, 1], [], []>} : vector<64x144xf32>, vector<144x16xf32>, vector<64x16xf32> -> vector<64x16xf32>
    %118 = vector.broadcast %67 : vector<1x16xf32> to vector<64x16xf32>
    %119 = arith.addf %117, %118 : vector<64x16xf32>
    %cst_36 = arith.constant 0.000000e+00 : f32
    %120 = vector.broadcast %cst_36 : f32 to vector<64x16xf32>
    %121 = arith.maximumf %119, %120 : vector<64x16xf32>
    %cst_37 = arith.constant dense<0.000000e+00> : vector<64x16xf32>
    %122 = tpu.matmul %68, %121, %cst_37 {dimension_numbers = #tpu.dot_dimension_numbers<[1], [0], [0], [1], [0, 0, 1, 1], [], []>} : vector<64x64xf32>, vector<64x16xf32>, vector<64x16xf32> -> vector<64x16xf32>
    %123 = vector.extract_strided_slice %122 {offsets = [0, 0], sizes = [16, 16], strides = [1, 1]} : vector<64x16xf32> to vector<16x16xf32>
    %124 = vector.extract_strided_slice %122 {offsets = [16, 0], sizes = [16, 16], strides = [1, 1]} : vector<64x16xf32> to vector<16x16xf32>
    %125 = arith.maximumf %123, %124 : vector<16x16xf32>
    %126 = vector.extract_strided_slice %122 {offsets = [32, 0], sizes = [16, 16], strides = [1, 1]} : vector<64x16xf32> to vector<16x16xf32>
    %127 = vector.extract_strided_slice %122 {offsets = [48, 0], sizes = [16, 16], strides = [1, 1]} : vector<64x16xf32> to vector<16x16xf32>
    %128 = arith.maximumf %126, %127 : vector<16x16xf32>
    %129 = arith.maximumf %125, %128 : vector<16x16xf32>
    %c0_38 = arith.constant 0 : index
    %c0_39 = arith.constant 0 : index
    %130 = vector.load %arg8[%c0_38, %c0_39] : memref<144x16xf32, #tpu.memory_space<vmem>>, vector<144x16xf32>
    %c0_40 = arith.constant 0 : index
    %c0_41 = arith.constant 0 : index
    %131 = vector.load %arg9[%c0_40, %c0_41] : memref<1x16xf32, #tpu.memory_space<vmem>>, vector<1x16xf32>
    %c0_42 = arith.constant 0 : index
    %c0_43 = arith.constant 0 : index
    %132 = vector.load %arg10[%c0_42, %c0_43] : memref<16x16xf32, #tpu.memory_space<vmem>>, vector<16x16xf32>
    %133 = tpu.iota {dimensions = array<i32: 0>} : vector<16x1xi32>
    %c3_i32 = arith.constant 3 : i32
    %134 = vector.broadcast %c3_i32 : i32 to vector<16x1xi32>
    %135 = arith.andi %133, %134 : vector<16x1xi32>
    %c3_i32_44 = arith.constant 3 : i32
    %136 = vector.broadcast %c3_i32_44 : i32 to vector<16x1xi32>
    %137 = arith.cmpi ne, %135, %136 : vector<16x1xi32>
    %138 = arith.extui %137 : vector<16x1xi1> to vector<16x1xi32>
    %139 = arith.sitofp %138 : vector<16x1xi32> to vector<16x1xf32>
    %c0_i32_45 = arith.constant 0 : i32
    %140 = vector.broadcast %c0_i32_45 : i32 to vector<16x1xi32>
    %141 = arith.cmpi ne, %135, %140 : vector<16x1xi32>
    %142 = arith.extui %141 : vector<16x1xi1> to vector<16x1xi32>
    %143 = arith.sitofp %142 : vector<16x1xi32> to vector<16x1xf32>
    %cst_46 = arith.constant 0.000000e+00 : f32
    %144 = vector.broadcast %cst_46 : f32 to vector<5x16xf32>
    %145 = vector.extract_strided_slice %129 {offsets = [0, 0], sizes = [11, 16], strides = [1, 1]} : vector<16x16xf32> to vector<11x16xf32>
    %146 = tpu.concatenate %144, %145 in 0 : vector<5x16xf32>, vector<11x16xf32> -> vector<16x16xf32>
    %147 = vector.broadcast %143 : vector<16x1xf32> to vector<16x16xf32>
    %148 = arith.mulf %146, %147 : vector<16x16xf32>
    %cst_47 = arith.constant 0.000000e+00 : f32
    %149 = vector.broadcast %cst_47 : f32 to vector<4x16xf32>
    %150 = vector.extract_strided_slice %129 {offsets = [0, 0], sizes = [12, 16], strides = [1, 1]} : vector<16x16xf32> to vector<12x16xf32>
    %151 = tpu.concatenate %149, %150 in 0 : vector<4x16xf32>, vector<12x16xf32> -> vector<16x16xf32>
    %cst_48 = arith.constant 0.000000e+00 : f32
    %152 = vector.broadcast %cst_48 : f32 to vector<3x16xf32>
    %153 = vector.extract_strided_slice %129 {offsets = [0, 0], sizes = [13, 16], strides = [1, 1]} : vector<16x16xf32> to vector<13x16xf32>
    %154 = tpu.concatenate %152, %153 in 0 : vector<3x16xf32>, vector<13x16xf32> -> vector<16x16xf32>
    %155 = vector.broadcast %139 : vector<16x1xf32> to vector<16x16xf32>
    %156 = arith.mulf %154, %155 : vector<16x16xf32>
    %cst_49 = arith.constant 0.000000e+00 : f32
    %157 = vector.broadcast %cst_49 : f32 to vector<1x16xf32>
    %158 = vector.extract_strided_slice %129 {offsets = [0, 0], sizes = [15, 16], strides = [1, 1]} : vector<16x16xf32> to vector<15x16xf32>
    %159 = tpu.concatenate %157, %158 in 0 : vector<1x16xf32>, vector<15x16xf32> -> vector<16x16xf32>
    %160 = vector.broadcast %143 : vector<16x1xf32> to vector<16x16xf32>
    %161 = arith.mulf %159, %160 : vector<16x16xf32>
    %cst_50 = arith.constant 0.000000e+00 : f32
    %162 = vector.broadcast %cst_50 : f32 to vector<1x16xf32>
    %163 = vector.extract_strided_slice %129 {offsets = [1, 0], sizes = [15, 16], strides = [1, 1]} : vector<16x16xf32> to vector<15x16xf32>
    %164 = tpu.concatenate %163, %162 in 0 : vector<15x16xf32>, vector<1x16xf32> -> vector<16x16xf32>
    %165 = vector.broadcast %139 : vector<16x1xf32> to vector<16x16xf32>
    %166 = arith.mulf %164, %165 : vector<16x16xf32>
    %cst_51 = arith.constant 0.000000e+00 : f32
    %167 = vector.broadcast %cst_51 : f32 to vector<3x16xf32>
    %168 = vector.extract_strided_slice %129 {offsets = [3, 0], sizes = [13, 16], strides = [1, 1]} : vector<16x16xf32> to vector<13x16xf32>
    %169 = tpu.concatenate %168, %167 in 0 : vector<13x16xf32>, vector<3x16xf32> -> vector<16x16xf32>
    %170 = vector.broadcast %143 : vector<16x1xf32> to vector<16x16xf32>
    %171 = arith.mulf %169, %170 : vector<16x16xf32>
    %cst_52 = arith.constant 0.000000e+00 : f32
    %172 = vector.broadcast %cst_52 : f32 to vector<4x16xf32>
    %173 = vector.extract_strided_slice %129 {offsets = [4, 0], sizes = [12, 16], strides = [1, 1]} : vector<16x16xf32> to vector<12x16xf32>
    %174 = tpu.concatenate %173, %172 in 0 : vector<12x16xf32>, vector<4x16xf32> -> vector<16x16xf32>
    %cst_53 = arith.constant 0.000000e+00 : f32
    %175 = vector.broadcast %cst_53 : f32 to vector<5x16xf32>
    %176 = vector.extract_strided_slice %129 {offsets = [5, 0], sizes = [11, 16], strides = [1, 1]} : vector<16x16xf32> to vector<11x16xf32>
    %177 = tpu.concatenate %176, %175 in 0 : vector<11x16xf32>, vector<5x16xf32> -> vector<16x16xf32>
    %178 = vector.broadcast %139 : vector<16x1xf32> to vector<16x16xf32>
    %179 = arith.mulf %177, %178 : vector<16x16xf32>
    %180 = tpu.concatenate %148, %151, %156, %161, %129, %166, %171, %174, %179 in 1 : vector<16x16xf32>, vector<16x16xf32>, vector<16x16xf32>, vector<16x16xf32>, vector<16x16xf32>, vector<16x16xf32>, vector<16x16xf32>, vector<16x16xf32>, vector<16x16xf32> -> vector<16x144xf32>
    %cst_54 = arith.constant dense<0.000000e+00> : vector<16x16xf32>
    %181 = tpu.matmul %180, %130, %cst_54 {dimension_numbers = #tpu.dot_dimension_numbers<[1], [0], [0], [1], [0, 0, 1, 1], [], []>} : vector<16x144xf32>, vector<144x16xf32>, vector<16x16xf32> -> vector<16x16xf32>
    %182 = vector.broadcast %131 : vector<1x16xf32> to vector<16x16xf32>
    %183 = arith.addf %181, %182 : vector<16x16xf32>
    %cst_55 = arith.constant 0.000000e+00 : f32
    %184 = vector.broadcast %cst_55 : f32 to vector<16x16xf32>
    %185 = arith.maximumf %183, %184 : vector<16x16xf32>
    %cst_56 = arith.constant dense<0.000000e+00> : vector<16x16xf32>
    %186 = tpu.matmul %132, %185, %cst_56 {dimension_numbers = #tpu.dot_dimension_numbers<[1], [0], [0], [1], [0, 0, 1, 1], [], []>} : vector<16x16xf32>, vector<16x16xf32>, vector<16x16xf32> -> vector<16x16xf32>
    %187 = vector.extract_strided_slice %186 {offsets = [0, 0], sizes = [4, 16], strides = [1, 1]} : vector<16x16xf32> to vector<4x16xf32>
    %188 = vector.extract_strided_slice %186 {offsets = [4, 0], sizes = [4, 16], strides = [1, 1]} : vector<16x16xf32> to vector<4x16xf32>
    %189 = arith.maximumf %187, %188 : vector<4x16xf32>
    %190 = vector.extract_strided_slice %186 {offsets = [8, 0], sizes = [4, 16], strides = [1, 1]} : vector<16x16xf32> to vector<4x16xf32>
    %191 = vector.extract_strided_slice %186 {offsets = [12, 0], sizes = [4, 16], strides = [1, 1]} : vector<16x16xf32> to vector<4x16xf32>
    %192 = arith.maximumf %190, %191 : vector<4x16xf32>
    %193 = arith.maximumf %189, %192 : vector<4x16xf32>
    %c0_57 = arith.constant 0 : index
    %c0_58 = arith.constant 0 : index
    %c0_59 = arith.constant 0 : index
    %194 = vector.load %arg11[%c0_57, %c0_58, %c0_59] : memref<4x16x128xf32, #tpu.memory_space<vmem>>, vector<4x16x128xf32>
    %c0_60 = arith.constant 0 : index
    %c0_61 = arith.constant 0 : index
    %195 = vector.load %arg12[%c0_60, %c0_61] : memref<1x128xf32, #tpu.memory_space<vmem>>, vector<1x128xf32>
    %196 = vector.extract_strided_slice %193 {offsets = [0, 0], sizes = [1, 16], strides = [1, 1]} : vector<4x16xf32> to vector<1x16xf32>
    %197 = vector.extract_strided_slice %194 {offsets = [0, 0, 0], sizes = [1, 16, 128], strides = [1, 1, 1]} : vector<4x16x128xf32> to vector<1x16x128xf32>
    %198 = vector.shape_cast %197 : vector<1x16x128xf32> to vector<16x128xf32>
    %cst_62 = arith.constant dense<0.000000e+00> : vector<1x128xf32>
    %199 = tpu.matmul %196, %198, %cst_62 {dimension_numbers = #tpu.dot_dimension_numbers<[1], [0], [0], [1], [0, 0, 1, 1], [], []>} : vector<1x16xf32>, vector<16x128xf32>, vector<1x128xf32> -> vector<1x128xf32>
    %200 = arith.addf %195, %199 : vector<1x128xf32>
    %201 = vector.extract_strided_slice %193 {offsets = [1, 0], sizes = [1, 16], strides = [1, 1]} : vector<4x16xf32> to vector<1x16xf32>
    %202 = vector.extract_strided_slice %194 {offsets = [1, 0, 0], sizes = [1, 16, 128], strides = [1, 1, 1]} : vector<4x16x128xf32> to vector<1x16x128xf32>
    %203 = vector.shape_cast %202 : vector<1x16x128xf32> to vector<16x128xf32>
    %cst_63 = arith.constant dense<0.000000e+00> : vector<1x128xf32>
    %204 = tpu.matmul %201, %203, %cst_63 {dimension_numbers = #tpu.dot_dimension_numbers<[1], [0], [0], [1], [0, 0, 1, 1], [], []>} : vector<1x16xf32>, vector<16x128xf32>, vector<1x128xf32> -> vector<1x128xf32>
    %205 = arith.addf %200, %204 : vector<1x128xf32>
    %206 = vector.extract_strided_slice %193 {offsets = [2, 0], sizes = [1, 16], strides = [1, 1]} : vector<4x16xf32> to vector<1x16xf32>
    %207 = vector.extract_strided_slice %194 {offsets = [2, 0, 0], sizes = [1, 16, 128], strides = [1, 1, 1]} : vector<4x16x128xf32> to vector<1x16x128xf32>
    %208 = vector.shape_cast %207 : vector<1x16x128xf32> to vector<16x128xf32>
    %cst_64 = arith.constant dense<0.000000e+00> : vector<1x128xf32>
    %209 = tpu.matmul %206, %208, %cst_64 {dimension_numbers = #tpu.dot_dimension_numbers<[1], [0], [0], [1], [0, 0, 1, 1], [], []>} : vector<1x16xf32>, vector<16x128xf32>, vector<1x128xf32> -> vector<1x128xf32>
    %210 = arith.addf %205, %209 : vector<1x128xf32>
    %211 = vector.extract_strided_slice %193 {offsets = [3, 0], sizes = [1, 16], strides = [1, 1]} : vector<4x16xf32> to vector<1x16xf32>
    %212 = vector.extract_strided_slice %194 {offsets = [3, 0, 0], sizes = [1, 16, 128], strides = [1, 1, 1]} : vector<4x16x128xf32> to vector<1x16x128xf32>
    %213 = vector.shape_cast %212 : vector<1x16x128xf32> to vector<16x128xf32>
    %cst_65 = arith.constant dense<0.000000e+00> : vector<1x128xf32>
    %214 = tpu.matmul %211, %213, %cst_65 {dimension_numbers = #tpu.dot_dimension_numbers<[1], [0], [0], [1], [0, 0, 1, 1], [], []>} : vector<1x16xf32>, vector<16x128xf32>, vector<1x128xf32> -> vector<1x128xf32>
    %215 = arith.addf %210, %214 : vector<1x128xf32>
    %216 = arith.mulf %215, %215 : vector<1x128xf32>
    %cst_66 = arith.constant dense<0.000000e+00> : vector<1xf32>
    %217 = vector.multi_reduction <add>, %216, %cst_66 [1] : vector<1x128xf32> to vector<1xf32>
    %218 = vector.shape_cast %217 : vector<1xf32> to vector<1x1xf32>
    %cst_67 = arith.constant 1.000000e-24 : f32
    %219 = vector.broadcast %cst_67 : f32 to vector<1x1xf32>
    %220 = arith.maximumf %218, %219 : vector<1x1xf32>
    %221 = math.rsqrt %220 : vector<1x1xf32>
    %222 = vector.broadcast %221 : vector<1x1xf32> to vector<1x128xf32>
    %223 = arith.mulf %215, %222 : vector<1x128xf32>
    %c0_68 = arith.constant 0 : index
    %c0_69 = arith.constant 0 : index
    %c0_70 = arith.constant 0 : index
    %224 = vector.load %arg13[%c0_68, %c0_69, %c0_70] : memref<1x1x128xf32, #tpu.memory_space<vmem>>, vector<1x1x128xf32>
    %225 = vector.shape_cast %224 : vector<1x1x128xf32> to vector<1x128xf32>
    %226 = vector.shape_cast %223 : vector<1x128xf32> to vector<1x1x128xf32>
    tpu.vector_store %arg13[%c0_68, %c0_69, %c0_70], %226 {strides = array<i32>} : memref<1x1x128xf32, #tpu.memory_space<vmem>>, vector<1x1x128xf32>,
    return
  }
  func.func @transform_0(%arg0: i32) -> (i32, i32, i32) {
    %c0_i32 = arith.constant 0 : i32
    %c0_i32_0 = arith.constant 0 : i32
    %c0_i32_1 = arith.constant 0 : i32
    return %arg0, %c0_i32, %c0_i32_0 : i32, i32, i32
  }
  func.func @transform_1(%arg0: i32) -> (i32, i32) {
    %c0_i32 = arith.constant 0 : i32
    %c0_i32_0 = arith.constant 0 : i32
    %c0_i32_1 = arith.constant 0 : i32
    return %c0_i32, %c0_i32_0 : i32, i32
  }
  func.func @transform_2(%arg0: i32) -> (i32, i32) {
    %c0_i32 = arith.constant 0 : i32
    %c0_i32_0 = arith.constant 0 : i32
    %c0_i32_1 = arith.constant 0 : i32
    return %c0_i32, %c0_i32_0 : i32, i32
  }
  func.func @transform_3(%arg0: i32) -> (i32, i32) {
    %c0_i32 = arith.constant 0 : i32
    %c0_i32_0 = arith.constant 0 : i32
    %c0_i32_1 = arith.constant 0 : i32
    return %c0_i32, %c0_i32_0 : i32, i32
  }
  func.func @transform_4(%arg0: i32) -> (i32, i32) {
    %c0_i32 = arith.constant 0 : i32
    %c0_i32_0 = arith.constant 0 : i32
    %c0_i32_1 = arith.constant 0 : i32
    return %c0_i32, %c0_i32_0 : i32, i32
  }
  func.func @transform_5(%arg0: i32) -> (i32, i32) {
    %c0_i32 = arith.constant 0 : i32
    %c0_i32_0 = arith.constant 0 : i32
    %c0_i32_1 = arith.constant 0 : i32
    return %c0_i32, %c0_i32_0 : i32, i32
  }
  func.func @transform_6(%arg0: i32) -> (i32, i32) {
    %c0_i32 = arith.constant 0 : i32
    %c0_i32_0 = arith.constant 0 : i32
    %c0_i32_1 = arith.constant 0 : i32
    return %c0_i32, %c0_i32_0 : i32, i32
  }
  func.func @transform_7(%arg0: i32) -> (i32, i32) {
    %c0_i32 = arith.constant 0 : i32
    %c0_i32_0 = arith.constant 0 : i32
    %c0_i32_1 = arith.constant 0 : i32
    return %c0_i32, %c0_i32_0 : i32, i32
  }
  func.func @transform_8(%arg0: i32) -> (i32, i32) {
    %c0_i32 = arith.constant 0 : i32
    %c0_i32_0 = arith.constant 0 : i32
    %c0_i32_1 = arith.constant 0 : i32
    return %c0_i32, %c0_i32_0 : i32, i32
  }
  func.func @transform_9(%arg0: i32) -> (i32, i32) {
    %c0_i32 = arith.constant 0 : i32
    %c0_i32_0 = arith.constant 0 : i32
    %c0_i32_1 = arith.constant 0 : i32
    return %c0_i32, %c0_i32_0 : i32, i32
  }
  func.func @transform_10(%arg0: i32) -> (i32, i32, i32) {
    %c0_i32 = arith.constant 0 : i32
    %c0_i32_0 = arith.constant 0 : i32
    %c0_i32_1 = arith.constant 0 : i32
    %c0_i32_2 = arith.constant 0 : i32
    return %c0_i32, %c0_i32_0, %c0_i32_1 : i32, i32, i32
  }
  func.func @transform_11(%arg0: i32) -> (i32, i32) {
    %c0_i32 = arith.constant 0 : i32
    %c0_i32_0 = arith.constant 0 : i32
    %c0_i32_1 = arith.constant 0 : i32
    return %c0_i32, %c0_i32_0 : i32, i32
  }
  func.func @transform_12(%arg0: i32) -> (i32, i32, i32) {
    %c0_i32 = arith.constant 0 : i32
    %c0_i32_0 = arith.constant 0 : i32
    %c0_i32_1 = arith.constant 0 : i32
    return %arg0, %c0_i32, %c0_i32_0 : i32, i32, i32
  }
}

</mosaic_0001>

<bundles_post_ra>
// kernel: nodenet2d_forward.1
= control target key start
LH: loop header
LB: loop body
LE: loop exit
PB: predicated region body
PF: predicated region fallthrough
CT: control target
= control target key end

     0   :  { %s6700_s0 = inlined_call_operand.vmem [shape: f32[2,256,3], index: 0, kind: input, shape index: {}]   ;;  %s6701_s1 = inlined_call_operand.vmem [shape: f32[27,16], index: 1, kind: input, shape index: {}]   ;;  %s6702_s2 = inlined_call_operand.vmem [shape: f32[1,16], index: 2, kind: input, shape index: {}]   ;;  %s6703_s3 = inlined_call_operand.vmem [shape: f32[256,256], index: 3, kind: input, shape index: {}]   ;;  %s6704_s4 = inlined_call_operand.vmem [shape: f32[144,16], index: 4, kind: input, shape index: {}]   ;;  %s6705_s5 = inlined_call_operand.vmem [shape: f32[1,16], index: 5, kind: input, shape index: {}]   ;;  %s6706_s6 = inlined_call_operand.vmem [shape: f32[64,64], index: 6, kind: input, shape index: {}]   ;;  %s6707_s7 = inlined_call_operand.vmem [shape: f32[144,16], index: 7, kind: input, shape index: {}]   ;;  %s6708_s8 = inlined_call_operand.vmem [shape: f32[1,16], index: 8, kind: input, shape index: {}]   ;;  %s6709_s9 = inlined_call_operand.vmem [shape: f32[16,16], index: 9, kind: input, shape index: {}]   ;;  %s6710_s10 = inlined_call_operand.vmem [shape: f32[4,16,128], index: 10, kind: input, shape index: {}]   ;;  %s6711_s11 = inlined_call_operand.vmem [shape: f32[1,128], index: 11, kind: input, shape index: {}]   ;;  %s6712_s12 = inlined_call_operand.hbm [shape: f32[2,1,128], index: 12, kind: output, shape index: {}]  }
   0x1   :  { %6737 = sst [smem:[#allocation5_spill]] %s6700_s0 }
   0x2   :  { %6738 = sst [smem:[#allocation6_spill]] %s6701_s1 }
   0x3   :  { %17 = vsyncpa [#allocation3], 0 }
   0x4   :  { %19 = vsyncpa [#allocation3 + $0x1], 0  ;;  %s4424_s21 = smov 0   ;;  %s4426_s22 = smov 0  }
   0x5   :  { %s4428_s23 = smov 0   ;;  %s4430_s24 = smov 0  }
   0x6 LB: > { %s4445_s25 = sadd.s32 4294967295, %s4341_s24   ;;  %s3956_s26 = sadd.s32 4294967294, %s4341_s24   ;;  %s4341_s24 = sphi %s4430_s24, %s6760_s24   ;;  %s4337_s23 = sphi %s4428_s23, %s6759_s23   ;;  %s4333_s22 = sphi %s4426_s22, %s6758_s22   ;;  %s4329_s21 = sphi %s4424_s21, %s6757_s21  }
   0x7   : > { %s4449_s27 = sadd.s32 1, %s4341_s24   ;;  %s289_s28 = sadd.s32 1, %s4337_s23 }
   0x8   : > { %s286_s29 = ssub.s32 %s4341_s24, %s4449_s27  ;;  %p299_p0 = scmp.ne.s32.totalorder %s4337_s23, %s4333_s22 }
   0x9   : > { %p287_p1 = scmp.eq.s32.totalorder %s286_s29, 0  ;;  %p300_p2 = scmp.eq.s32.totalorder %s4445_s25, 1 }
   0xa   : > { %p305_p3 = scmp.ne.s32.totalorder %s4333_s22, %s4329_s21  ;;  %p306_p4 = scmp.eq.s32.totalorder %s3956_s26, 1 }
   0xb   : > { %s4460_s30 = scalar_select %p287_p1, %s4337_s23, %s289_s28  }
   0xc   : > { %p4462_p5 = por %p300_p2, %p299_p0  ;;  %p4466_p6 = por %p306_p4, %p305_p3 }
   0xd   : > { %p3959_p7 = scmp.ge.s32.totalorder %s4341_s24, 1  ;;  %p365_p8 = scmp.lt.s32.totalorder %s4341_s24, 3 }
   0xf   : > { %p366_p9 = pnand %p3959_p7, %p365_p8 }
  0x10   : > { %p406_p10 = scmp.lt.s32.totalorder (!%p366_p9), %s4445_s25, 1  ;;  %s6725_s15 = smov (!%p366_p9), 3  }
  0x11   : > { %369 = sbr.rel (%p366_p9) target bundleno = 2651 (0xa5b), region = 68  ;;  %s6741_s0 = sld [smem:[#allocation5_spill]] (!%p366_p9) }
  0x12   : > { %s6717_s26 = smov (!%p366_p9), 12   ;;  %s6715_s28 = smov (!%p366_p9), 6  }
  0x13   : > { %s6723_s29 = smov (!%p366_p9), 15   ;;  %s6719_s18 = smov (!%p366_p9), 18  }
  0x14   : > { %s4351_s19 = smov (!%p366_p9), 24   ;;  %s6742_s1 = sld [smem:[#allocation6_spill]] (!%p366_p9) }
  0x16   : > { %v512_v0 = vlaneseq  ;;  %v4343_v1 = vmov 0.0   ;;  %s407_s16 = scalar_select %p406_p10, %s4445_s25, 1  ;;  %vm923_vm0 = vcmask 1046528   ;;  %vm799_vm1 = vcmask 1040384  }
  0x17   : > { %1192 = vrot.lane.b32.xlu0 %v4343_v1, %s6725_s15  ;;  %vm2478_vm7 = vcmask 1042432   ;;  %vm2114_vm9 = vcmask 23552   ;;  %vm2180_vm11 = vcmask 72704   ;;  %vm2147_vm12 = vcmask 48128  }
  0x18   : > { %v4476_v2 = vshrl.u32 %v512_v0, 7  ;;  %s4073_s17 = sshll.u32 %s407_s16, 8  ;;  %s6713_s16 = smov 9   ;;  %vm2213_vm13 = vcmask 97280   ;;  %vm2246_vm14 = vcmask 121856   ;;  %vm2279_vm15 = vcmask 146432  }
  0x19   : > { %s4485_s20 = scalar_lea.vmem %s6741_s0, %s4073_s17  ;;  %s6721_s17 = smov 21  }
  0x1a   : > { %v4479_v3 = vadd.s32 16, %v4476_v2  ;;  %v545_v4 = vand.u32 15, %v4476_v2  ;;  %v411_v5 = vld [vmem:[%s4485_s20] sm:$0xff]  ;;  %v4489_v6 = vld [vmem:[%s4485_s20 + $0x8] sm:$0xff]  ;;  %v4493_v8 = vld [vmem:[%s4485_s20 + $0x10] sm:$0xff]  ;;  %v4498_v12 = vadd.s32 8, %v4476_v2 }
  0x1b   : > { %1541 = vrot.lane.b32.xlu1 %v411_v5, %s6717_s26  ;;  %v924_v9 = vrot.slane %v411_v5, 1  ;;  %v925_v10 = vrot.slane %v4489_v6, 1  ;;  %v800_v11 = vrot.slane %v411_v5, 7  ;;  %v801_v14 = vrot.slane %v4489_v6, 7  ;;  %v4519_v23 = vld [vmem:[%s4485_s20 + $0x18] sm:$0xff]  ;;  %v4548_v36 = vld [vmem:[%s4485_s20 + $0x20] sm:$0xff] }
  0x1c   : > { %v547_v7 = vand.u32 15, %v4479_v3  ;;  %vm673_vm2 = vcmp.ne.s32.totalorder %v545_v4, 0  ;;  %v803_v15 = vrot.slane %v4493_v8, 7  ;;  %v546_v22 = vand.u32 15, %v4498_v12  ;;  %v4578_v45 = vld [vmem:[%s4485_s20 + $0x28] sm:$0xff]  ;;  %v4597_v51 = vld [vmem:[%s4485_s20 + $0x30] sm:$0xff] }
  0x1d   : > { %v4501_v13 = vsel %vm673_vm2, 1.0, %v4343_v1  ;;  %v926_v16 = vsel %vm923_vm0, %v924_v9, %v925_v10  ;;  %v889_v18 = vsel %vm799_vm1, 0.0, %v800_v11  ;;  %v927_v25 = vrot.slane %v4493_v8, 1  ;;  %s6748_s0 = smov 3  }
  0x1e   : > { %vm675_vm3 = vcmp.ne.s32.totalorder %v547_v7, 0  ;;  %1669 = vrot.lane.b32.xlu2 %v926_v16, %s6723_s29  ;;  %v1056_v20 = vmul.f32 %v4501_v13, %v889_v18  ;;  %v4515_v21 = vsel %vm799_vm1, %v801_v14, %v803_v15  ;;  %v929_v26 = vrot.slane %v4519_v23, 1  ;;  %v446_v7 = vld [vmem:[%s6742_s1 + $0x18] sm:$0x7] }
  0x1f   : > { %1317 = vrot.lane.b32.xlu0 %v4343_v1, %s6715_s28  ;;  %v3979_v17 = vsel %vm675_vm3, 1.0, %v4343_v1  ;;  %v1127_v24 = vmul.f32 %v4501_v13, %v4515_v21  ;;  %vm578_vm4 = vcmp.ne.s32.totalorder %v546_v22, 15  ;;  %v1016_v28 = vsel %vm923_vm0, 0.0, %v924_v9  ;;  %3994 = vmatpush.msk.msra.mxu0 %vm2478_vm7, %v446_v7 }
  0x20   : > { %v4511_v19 = vmul.f32 %v3979_v17, %v889_v18  ;;  %v3962_v27 = vsel %vm578_vm4, 1.0, %v4343_v1  ;;  %v4532_v29 = vsel %vm923_vm0, %v927_v25, %v929_v26  ;;  %v4535_v30 = vsel %vm799_vm1, %v800_v11, %v801_v14  ;;  %v444_v14 = vld [vmem:[%s6742_s1 + $0x8] sm:$0xff] }
  0x21   : > { %v1018_v31 = vmul.f32 %v3962_v27, %v1016_v28  ;;  %v805_v32 = vrot.slane %v4519_v23, 7  ;;  %v928_v33 = vsel %vm923_vm0, %v925_v10, %v927_v25  ;;  %v931_v37 = vrot.slane %v4548_v36, 1  ;;  %v445_v10 = vld [vmem:[%s6742_s1 + $0x10] sm:$0xff] }
  0x22   : > { %v1094_v35 = vmul.f32 %v3962_v27, %v928_v33  ;;  %v1058_v40 = vmul.f32 %v3979_v17, %v4515_v21  ;;  %v4567_v41 = vadd.s32 24, %v4476_v2  ;;  %v807_v42 = vrot.slane %v4548_v36, 7  ;;  %2495 = vmatpush.msra.mxu0 %v445_v10 }
  0x23   : > { %1445 = vrot.lane.b32.xlu1 %v1056_v20, %s6713_s16  ;;  %v4545_v34 = vsel %vm799_vm1, %v803_v15, %v805_v32  ;;  %v4557_v38 = vsel %vm923_vm0, %v929_v26, %v931_v37  ;;  %v933_v47 = vrot.slane %v4578_v45, 1  ;;  %v935_v53 = vrot.slane %v4597_v51, 1  ;;  %v4680_v20 = vld [vmem:[%s4485_s20 + $0x40] sm:$0xff] }
  0x24   : > { %v1160_v39 = vmul.f32 %v3962_v27, %v4557_v38  ;;  %v548_v43 = vand.u32 15, %v4567_v41  ;;  %v4575_v44 = vsel %vm799_vm1, %v805_v32, %v807_v42  ;;  %v4604_v54 = vadd.s32 32, %v4476_v2  ;;  %2496 = vmatpush.msra.mxu0 %v444_v14 }
  0x25   : > { %v1129_v46 = vmul.f32 %v3979_v17, %v4575_v44  ;;  %v4589_v49 = vsel %vm923_vm0, %v931_v37, %v933_v47  ;;  %v809_v55 = vrot.slane %v4578_v45, 7  ;;  %v4609_v56 = vsel %vm923_vm0, %v933_v47, %v935_v53 }
  0x26   : > { %1797 = vrot.lane.b32.xlu2 %v1127_v24, %s6719_s18  ;;  %vm580_vm5 = vcmp.ne.s32.totalorder %v548_v43, 15  ;;  %v549_v57 = vand.u32 15, %v4604_v54  ;;  %v811_v62 = vrot.slane %v4597_v51, 7  ;;  %v4640_v4 = vadd.s32 40, %v4476_v2 }
  0x27   : > { %1893 = vrot.lane.b32.xlu0 %v4493_v8, %s6721_s17  ;;  %v3963_v48 = vsel %vm580_vm5, 1.0, %v4343_v1  ;;  %v4615_v58 = vsel %vm799_vm1, %v807_v42, %v809_v55  ;;  %v939_v25 = vrot.slane %v4680_v20, 1  ;;  %v4687_v26 = vadd.s32 48, %v4476_v2 }
  0x28   : > { %v1020_v50 = vmul.f32 %v3963_v48, %v928_v33  ;;  %v1096_v52 = vmul.f32 %v3963_v48, %v4557_v38  ;;  %v1162_v59 = vmul.f32 %v3963_v48, %v4609_v56  ;;  %vm677_vm6 = vcmp.ne.s32.totalorder %v549_v57, 0 }
  0x29   : > { %v4622_v60 = vsel %vm677_vm6, 1.0, %v4343_v1  ;;  %v4633_v63 = vsel %vm799_vm1, %v809_v55, %v811_v62  ;;  %v551_v32 = vand.u32 15, %v4687_v26  ;;  %v890_v37 = vmul.f32 0.0, %v4501_v13  ;;  %v4723_v55 = vld [vmem:[%s4485_s20 + $0x48] sm:$0xff] }
  0x2a   : > { %v1060_v61 = vmul.f32 %v4622_v60, %v4575_v44  ;;  %v1131_v0 = vmul.f32 %v4622_v60, %v4633_v63  ;;  %vm2312_vm2 = vcmask 171008   ;;  %vm2345_vm3 = vcmask 195584  }
  0x2b   : > { %2018 = vrot.lane.b32.xlu1 %v4532_v29, %s4351_s19  ;;  %vm679_vm10 = vcmp.ne.s32.totalorder %v551_v32, 0  ;;  %vm2381_vm4 = vcmask 220160   ;;  %v4729_v57 = vadd.s32 56, %v4476_v2 }
  0x2e   : > { %1319 = vrot.lane.b32.xlu2 %v1018_v31, %s6715_s28 }
  0x2f   : > { %1447 = vrot.lane.b32.xlu0 %v4535_v30, %s6713_s16 }
  0x33   : > { %1543 = vrot.lane.b32.xlu1 %v4489_v6, %s6717_s26 }
  0x36   : > { %1671 = vrot.lane.b32.xlu2 %v1094_v35, %s6723_s29 }
  0x37   : > { %1799 = vrot.lane.b32.xlu0 %v4545_v34, %s6719_s18 }
  0x3b   : > { %1895 = vrot.lane.b32.xlu1 %v4519_v23, %s6721_s17 }
  0x3e   : > { %2020 = vrot.lane.b32.xlu2 %v1160_v39, %s4351_s19 }
  0x3f   : > { %1194 = vrot.lane.b32.xlu0 %v411_v5, %s6725_s15  ;;  %v550_v5 = vand.u32 15, %v4640_v4 }
  0x41   : > { %vm582_vm8 = vcmp.ne.s32.totalorder %v550_v5, 15 }
  0x42   : > { %v3964_v15 = vsel %vm582_vm8, 1.0, %v4343_v1 }
  0x43   : > { %1321 = vrot.lane.b32.xlu1 %v926_v16, %s6715_s28  ;;  %v443_v16 = vld [vmem:[%s6742_s1] sm:$0xff]  ;;  %v1022_v17 = vmul.f32 %v3964_v15, %v4557_v38 }
  0x44   : > { %2497 = vmatpush.msra.mxu0 %v443_v16 }
  0x46   : > { %1449 = vrot.lane.b32.xlu2 %v1058_v40, %s6713_s16  ;;  %v4707_v40 = vsel %vm679_vm10, 1.0, %v4343_v1 }
  0x47   : > { %1545 = vrot.lane.b32.xlu0 %v4493_v8, %s6717_s26  ;;  %v1062_v48 = vmul.f32 %v4707_v40, %v4633_v63 }
  0x4b   : > { %1673 = vrot.lane.b32.xlu1 %v4532_v29, %s6723_s29 }
  0x4e   : > { %1801 = vrot.lane.b32.xlu2 %v1129_v46, %s6719_s18 }
  0x4f   : > { %1897 = vrot.lane.b32.xlu0 %v4548_v36, %s6721_s17 }
  0x53   : > { %2022 = vrot.lane.b32.xlu1 %v4589_v49, %s4351_s19 }
  0x56   : > { %1196 = vrot.lane.b32.xlu2 %v4489_v6, %s6725_s15  ;;  %v4649_v6 = vld [vmem:[%s4485_s20 + $0x38] sm:$0xff] }
  0x57   : > { %1323 = vrot.lane.b32.xlu0 %v1020_v50, %s6715_s28  ;;  %v937_v9 = vrot.slane %v4649_v6, 1  ;;  %v813_v27 = vrot.slane %v4649_v6, 7 }
  0x59   : > { %v4662_v11 = vsel %vm923_vm0, %v935_v53, %v937_v9  ;;  %v4692_v28 = vsel %vm799_vm1, %v811_v62, %v813_v27 }
  0x5b   : > { %1451 = vrot.lane.b32.xlu1 %v4545_v34, %s6713_s16 }
  0x5e   : > { %1547 = vrot.lane.b32.xlu2 %v4519_v23, %s6717_s26 }
  0x5f   : > { %1675 = vrot.lane.b32.xlu0 %v1096_v52, %s6723_s29  ;;  %v815_v52 = vrot.slane %v4680_v20, 7 }
  0x63   : > { %1803 = vrot.lane.b32.xlu1 %v4615_v58, %s6719_s18 }
  0x66   : > { %1899 = vrot.lane.b32.xlu2 %v4578_v45, %s6721_s17 }
  0x67   : > { %2024 = vrot.lane.b32.xlu0 %v1162_v59, %s4351_s19 }
  0x6b   : > { %1198 = vrot.lane.b32.xlu1 %v4493_v8, %s6725_s15 }
  0x6e   : > { %1325 = vrot.lane.b32.xlu2 %v4532_v29, %s6715_s28  ;;  %s6744_s28 = smov 12   ;;  %v4695_v29 = vsel %vm923_vm0, %v937_v9, %v939_v25  ;;  %v552_v9 = vand.u32 15, %v4729_v57 }
  0x6f   : > { %1453 = vrot.lane.b32.xlu0 %v1060_v61, %s6713_s16  ;;  %s6745_s16 = smov 9   ;;  %v1164_v35 = vmul.f32 %v3964_v15, %v4695_v29 }
  0x70   : > { %vm584_vm5 = vcmp.ne.s32.totalorder %v552_v9, 15 }
  0x73   : > { %1549 = vrot.lane.b32.xlu1 %v4548_v36, %s6717_s26  ;;  %s6746_s26 = smov 21  }
  0x76   : > { %1677 = vrot.lane.b32.xlu2 %v4589_v49, %s6723_s29 }
  0x77   : > { %1805 = vrot.lane.b32.xlu0 %v1131_v0, %s6719_s18  ;;  %s6747_s18 = smov 18   ;;  %v941_v0 = vrot.slane %v4723_v55, 1 }
  0x78   : > { %v1670_v8 = vpop.permute.xlu2 %1669 }
  0x79   : > { %v4744_v14 = vsel %vm923_vm0, %v939_v25, %v941_v0 }
  0x7b   : > { %1901 = vrot.lane.b32.xlu1 %v4597_v51, %s6721_s17  ;;  %s6743_s17 = smov 6  }
  0x7e   : > { %2026 = vrot.lane.b32.xlu2 %v4662_v11, %s4351_s19 }
  0x7f   : > { %1200 = vrot.lane.b32.xlu0 %v4519_v23, %s6725_s15  ;;  %v1098_v23 = vmul.f32 %v3964_v15, %v4609_v56 }
  0x80   : > { %v1798_v18 = vpop.permute.xlu2 %1797 }
  0x83   : > { %1327 = vrot.lane.b32.xlu1 %v1022_v17, %s6743_s17 }
  0x86   : > { %1455 = vrot.lane.b32.xlu2 %v4615_v58, %s6745_s16 }
  0x87   : > { %1551 = vrot.lane.b32.xlu0 %v4578_v45, %s6744_s28 }
  0x88   : > { %v1320_v24 = vpop.permute.xlu2 %1319 }
  0x89   : > { %v1193_v22 = vpop.permute.xlu0 %1192 }
  0x8a   : > { %v2115_v39 = vsel %vm2114_vm9, %v890_v37, %v1193_v22  ;;  %v2116_v10 = vsel %vm2114_vm9, 0.0, %v1193_v22 }
  0x8b   : > { %1679 = vrot.lane.b32.xlu1 %v1098_v23, %s6723_s29  ;;  %v2149_v15 = vsel %vm2147_vm12, %v2116_v10, %v1320_v24  ;;  %v3965_v23 = vsel %vm584_vm5, 1.0, %v4343_v1 }
  0x8c   : > { %v1024_v24 = vmul.f32 %v3965_v23, %v4609_v56 }
  0x8d   : > { %v1542_v31 = vpop.permute.xlu1 %1541 }
  0x8e   : > { %1807 = vrot.lane.b32.xlu2 %v4692_v28, %s6747_s18 }
  0x8f   : > { %1903 = vrot.lane.b32.xlu0 %v4649_v6, %s6746_s26 }
  0x90   : > { %v1672_v38 = vpop.permute.xlu2 %1671 }
  0x91   : > { %v1318_v33 = vpop.permute.xlu0 %1317 }
  0x92   : > { %v2148_v42 = vsel %vm2147_vm12, %v2115_v39, %v1318_v33  ;;  %v1100_v39 = vmul.f32 %v3965_v23, %v4695_v29 }
  0x93   : > { %2028 = vrot.lane.b32.xlu1 %v1164_v35, %s4351_s19  ;;  %v817_v35 = vrot.slane %v4723_v55, 7 }
  0x95   : > { %v1446_v43 = vpop.permute.xlu1 %1445 }
  0x96   : > { %v2181_v13 = vsel %vm2180_vm11, %v2148_v42, %v1446_v43  ;;  %1202 = vrot.lane.b32.xlu2 %v4548_v36, %s6725_s15  ;;  %v4726_v36 = vsel %vm799_vm1, %v813_v27, %v815_v52  ;;  %v4772_v42 = vld [vmem:[%s4485_s20 + $0x50] sm:$0xff] }
  0x97   : > { %1329 = vrot.lane.b32.xlu0 %v4589_v49, %s6743_s17  ;;  %v2214_v46 = vsel %vm2213_vm13, %v2181_v13, %v1542_v31  ;;  %v1133_v7 = vmul.f32 %v4707_v40, %v4726_v36  ;;  %v943_v43 = vrot.slane %v4772_v42, 1  ;;  %v521_v13 = vadd.s32 64, %v4476_v2 }
  0x98   : > { %v2247_v50 = vsel %vm2246_vm14, %v2214_v46, %v1670_v8  ;;  %v2021_v53 = vpop.permute.xlu2 %2020 }
  0x99   : > { %v1894_v47 = vpop.permute.xlu0 %1893  ;;  %v2280_v49 = vsel %vm2279_vm15, %v2247_v50, %v1798_v18  ;;  %v4784_v50 = vsel %vm923_vm0, %v941_v0, %v943_v43 }
  0x9a   : > { %v2313_v59 = vsel %vm2312_vm2, %v2280_v49, %v1894_v47  ;;  %v553_v49 = vand.u32 15, %v521_v13 }
  0x9b   : > { %1457 = vrot.lane.b32.xlu1 %v1062_v48, %s6745_s16 }
  0x9c   : > { %vm681_vm6 = vcmp.ne.s32.totalorder %v553_v49, 0 }
  0x9d   : > { %v2019_v61 = vpop.permute.xlu1 %2018 }
  0x9e   : > { %v2346_v62 = vsel %vm2345_vm3, %v2313_v59, %v2019_v61  ;;  %1553 = vrot.lane.b32.xlu2 %v4597_v51, %s6744_s28  ;;  %v1166_v59 = vmul.f32 %v3965_v23, %v4784_v50 }
  0x9f   : > { %1681 = vrot.lane.b32.xlu0 %v4662_v11, %s6723_s29  ;;  %3995 = vmatmul.msk.f32.vlgmr.msra.gmra.mxu0 %vm2381_vm4, %v2346_v62 }
  0xa0   : > { %v1450_v8 = vpop.permute.xlu2 %1449 }
  0xa1   : > { %v1448_v5 = vpop.permute.xlu0 %1447 }
  0xa2   : > { %v2182_v17 = vsel %vm2180_vm11, %v2149_v15, %v1448_v5  ;;  %v819_v15 = vrot.slane %v4772_v42, 7 }
  0xa3   : > { %1809 = vrot.lane.b32.xlu1 %v1133_v7, %s6747_s18  ;;  %v4797_v7 = vsel %vm681_vm6, 1.0, %v4343_v1 }
  0xa4   : > { %v1064_v10 = vmul.f32 %v4797_v7, %v4726_v36 }
  0xa5   : > { %v1544_v16 = vpop.permute.xlu1 %1543 }
  0xa6   : > { %1905 = vrot.lane.b32.xlu2 %v4680_v20, %s6746_s26  ;;  %v2215_v18 = vsel %vm2213_vm13, %v2182_v17, %v1544_v16 }
  0xa7   : > { %2030 = vrot.lane.b32.xlu0 %v4744_v14, %s4351_s19  ;;  %v2248_v27 = vsel %vm2246_vm14, %v2215_v18, %v1672_v38 }
  0xa8   : > { %v1802_v25 = vpop.permute.xlu2 %1801 }
  0xa9   : > { %v1800_v22 = vpop.permute.xlu0 %1799 }
  0xaa   : > { %v2281_v31 = vsel %vm2279_vm15, %v2248_v27, %v1800_v22 }
  0xab   : > { %1204 = vrot.lane.b32.xlu1 %v4578_v45, %s6725_s15  ;;  %v4768_v45 = vsel %vm799_vm1, %v815_v52, %v817_v35 }
  0xad   : > { %v1896_v32 = vpop.permute.xlu1 %1895 }
  0xae   : > { %v2314_v33 = vsel %vm2312_vm2, %v2281_v31, %v1896_v32  ;;  %1331 = vrot.lane.b32.xlu2 %v1024_v24, %s6743_s17  ;;  %v4818_v24 = vld [vmem:[%s4485_s20 + $0x58] sm:$0xff] }
  0xaf   : > { %1459 = vrot.lane.b32.xlu0 %v4692_v28, %s6745_s16  ;;  %v2347_v38 = vsel %vm2345_vm3, %v2314_v33, %v2021_v53  ;;  %v945_v33 = vrot.slane %v4818_v24, 1 }
  0xb0   : > { %3996 = vmatmul.msk.f32.gmra.mxu0 %vm2381_vm4, %v2347_v38  ;;  %v1197_v56 = vpop.permute.xlu2 %1196 }
  0xb1   : > { %v1195_v37 = vpop.permute.xlu0 %1194  ;;  %v2118_v27 = vsel %vm2114_vm9, %v4535_v30, %v1197_v56  ;;  %v4832_v56 = vsel %vm923_vm0, %v943_v43, %v945_v33 }
  0xb2   : > { %v2117_v46 = vsel %vm2114_vm9, %v4511_v19, %v1195_v37 }
  0xb3   : > { %1555 = vrot.lane.b32.xlu1 %v4649_v6, %s6744_s28 }
  0xb5   : > { %v1322_v47 = vpop.permute.xlu1 %1321 }
  0xb6   : > { %1683 = vrot.lane.b32.xlu2 %v1100_v39, %s6723_s29  ;;  %v2150_v52 = vsel %vm2147_vm12, %v2117_v46, %v1322_v47 }
  0xb7   : > { %1811 = vrot.lane.b32.xlu0 %v4768_v45, %s6747_s18  ;;  %v2183_v61 = vsel %vm2180_vm11, %v2150_v52, %v1450_v8 }
  0xb8   : > { %v1548_v53 = vpop.permute.xlu2 %1547 }
  0xb9   : > { %v1546_v48 = vpop.permute.xlu0 %1545 }
  0xba   : > { %v2216_v62 = vsel %vm2213_vm13, %v2183_v61, %v1546_v48 }
  0xbb   : > { %1907 = vrot.lane.b32.xlu1 %v4723_v55, %s6746_s26 }
  0xbd   : > { %v1674_v19 = vpop.permute.xlu1 %1673 }
  0xbe   : > { %2032 = vrot.lane.b32.xlu2 %v1166_v59, %s4351_s19  ;;  %v2249_v0 = vsel %vm2246_vm14, %v2216_v62, %v1674_v19  ;;  %v4845_v59 = vld [vmem:[%s4485_s20 + $0x60] sm:$0xff]  ;;  %v523_v62 = vadd.s32 80, %v4476_v2 }
  0xbf   : > { %1206 = vrot.lane.b32.xlu0 %v4597_v51, %s6725_s15  ;;  %v2282_v8 = vsel %vm2279_vm15, %v2249_v0, %v1802_v25  ;;  %v522_v51 = vadd.s32 72, %v4476_v2  ;;  %v947_v19 = vrot.slane %v4845_v59, 1  ;;  %v821_v0 = vrot.slane %v4818_v24, 7 }
  0xc0   : > { %v1900_v9 = vpop.permute.xlu2 %1899 }
  0xc1   : > { %v1898_v5 = vpop.permute.xlu0 %1897  ;;  %v554_v23 = vand.u32 15, %v522_v51 }
  0xc2   : > { %v2315_v16 = vsel %vm2312_vm2, %v2282_v8, %v1898_v5 }
  0xc3   : > { %1333 = vrot.lane.b32.xlu1 %v4662_v11, %s6743_s17  ;;  %v4813_v11 = vsel %vm799_vm1, %v817_v35, %v819_v15  ;;  %vm586_vm8 = vcmp.ne.s32.totalorder %v554_v23, 15 }
  0xc4   : > { %v1135_v31 = vmul.f32 %v4797_v7, %v4813_v11  ;;  %v3966_v35 = vsel %vm586_vm8, 1.0, %v4343_v1 }
  0xc5   : > { %v2023_v17 = vpop.permute.xlu1 %2022  ;;  %v1026_v13 = vmul.f32 %v3966_v35, %v4695_v29  ;;  %v1102_v61 = vmul.f32 %v3966_v35, %v4784_v50 }
  0xc6   : > { %v2348_v18 = vsel %vm2345_vm3, %v2315_v16, %v2023_v17  ;;  %1461 = vrot.lane.b32.xlu2 %v1064_v10, %s6745_s16  ;;  %v555_v10 = vand.u32 15, %v523_v62  ;;  %v4865_v16 = vsel %vm799_vm1, %v819_v15, %v821_v0 }
  0xc7   : > { %1557 = vrot.lane.b32.xlu0 %v4680_v20, %s6744_s28  ;;  %3997 = vmatmul.msk.f32.gmra.mxu0 %vm2381_vm4, %v2348_v18 }
  0xc8   : > { %v1326_v25 = vpop.permute.xlu2 %1325  ;;  %vm683_vm10 = vcmp.ne.s32.totalorder %v555_v10, 0 }
  0xc9   : > { %v1324_v22 = vpop.permute.xlu0 %1323  ;;  %v4874_v23 = vsel %vm683_vm10, 1.0, %v4343_v1 }
  0xca   : > { %v2151_v32 = vsel %vm2147_vm12, %v2118_v27, %v1324_v22 }
  0xcb   : > { %1685 = vrot.lane.b32.xlu1 %v4744_v14, %s6723_s29 }
  0xcd   : > { %v1452_v37 = vpop.permute.xlu1 %1451 }
  0xce   : > { %1813 = vrot.lane.b32.xlu2 %v1135_v31, %s6747_s18  ;;  %v2184_v30 = vsel %vm2180_vm11, %v2151_v32, %v1452_v37 }
  0xcf   : > { %1909 = vrot.lane.b32.xlu0 %v4772_v42, %s6746_s26  ;;  %v2217_v46 = vsel %vm2213_vm13, %v2184_v30, %v1548_v53 }
  0xd0   : > { %v1678_v39 = vpop.permute.xlu2 %1677 }
  0xd1   : > { %v1676_v38 = vpop.permute.xlu0 %1675 }
  0xd2   : > { %v2250_v47 = vsel %vm2246_vm14, %v2217_v46, %v1676_v38 }
  0xd3   : > { %2034 = vrot.lane.b32.xlu1 %v4832_v56, %s4351_s19 }
  0xd5   : > { %v1804_v48 = vpop.permute.xlu1 %1803 }
  0xd6   : > { %v2283_v52 = vsel %vm2279_vm15, %v2250_v47, %v1804_v48  ;;  %1208 = vrot.lane.b32.xlu2 %v4649_v6, %s6725_s15  ;;  %v894_v6 = vmul.f32 %v4622_v60, %v4515_v21  ;;  %v524_v47 = vadd.s32 88, %v4476_v2 }
  0xd7   : > { %1335 = vrot.lane.b32.xlu0 %v1026_v13, %s6743_s17  ;;  %v2316_v43 = vsel %vm2312_vm2, %v2283_v52, %v1900_v9  ;;  %v4859_v9 = vsel %vm923_vm0, %v945_v33, %v947_v19  ;;  %v823_v33 = vrot.slane %v4845_v59, 7 }
  0xd8   : > { %v2027_v53 = vpop.permute.xlu2 %2026  ;;  %v1168_v21 = vmul.f32 %v3966_v35, %v4859_v9 }
  0xd9   : > { %v2025_v49 = vpop.permute.xlu0 %2024  ;;  %v4889_v38 = vsel %vm799_vm1, %v821_v0, %v823_v33 }
  0xda   : > { %v2349_v29 = vsel %vm2345_vm3, %v2316_v43, %v2025_v49  ;;  %v1137_v46 = vmul.f32 %v4874_v23, %v4889_v38  ;;  %v4906_v43 = vld [vmem:[%s4485_s20 + $0x68] sm:$0xff] }
  0xdb   : > { %3998 = vmatmul.msk.f32.gmra.mxu0 %vm2381_vm4, %v2349_v29  ;;  %1463 = vrot.lane.b32.xlu1 %v4768_v45, %s6745_s16 }
  0xdd   : > { %v1199_v5 = vpop.permute.xlu1 %1198 }
  0xde   : > { %1559 = vrot.lane.b32.xlu2 %v4723_v55, %s6744_s28  ;;  %v2119_v51 = vsel %vm2114_vm9, %v894_v6, %v1199_v5 }
  0xdf   : > { %1687 = vrot.lane.b32.xlu0 %v1102_v61, %s6723_s29  ;;  %v2152_v60 = vsel %vm2147_vm12, %v2119_v51, %v1326_v25  ;;  %v1066_v25 = vmul.f32 %v4874_v23, %v4813_v11  ;;  %v949_v61 = vrot.slane %v4906_v43, 1 }
  0xe0   : > { %v1456_v17 = vpop.permute.xlu2 %1455 }
  0xe1   : > { %v1454_v8 = vpop.permute.xlu0 %1453 }
  0xe2   : > { %v2185_v22 = vsel %vm2180_vm11, %v2152_v60, %v1454_v8 }
  0xe3   : > { %1815 = vrot.lane.b32.xlu1 %v4865_v16, %s6747_s18 }
  0xe5   : > { %v1550_v18 = vpop.permute.xlu1 %1549 }
  0xe6   : > { %1911 = vrot.lane.b32.xlu2 %v4818_v24, %s6746_s26  ;;  %v2218_v15 = vsel %vm2213_vm13, %v2185_v22, %v1550_v18  ;;  %v4932_v18 = vld [vmem:[%s4485_s20 + $0x70] sm:$0xff] }
  0xe7   : > { %2036 = vrot.lane.b32.xlu0 %v1168_v21, %s4351_s19  ;;  %v2251_v32 = vsel %vm2246_vm14, %v2218_v15, %v1678_v39 }
  0xe8   : > { %v1808_v31 = vpop.permute.xlu2 %1807 }
  0xe9   : > { %v1806_v27 = vpop.permute.xlu0 %1805 }
  0xea   : > { %v2284_v37 = vsel %vm2279_vm15, %v2251_v32, %v1806_v27  ;;  %v951_v27 = vrot.slane %v4932_v18, 1  ;;  %v525_v32 = vadd.s32 96, %v4476_v2 }
  0xeb   : > { %1210 = vrot.lane.b32.xlu1 %v4680_v20, %s6725_s15 }
  0xed   : > { %v1902_v35 = vpop.permute.xlu1 %1901 }
  0xee   : > { %v2317_v30 = vsel %vm2312_vm2, %v2284_v37, %v1902_v35  ;;  %1337 = vrot.lane.b32.xlu2 %v4744_v14, %s6743_s17  ;;  %v556_v14 = vand.u32 15, %v524_v47  ;;  %v4949_v35 = vsel %vm923_vm0, %v949_v61, %v951_v27 }
  0xef   : > { %1465 = vrot.lane.b32.xlu0 %v1066_v25, %s6745_s16  ;;  %v2350_v13 = vsel %vm2345_vm3, %v2317_v30, %v2027_v53 }
  0xf0   : > { %3999 = vmatmul.msk.f32.gmra.mxu0 %vm2381_vm4, %v2350_v13  ;;  %v1203_v20 = vpop.permute.xlu2 %1202  ;;  %vm588_vm5 = vcmp.ne.s32.totalorder %v556_v14, 15 }
  0xf1   : > { %v1201_v39 = vpop.permute.xlu0 %1200  ;;  %v3967_v6 = vsel %vm588_vm5, 1.0, %v4343_v1 }
  0xf2   : > { %v2120_v48 = vsel %vm2114_vm9, %v4545_v34, %v1201_v39  ;;  %v4914_v34 = vsel %vm923_vm0, %v947_v19, %v949_v61  ;;  %v1028_v51 = vmul.f32 %v3967_v6, %v4784_v50  ;;  %v1104_v15 = vmul.f32 %v3967_v6, %v4859_v9 }
  0xf3   : > { %1561 = vrot.lane.b32.xlu1 %v4772_v42, %s6744_s28  ;;  %v557_v39 = vand.u32 15, %v525_v32 }
  0xf5   : > { %v1328_v52 = vpop.permute.xlu1 %1327  ;;  %vm685_vm6 = vcmp.ne.s32.totalorder %v557_v39, 0 }
  0xf6   : > { %1689 = vrot.lane.b32.xlu2 %v4832_v56, %s6723_s29  ;;  %v2153_v29 = vsel %vm2147_vm12, %v2120_v48, %v1328_v52  ;;  %v4960_v48 = vsel %vm685_vm6, 1.0, %v4343_v1 }
  0xf7   : > { %1817 = vrot.lane.b32.xlu0 %v1137_v46, %s6747_s18  ;;  %v2186_v62 = vsel %vm2180_vm11, %v2153_v29, %v1456_v17  ;;  %v1170_v46 = vmul.f32 %v3967_v6, %v4949_v35  ;;  %v1068_v61 = vmul.f32 %v4960_v48, %v4889_v38  ;;  %v827_v6 = vrot.slane %v4932_v18, 7 }
  0xf8   : > { %v1554_v53 = vpop.permute.xlu2 %1553 }
  0xf9   : > { %v1552_v49 = vpop.permute.xlu0 %1551 }
  0xfa   : > { %v2219_v5 = vsel %vm2213_vm13, %v2186_v62, %v1552_v49 }
  0xfb   : > { %1913 = vrot.lane.b32.xlu1 %v4845_v59, %s6746_s26 }
  0xfd   : > { %v1680_v0 = vpop.permute.xlu1 %1679 }
  0xfe   : > { %2038 = vrot.lane.b32.xlu2 %v4914_v34, %s4351_s19  ;;  %v2252_v8 = vsel %vm2246_vm14, %v2219_v5, %v1680_v0 }
  0xff   : > { %1212 = vrot.lane.b32.xlu0 %v4723_v55, %s6725_s15  ;;  %v2285_v19 = vsel %vm2279_vm15, %v2252_v8, %v1808_v31  ;;  %v896_v55 = vmul.f32 %v4707_v40, %v4575_v44  ;;  %v825_v44 = vrot.slane %v4906_v43, 7 }
 0x100   : > { %v1906_v17 = vpop.permute.xlu2 %1905 }
 0x101   : > { %v1904_v10 = vpop.permute.xlu0 %1903  ;;  %v2121_v25 = vsel %vm2114_vm9, %v896_v55, %v1203_v20  ;;  %v4945_v40 = vsel %vm799_vm1, %v823_v33, %v825_v44  ;;  %v4979_v5 = vsel %vm799_vm1, %v825_v44, %v827_v6 }
 0x102   : > { %v2318_v21 = vsel %vm2312_vm2, %v2285_v19, %v1904_v10 }
 0x103   : > { %1339 = vrot.lane.b32.xlu1 %v1028_v51, %s6743_s17 }
 0x105   : > { %v2029_v60 = vpop.permute.xlu1 %2028 }
 0x106   : > { %v2351_v22 = vsel %vm2345_vm3, %v2318_v21, %v2029_v60  ;;  %1467 = vrot.lane.b32.xlu2 %v4865_v16, %s6745_s16 }
 0x107   : > { %1563 = vrot.lane.b32.xlu0 %v4818_v24, %s6744_s28  ;;  %4000 = vmatmul.msk.f32.gmra.mxu0 %vm2381_vm4, %v2351_v22 }
 0x108   : > { %v1332_v31 = vpop.permute.xlu2 %1331 }
 0x109   : > { %v1330_v50 = vpop.permute.xlu0 %1329 }
 0x10a   : > { %v2154_v37 = vsel %vm2147_vm12, %v2121_v25, %v1330_v50 }
 0x10b   : > { %1691 = vrot.lane.b32.xlu1 %v1104_v15, %s6723_s29 }
 0x10d   : > { %v1458_v30 = vpop.permute.xlu1 %1457 }
 0x10e   : > { %1819 = vrot.lane.b32.xlu2 %v4945_v40, %s6747_s18  ;;  %v2187_v13 = vsel %vm2180_vm11, %v2154_v37, %v1458_v30 }
 0x10f   : > { %1915 = vrot.lane.b32.xlu0 %v4906_v43, %s6746_s26  ;;  %v2220_v47 = vsel %vm2213_vm13, %v2187_v13, %v1554_v53 }
 0x110   : > { %v1684_v33 = vpop.permute.xlu2 %1683 }
 0x111   : > { %v1682_v20 = vpop.permute.xlu0 %1681 }
 0x112   : > { %v2253_v52 = vsel %vm2246_vm14, %v2220_v47, %v1682_v20 }
 0x113   : > { %2040 = vrot.lane.b32.xlu1 %v1170_v46, %s4351_s19 }
 0x115   : > { %v1810_v14 = vpop.permute.xlu1 %1809 }
 0x116   : > { %v2286_v49 = vsel %vm2279_vm15, %v2253_v52, %v1810_v14  ;;  %1214 = vrot.lane.b32.xlu2 %v4772_v42, %s6725_s15  ;;  %v526_v42 = vadd.s32 104, %v4476_v2  ;;  %v5022_v52 = vld [vmem:[%s4485_s20 + $0x80] sm:$0xff] }
 0x117   : > { %1341 = vrot.lane.b32.xlu0 %v4832_v56, %s6743_s17  ;;  %v2319_v29 = vsel %vm2312_vm2, %v2286_v49, %v1906_v17  ;;  %v4976_v56 = vld [vmem:[%s4485_s20 + $0x78] sm:$0xff]  ;;  %v1139_v17 = vmul.f32 %v4960_v48, %v4979_v5  ;;  %v955_v14 = vrot.slane %v5022_v52, 1  ;;  %v527_v49 = vadd.s32 112, %v4476_v2 }
 0x118   : > { %v2033_v0 = vpop.permute.xlu2 %2032  ;;  %v953_v10 = vrot.slane %v4976_v56, 1  ;;  %v558_v60 = vand.u32 15, %v526_v42  ;;  %v829_v13 = vrot.slane %v4976_v56, 7 }
 0x119   : > { %v2031_v53 = vpop.permute.xlu0 %2030 }
 0x11a   : > { %v2352_v62 = vsel %vm2345_vm3, %v2319_v29, %v2031_v53  ;;  %v4992_v55 = vsel %vm923_vm0, %v951_v27, %v953_v10  ;;  %vm590_vm8 = vcmp.ne.s32.totalorder %v558_v60, 15 }
 0x11b   : > { %4001 = vmatmul.msk.f32.gmra.mxu0 %vm2381_vm4, %v2352_v62  ;;  %1469 = vrot.lane.b32.xlu1 %v1068_v61, %s6745_s16  ;;  %v3968_v27 = vsel %vm590_vm8, 1.0, %v4343_v1 }
 0x11c   : > { %v1030_v44 = vmul.f32 %v3968_v27, %v4859_v9  ;;  %v1106_v47 = vmul.f32 %v3968_v27, %v4949_v35 }
 0x11d   : > { %v1205_v8 = vpop.permute.xlu1 %1204 }
 0x11e   : > { %1565 = vrot.lane.b32.xlu2 %v4845_v59, %s6744_s28  ;;  %v2122_v19 = vsel %vm2114_vm9, %v4615_v58, %v1205_v8 }
 0x11f   : > { %1693 = vrot.lane.b32.xlu0 %v4914_v34, %s6723_s29  ;;  %v2155_v22 = vsel %vm2147_vm12, %v2122_v19, %v1332_v31 }
 0x120   : > { %v1462_v21 = vpop.permute.xlu2 %1461 }
 0x121   : > { %v1460_v51 = vpop.permute.xlu0 %1459 }
 0x122   : > { %v2188_v15 = vsel %vm2180_vm11, %v2155_v22, %v1460_v51 }
 0x123   : > { %1821 = vrot.lane.b32.xlu1 %v1139_v17, %s6747_s18 }
 0x125   : > { %v1556_v50 = vpop.permute.xlu1 %1555 }
 0x126   : > { %1917 = vrot.lane.b32.xlu2 %v4932_v18, %s6746_s26  ;;  %v2221_v58 = vsel %vm2213_vm13, %v2188_v15, %v1556_v50  ;;  %v831_v50 = vrot.slane %v5022_v52, 7 }
 0x127   : > { %2042 = vrot.lane.b32.xlu0 %v4992_v55, %s4351_s19  ;;  %v2254_v31 = vsel %vm2246_vm14, %v2221_v58, %v1684_v33  ;;  %v5018_v33 = vsel %vm799_vm1, %v827_v6, %v829_v13  ;;  %v559_v6 = vand.u32 15, %v527_v49 }
 0x128   : > { %v1814_v32 = vpop.permute.xlu2 %1813 }
 0x129   : > { %v1812_v25 = vpop.permute.xlu0 %1811  ;;  %vm687_vm10 = vcmp.ne.s32.totalorder %v559_v6, 0 }
 0x12a   : > { %v2287_v37 = vsel %vm2279_vm15, %v2254_v31, %v1812_v25  ;;  %v5046_v19 = vsel %vm687_vm10, 1.0, %v4343_v1 }
 0x12b   : > { %1216 = vrot.lane.b32.xlu1 %v4818_v24, %s6725_s15  ;;  %v898_v24 = vmul.f32 %v4797_v7, %v4633_v63  ;;  %v5033_v7 = vsel %vm923_vm0, %v953_v10, %v955_v14  ;;  %v1070_v22 = vmul.f32 %v5046_v19, %v4979_v5 }
 0x12d   : > { %v1908_v30 = vpop.permute.xlu1 %1907 }
 0x12e   : > { %v2320_v39 = vsel %vm2312_vm2, %v2287_v37, %v1908_v30  ;;  %1343 = vrot.lane.b32.xlu2 %v1030_v44, %s6743_s17  ;;  %v5067_v37 = vld [vmem:[%s4485_s20 + $0x88] sm:$0xff] }
 0x12f   : > { %1471 = vrot.lane.b32.xlu0 %v4945_v40, %s6745_s16  ;;  %v2353_v46 = vsel %vm2345_vm3, %v2320_v39, %v2033_v0  ;;  %v1172_v0 = vmul.f32 %v3968_v27, %v5033_v7 }
 0x130   : > { %4002 = vmatmul.msk.f32.gmra.mxu0 %vm2381_vm4, %v2353_v46  ;;  %v1209_v9 = vpop.permute.xlu2 %1208 }
 0x131   : > { %v1207_v20 = vpop.permute.xlu0 %1206  ;;  %v2124_v44 = vsel %vm2114_vm9, %v4692_v28, %v1209_v9 }
 0x132   : > { %v2123_v29 = vsel %vm2114_vm9, %v898_v24, %v1207_v20  ;;  %v957_v20 = vrot.slane %v5067_v37, 1 }
 0x133   : > { %1567 = vrot.lane.b32.xlu1 %v4906_v43, %s6744_s28 }
 0x134   : > { %v5081_v24 = vsel %vm923_vm0, %v955_v14, %v957_v20 }
 0x135   : > { %v1334_v53 = vpop.permute.xlu1 %1333 }
 0x136   : > { %1695 = vrot.lane.b32.xlu2 %v1106_v47, %s6723_s29  ;;  %v2156_v61 = vsel %vm2147_vm12, %v2123_v29, %v1334_v53 }
 0x137   : > { %1823 = vrot.lane.b32.xlu0 %v5018_v33, %s6747_s18  ;;  %v2189_v42 = vsel %vm2180_vm11, %v2156_v61, %v1462_v21 }
 0x138   : > { %v1560_v62 = vpop.permute.xlu2 %1559 }
 0x139   : > { %v1558_v63 = vpop.permute.xlu0 %1557 }
 0x13a   : > { %v2222_v51 = vsel %vm2213_vm13, %v2189_v42, %v1558_v63 }
 0x13b   : > { %1919 = vrot.lane.b32.xlu1 %v4976_v56, %s6746_s26 }
 0x13d   : > { %v1686_v8 = vpop.permute.xlu1 %1685 }
 0x13e   : > { %2044 = vrot.lane.b32.xlu2 %v1172_v0, %s4351_s19  ;;  %v2255_v10 = vsel %vm2246_vm14, %v2222_v51, %v1686_v8  ;;  %v5094_v0 = vld [vmem:[%s4485_s20 + $0x90] sm:$0xff]  ;;  %v529_v51 = vadd.s32 128, %v4476_v2 }
 0x13f   : > { %1218 = vrot.lane.b32.xlu0 %v4845_v59, %s6725_s15  ;;  %v2288_v21 = vsel %vm2279_vm15, %v2255_v10, %v1814_v32  ;;  %v528_v59 = vadd.s32 120, %v4476_v2  ;;  %v959_v8 = vrot.slane %v5094_v0, 1  ;;  %v833_v10 = vrot.slane %v5067_v37, 7 }
 0x140   : > { %v1912_v60 = vpop.permute.xlu2 %1911 }
 0x141   : > { %v1910_v17 = vpop.permute.xlu0 %1909  ;;  %v560_v32 = vand.u32 15, %v528_v59 }
 0x142   : > { %v2321_v15 = vsel %vm2312_vm2, %v2288_v21, %v1910_v17 }
 0x143   : > { %1345 = vrot.lane.b32.xlu1 %v4914_v34, %s6743_s17  ;;  %v5062_v34 = vsel %vm799_vm1, %v829_v13, %v831_v50  ;;  %vm592_vm5 = vcmp.ne.s32.totalorder %v560_v32, 15 }
 0x144   : > { %v1141_v30 = vmul.f32 %v5046_v19, %v5062_v34  ;;  %v3969_v13 = vsel %vm592_vm5, 1.0, %v4343_v1 }
 0x145   : > { %v2035_v58 = vpop.permute.xlu1 %2034  ;;  %v1032_v49 = vmul.f32 %v3969_v13, %v4949_v35  ;;  %v1108_v42 = vmul.f32 %v3969_v13, %v5033_v7 }
 0x146   : > { %v2354_v25 = vsel %vm2345_vm3, %v2321_v15, %v2035_v58  ;;  %1473 = vrot.lane.b32.xlu2 %v1070_v22, %s6745_s16  ;;  %v561_v22 = vand.u32 15, %v529_v51  ;;  %v5114_v15 = vsel %vm799_vm1, %v831_v50, %v833_v10 }
 0x147   : > { %1569 = vrot.lane.b32.xlu0 %v4932_v18, %s6744_s28  ;;  %4003 = vmatmul.msk.f32.gmra.mxu0 %vm2381_vm4, %v2354_v25 }
 0x148   : > { %v1338_v31 = vpop.permute.xlu2 %1337  ;;  %vm689_vm6 = vcmp.ne.s32.totalorder %v561_v22, 0 }
 0x149   : > { %v1336_v27 = vpop.permute.xlu0 %1335  ;;  %v5123_v32 = vsel %vm689_vm6, 1.0, %v4343_v1 }
 0x14a   : > { %v2157_v39 = vsel %vm2147_vm12, %v2124_v44, %v1336_v27 }
 0x14b   : > { %1697 = vrot.lane.b32.xlu1 %v4992_v55, %s6723_s29 }
 0x14d   : > { %v1464_v46 = vpop.permute.xlu1 %1463 }
 0x14e   : > { %1825 = vrot.lane.b32.xlu2 %v1141_v30, %s6747_s18  ;;  %v2190_v28 = vsel %vm2180_vm11, %v2157_v39, %v1464_v46 }
 0x14f   : > { %1921 = vrot.lane.b32.xlu0 %v5022_v52, %s6746_s26  ;;  %v2223_v29 = vsel %vm2213_vm13, %v2190_v28, %v1560_v62 }
 0x150   : > { %v1690_v47 = vpop.permute.xlu2 %1689 }
 0x151   : > { %v1688_v9 = vpop.permute.xlu0 %1687 }
 0x152   : > { %v2256_v53 = vsel %vm2246_vm14, %v2223_v29, %v1688_v9 }
 0x153   : > { %2046 = vrot.lane.b32.xlu1 %v5081_v24, %s4351_s19 }
 0x155   : > { %v1816_v63 = vpop.permute.xlu1 %1815 }
 0x156   : > { %v2289_v61 = vsel %vm2279_vm15, %v2256_v53, %v1816_v63  ;;  %1220 = vrot.lane.b32.xlu2 %v4906_v43, %s6725_s15  ;;  %v900_v43 = vmul.f32 %v4874_v23, %v4726_v36  ;;  %v530_v53 = vadd.s32 136, %v4476_v2 }
 0x157   : > { %1347 = vrot.lane.b32.xlu0 %v1032_v49, %s6743_s17  ;;  %v2322_v14 = vsel %vm2312_vm2, %v2289_v61, %v1912_v60  ;;  %v5108_v60 = vsel %vm923_vm0, %v957_v20, %v959_v8  ;;  %v835_v20 = vrot.slane %v5094_v0, 7 }
 0x158   : > { %v2039_v62 = vpop.permute.xlu2 %2038  ;;  %v1174_v36 = vmul.f32 %v3969_v13, %v5108_v60 }
 0x159   : > { %v2037_v6 = vpop.permute.xlu0 %2036  ;;  %v5138_v9 = vsel %vm799_vm1, %v833_v10, %v835_v20 }
 0x15a   : > { %v2355_v35 = vsel %vm2345_vm3, %v2322_v14, %v2037_v6  ;;  %v1143_v29 = vmul.f32 %v5123_v32, %v5138_v9  ;;  %v5155_v14 = vld [vmem:[%s4485_s20 + $0x98] sm:$0xff] }
 0x15b   : > { %4004 = vmatmul.msk.f32.gmra.mxu0 %vm2381_vm4, %v2355_v35  ;;  %1475 = vrot.lane.b32.xlu1 %v5018_v33, %s6745_s16 }
 0x15d   : > { %v1211_v17 = vpop.permute.xlu1 %1210 }
 0x15e   : > { %1571 = vrot.lane.b32.xlu2 %v4976_v56, %s6744_s28  ;;  %v2125_v59 = vsel %vm2114_vm9, %v900_v43, %v1211_v17 }
 0x15f   : > { %1699 = vrot.lane.b32.xlu0 %v1108_v42, %s6723_s29  ;;  %v2158_v23 = vsel %vm2147_vm12, %v2125_v59, %v1338_v31  ;;  %v1072_v31 = vmul.f32 %v5123_v32, %v5062_v34  ;;  %v961_v42 = vrot.slane %v5155_v14, 1 }
 0x160   : > { %v1468_v58 = vpop.permute.xlu2 %1467 }
 0x161   : > { %v1466_v21 = vpop.permute.xlu0 %1465 }
 0x162   : > { %v2191_v27 = vsel %vm2180_vm11, %v2158_v23, %v1466_v21 }
 0x163   : > { %1827 = vrot.lane.b32.xlu1 %v5114_v15, %s6747_s18 }
 0x165   : > { %v1562_v25 = vpop.permute.xlu1 %1561 }
 0x166   : > { %1923 = vrot.lane.b32.xlu2 %v5067_v37, %s6746_s26  ;;  %v2224_v50 = vsel %vm2213_vm13, %v2191_v27, %v1562_v25  ;;  %v5181_v25 = vld [vmem:[%s4485_s20 + $0xa0] sm:$0xff] }
 0x167   : > { %2048 = vrot.lane.b32.xlu0 %v1174_v36, %s4351_s19  ;;  %v2257_v39 = vsel %vm2246_vm14, %v2224_v50, %v1690_v47 }
 0x168   : > { %v1820_v30 = vpop.permute.xlu2 %1819 }
 0x169   : > { %v1818_v44 = vpop.permute.xlu0 %1817 }
 0x16a   : > { %v2290_v46 = vsel %vm2279_vm15, %v2257_v39, %v1818_v44  ;;  %v963_v44 = vrot.slane %v5181_v25, 1  ;;  %v837_v39 = vrot.slane %v5155_v14, 7 }
 0x16b   : > { %1222 = vrot.lane.b32.xlu1 %v4932_v18, %s6725_s15 }
 0x16d   : > { %v1914_v13 = vpop.permute.xlu1 %1913 }
 0x16e   : > { %v2323_v28 = vsel %vm2312_vm2, %v2290_v46, %v1914_v13  ;;  %1349 = vrot.lane.b32.xlu2 %v4992_v55, %s6743_s17  ;;  %v562_v55 = vand.u32 15, %v530_v53  ;;  %v5198_v13 = vsel %vm923_vm0, %v961_v42, %v963_v44 }
 0x16f   : > { %1477 = vrot.lane.b32.xlu0 %v1072_v31, %s6745_s16  ;;  %v2356_v49 = vsel %vm2345_vm3, %v2323_v28, %v2039_v62 }
 0x170   : > { %4005 = vmatmul.msk.f32.gmra.mxu0 %vm2381_vm4, %v2356_v49  ;;  %v1215_v18 = vpop.permute.xlu2 %1214  ;;  %vm594_vm8 = vcmp.ne.s32.totalorder %v562_v55, 15 }
 0x171   : > { %v1213_v47 = vpop.permute.xlu0 %1212  ;;  %v3970_v43 = vsel %vm594_vm8, 1.0, %v4343_v1 }
 0x172   : > { %v2126_v63 = vsel %vm2114_vm9, %v4768_v45, %v1213_v47  ;;  %v5163_v45 = vsel %vm923_vm0, %v959_v8, %v961_v42  ;;  %v1034_v59 = vmul.f32 %v3970_v43, %v5033_v7  ;;  %v1110_v50 = vmul.f32 %v3970_v43, %v5108_v60 }
 0x173   : > { %1573 = vrot.lane.b32.xlu1 %v5022_v52, %s6744_s28 }
 0x175   : > { %v1340_v61 = vpop.permute.xlu1 %1339 }
 0x176   : > { %1701 = vrot.lane.b32.xlu2 %v5081_v24, %s6723_s29  ;;  %v2159_v35 = vsel %vm2147_vm12, %v2126_v63, %v1340_v61 }
 0x177   : > { %1829 = vrot.lane.b32.xlu0 %v1143_v29, %s6747_s18  ;;  %v2192_v51 = vsel %vm2180_vm11, %v2159_v35, %v1468_v58  ;;  %v1176_v29 = vmul.f32 %v3970_v43, %v5198_v13  ;;  %v839_v43 = vrot.slane %v5181_v25, 7 }
 0x178   : > { %v1566_v62 = vpop.permute.xlu2 %1565 }
 0x179   : > { %v1564_v6 = vpop.permute.xlu0 %1563 }
 0x17a   : > { %v2225_v17 = vsel %vm2213_vm13, %v2192_v51, %v1564_v6 }
 0x17b   : > { %1925 = vrot.lane.b32.xlu1 %v5094_v0, %s6746_s26 }
 0x17d   : > { %v1692_v10 = vpop.permute.xlu1 %1691 }
 0x17e   : > { %2050 = vrot.lane.b32.xlu2 %v5163_v45, %s4351_s19  ;;  %v2258_v21 = vsel %vm2246_vm14, %v2225_v17, %v1692_v10  ;;  %v5228_v17 = vsel %vm799_vm1, %v837_v39, %v839_v43 }
 0x17f   : > { %1224 = vrot.lane.b32.xlu0 %v4976_v56, %s6725_s15  ;;  %v2291_v8 = vsel %vm2279_vm15, %v2258_v21, %v1820_v30  ;;  %v902_v56 = vmul.f32 %v4960_v48, %v4813_v11  ;;  %v531_v11 = vadd.s32 144, %v4476_v2  ;;  %v5194_v48 = vsel %vm799_vm1, %v835_v20, %v837_v39 }
 0x180   : > { %v1918_v58 = vpop.permute.xlu2 %1917 }
 0x181   : > { %v1916_v22 = vpop.permute.xlu0 %1915  ;;  %v2127_v31 = vsel %vm2114_vm9, %v902_v56, %v1215_v18  ;;  %v563_v47 = vand.u32 15, %v531_v11 }
 0x182   : > { %v2324_v36 = vsel %vm2312_vm2, %v2291_v8, %v1916_v22 }
 0x183   : > { %1351 = vrot.lane.b32.xlu1 %v1034_v59, %s6743_s17  ;;  %vm691_vm10 = vcmp.ne.s32.totalorder %v563_v47, 0 }
 0x184   : > { %v5209_v63 = vsel %vm691_vm10, 1.0, %v4343_v1 }
 0x185   : > { %v2041_v23 = vpop.permute.xlu1 %2040  ;;  %v1074_v42 = vmul.f32 %v5209_v63, %v5138_v9 }
 0x186   : > { %v2357_v27 = vsel %vm2345_vm3, %v2324_v36, %v2041_v23  ;;  %1479 = vrot.lane.b32.xlu2 %v5114_v15, %s6745_s16 }
 0x187   : > { %1575 = vrot.lane.b32.xlu0 %v5067_v37, %s6744_s28  ;;  %4006 = vmatmul.msk.f32.gmra.mxu0 %vm2381_vm4, %v2357_v27 }
 0x188   : > { %v1344_v30 = vpop.permute.xlu2 %1343 }
 0x189   : > { %v1342_v7 = vpop.permute.xlu0 %1341 }
 0x18a   : > { %v2160_v46 = vsel %vm2147_vm12, %v2127_v31, %v1342_v7 }
 0x18b   : > { %1703 = vrot.lane.b32.xlu1 %v1110_v50, %s6723_s29 }
 0x18d   : > { %v1470_v28 = vpop.permute.xlu1 %1469 }
 0x18e   : > { %1831 = vrot.lane.b32.xlu2 %v5194_v48, %s6747_s18  ;;  %v2193_v49 = vsel %vm2180_vm11, %v2160_v46, %v1470_v28 }
 0x18f   : > { %1927 = vrot.lane.b32.xlu0 %v5155_v14, %s6746_s26  ;;  %v2226_v53 = vsel %vm2213_vm13, %v2193_v49, %v1566_v62 }
 0x190   : > { %v1696_v20 = vpop.permute.xlu2 %1695 }
 0x191   : > { %v1694_v18 = vpop.permute.xlu0 %1693 }
 0x192   : > { %v2259_v61 = vsel %vm2246_vm14, %v2226_v53, %v1694_v18 }
 0x193   : > { %2052 = vrot.lane.b32.xlu1 %v1176_v29, %s4351_s19 }
 0x195   : > { %v1822_v55 = vpop.permute.xlu1 %1821 }
 0x196   : > { %v2292_v6 = vsel %vm2279_vm15, %v2259_v61, %v1822_v55  ;;  %1226 = vrot.lane.b32.xlu2 %v5022_v52, %s6725_s15  ;;  %v532_v52 = vadd.s32 152, %v4476_v2  ;;  %v5271_v61 = vld [vmem:[%s4485_s20 + $0xb0] sm:$0xff] }
 0x197   : > { %1353 = vrot.lane.b32.xlu0 %v5081_v24, %s6743_s17  ;;  %v2325_v35 = vsel %vm2312_vm2, %v2292_v6, %v1918_v58  ;;  %v5225_v24 = vld [vmem:[%s4485_s20 + $0xa8] sm:$0xff]  ;;  %v1145_v58 = vmul.f32 %v5209_v63, %v5228_v17  ;;  %v967_v55 = vrot.slane %v5271_v61, 1  ;;  %v533_v6 = vadd.s32 160, %v4476_v2 }
 0x198   : > { %v2045_v10 = vpop.permute.xlu2 %2044  ;;  %v965_v22 = vrot.slane %v5225_v24, 1  ;;  %v564_v23 = vand.u32 15, %v532_v52  ;;  %v841_v49 = vrot.slane %v5225_v24, 7 }
 0x199   : > { %v2043_v62 = vpop.permute.xlu0 %2042 }
 0x19a   : > { %v2358_v51 = vsel %vm2345_vm3, %v2325_v35, %v2043_v62  ;;  %v5241_v56 = vsel %vm923_vm0, %v963_v44, %v965_v22  ;;  %vm596_vm5 = vcmp.ne.s32.totalorder %v564_v23, 15 }
 0x19b   : > { %4007 = vmatmul.msk.f32.gmra.mxu0 %vm2381_vm4, %v2358_v51  ;;  %1481 = vrot.lane.b32.xlu1 %v1074_v42, %s6745_s16  ;;  %v3971_v44 = vsel %vm596_vm5, 1.0, %v4343_v1 }
 0x19c   : > { %v1036_v11 = vmul.f32 %v3971_v44, %v5108_v60  ;;  %v1112_v53 = vmul.f32 %v3971_v44, %v5198_v13 }
 0x19d   : > { %v1217_v21 = vpop.permute.xlu1 %1216 }
 0x19e   : > { %1577 = vrot.lane.b32.xlu2 %v5094_v0, %s6744_s28  ;;  %v2128_v8 = vsel %vm2114_vm9, %v4865_v16, %v1217_v21 }
 0x19f   : > { %1705 = vrot.lane.b32.xlu0 %v5163_v45, %s6723_s29  ;;  %v2161_v27 = vsel %vm2147_vm12, %v2128_v8, %v1344_v30 }
 0x1a0   : > { %v1474_v36 = vpop.permute.xlu2 %1473 }
 0x1a1   : > { %v1472_v59 = vpop.permute.xlu0 %1471 }
 0x1a2   : > { %v2194_v50 = vsel %vm2180_vm11, %v2161_v27, %v1472_v59 }
 0x1a3   : > { %1833 = vrot.lane.b32.xlu1 %v1145_v58, %s6747_s18 }
 0x1a5   : > { %v1568_v7 = vpop.permute.xlu1 %1567 }
 0x1a6   : > { %1929 = vrot.lane.b32.xlu2 %v5181_v25, %s6746_s26  ;;  %v2227_v16 = vsel %vm2213_vm13, %v2194_v50, %v1568_v7  ;;  %v843_v7 = vrot.slane %v5271_v61, 7 }
 0x1a7   : > { %2054 = vrot.lane.b32.xlu0 %v5241_v56, %s4351_s19  ;;  %v2260_v30 = vsel %vm2246_vm14, %v2227_v16, %v1696_v20  ;;  %v5267_v20 = vsel %vm799_vm1, %v839_v43, %v841_v49  ;;  %v565_v43 = vand.u32 15, %v533_v6 }
 0x1a8   : > { %v1826_v39 = vpop.permute.xlu2 %1825 }
 0x1a9   : > { %v1824_v31 = vpop.permute.xlu0 %1823  ;;  %vm693_vm6 = vcmp.ne.s32.totalorder %v565_v43, 0 }
 0x1aa   : > { %v2293_v46 = vsel %vm2279_vm15, %v2260_v30, %v1824_v31  ;;  %v5295_v8 = vsel %vm693_vm6, 1.0, %v4343_v1 }
 0x1ab   : > { %1228 = vrot.lane.b32.xlu1 %v5067_v37, %s6725_s15  ;;  %v904_v37 = vmul.f32 %v5046_v19, %v4889_v38  ;;  %v5282_v19 = vsel %vm923_vm0, %v965_v22, %v967_v55  ;;  %v1076_v27 = vmul.f32 %v5295_v8, %v5228_v17 }
 0x1ad   : > { %v1920_v28 = vpop.permute.xlu1 %1919 }
 0x1ae   : > { %v2326_v47 = vsel %vm2312_vm2, %v2293_v46, %v1920_v28  ;;  %1355 = vrot.lane.b32.xlu2 %v1036_v11, %s6743_s17  ;;  %v5316_v46 = vld [vmem:[%s4485_s20 + $0xb8] sm:$0xff] }
 0x1af   : > { %1483 = vrot.lane.b32.xlu0 %v5194_v48, %s6745_s16  ;;  %v2359_v29 = vsel %vm2345_vm3, %v2326_v47, %v2045_v10  ;;  %v1178_v10 = vmul.f32 %v3971_v44, %v5282_v19 }
 0x1b0   : > { %4008 = vmatmul.msk.f32.gmra.mxu0 %vm2381_vm4, %v2359_v29  ;;  %v1221_v60 = vpop.permute.xlu2 %1220 }
 0x1b1   : > { %v1219_v18 = vpop.permute.xlu0 %1218  ;;  %v2130_v11 = vsel %vm2114_vm9, %v4945_v40, %v1221_v60 }
 0x1b2   : > { %v2129_v35 = vsel %vm2114_vm9, %v904_v37, %v1219_v18  ;;  %v969_v18 = vrot.slane %v5316_v46, 1 }
 0x1b3   : > { %1579 = vrot.lane.b32.xlu1 %v5155_v14, %s6744_s28 }
 0x1b4   : > { %v5330_v37 = vsel %vm923_vm0, %v967_v55, %v969_v18 }
 0x1b5   : > { %v1346_v62 = vpop.permute.xlu1 %1345 }
 0x1b6   : > { %1707 = vrot.lane.b32.xlu2 %v1112_v53, %s6723_s29  ;;  %v2162_v42 = vsel %vm2147_vm12, %v2129_v35, %v1346_v62 }
 0x1b7   : > { %1835 = vrot.lane.b32.xlu0 %v5267_v20, %s6747_s18  ;;  %v2195_v52 = vsel %vm2180_vm11, %v2162_v42, %v1474_v36 }
 0x1b8   : > { %v1572_v51 = vpop.permute.xlu2 %1571 }
 0x1b9   : > { %v1570_v38 = vpop.permute.xlu0 %1569 }
 0x1ba   : > { %v2228_v59 = vsel %vm2213_vm13, %v2195_v52, %v1570_v38 }
 0x1bb   : > { %1931 = vrot.lane.b32.xlu1 %v5225_v24, %s6746_s26 }
 0x1bd   : > { %v1698_v21 = vpop.permute.xlu1 %1697 }
 0x1be   : > { %2056 = vrot.lane.b32.xlu2 %v1178_v10, %s4351_s19  ;;  %v2261_v22 = vsel %vm2246_vm14, %v2228_v59, %v1698_v21  ;;  %v5343_v10 = vld [vmem:[%s4485_s20 + $0xc0] sm:$0xff]  ;;  %v535_v59 = vadd.s32 176, %v4476_v2 }
 0x1bf   : > { %1230 = vrot.lane.b32.xlu0 %v5094_v0, %s6725_s15  ;;  %v2294_v36 = vsel %vm2279_vm15, %v2261_v22, %v1826_v39  ;;  %v534_v0 = vadd.s32 168, %v4476_v2  ;;  %v971_v21 = vrot.slane %v5343_v10, 1  ;;  %v845_v22 = vrot.slane %v5316_v46, 7 }
 0x1c0   : > { %v1924_v23 = vpop.permute.xlu2 %1923 }
 0x1c1   : > { %v1922_v58 = vpop.permute.xlu0 %1921  ;;  %v566_v39 = vand.u32 15, %v534_v0  ;;  %v567_v0 = vand.u32 15, %v535_v59 }
 0x1c2   : > { %v2327_v50 = vsel %vm2312_vm2, %v2294_v36, %v1922_v58  ;;  %v5359_v36 = vsel %vm923_vm0, %v969_v18, %v971_v21 }
 0x1c3   : > { %1357 = vrot.lane.b32.xlu1 %v5163_v45, %s6743_s17  ;;  %v5311_v45 = vsel %vm799_vm1, %v841_v49, %v843_v7  ;;  %vm598_vm8 = vcmp.ne.s32.totalorder %v566_v39, 15  ;;  %vm695_vm10 = vcmp.ne.s32.totalorder %v567_v0, 0 }
 0x1c4   : > { %v1147_v28 = vmul.f32 %v5295_v8, %v5311_v45  ;;  %v3972_v49 = vsel %vm598_vm8, 1.0, %v4343_v1 }
 0x1c5   : > { %v2047_v16 = vpop.permute.xlu1 %2046  ;;  %v1038_v6 = vmul.f32 %v3972_v49, %v5198_v13  ;;  %v1114_v52 = vmul.f32 %v3972_v49, %v5282_v19 }
 0x1c6   : > { %v2360_v31 = vsel %vm2345_vm3, %v2327_v50, %v2047_v16  ;;  %1485 = vrot.lane.b32.xlu2 %v1076_v27, %s6745_s16  ;;  %v5365_v16 = vsel %vm799_vm1, %v843_v7, %v845_v22 }
 0x1c7   : > { %1581 = vrot.lane.b32.xlu0 %v5181_v25, %s6744_s28  ;;  %4009 = vmatmul.msk.f32.gmra.mxu0 %vm2381_vm4, %v2360_v31 }
 0x1c8   : > { %v1350_v30 = vpop.permute.xlu2 %1349 }
 0x1c9   : > { %v1348_v44 = vpop.permute.xlu0 %1347 }
 0x1ca   : > { %v2163_v47 = vsel %vm2147_vm12, %v2130_v11, %v1348_v44 }
 0x1cb   : > { %1709 = vrot.lane.b32.xlu1 %v5241_v56, %s6723_s29 }
 0x1cd   : > { %v1476_v29 = vpop.permute.xlu1 %1475 }
 0x1ce   : > { %1837 = vrot.lane.b32.xlu2 %v1147_v28, %s6747_s18  ;;  %v2196_v40 = vsel %vm2180_vm11, %v2163_v47, %v1476_v29  ;;  %v5376_v28 = vsel %vm695_vm10, 1.0, %v4343_v1 }
 0x1cf   : > { %1933 = vrot.lane.b32.xlu0 %v5271_v61, %s6746_s26  ;;  %v2229_v35 = vsel %vm2213_vm13, %v2196_v40, %v1572_v51  ;;  %v1078_v18 = vmul.f32 %v5376_v28, %v5311_v45 }
 0x1d0   : > { %v1702_v53 = vpop.permute.xlu2 %1701 }
 0x1d1   : > { %v1700_v60 = vpop.permute.xlu0 %1699 }
 0x1d2   : > { %v2262_v62 = vsel %vm2246_vm14, %v2229_v35, %v1700_v60 }
 0x1d3   : > { %2058 = vrot.lane.b32.xlu1 %v5330_v37, %s4351_s19 }
 0x1d5   : > { %v1828_v38 = vpop.permute.xlu1 %1827 }
 0x1d6   : > { %v2295_v42 = vsel %vm2279_vm15, %v2262_v62, %v1828_v38  ;;  %1232 = vrot.lane.b32.xlu2 %v5155_v14, %s6725_s15  ;;  %v906_v14 = vmul.f32 %v5123_v32, %v4979_v5  ;;  %v1180_v32 = vmul.f32 %v3972_v49, %v5359_v36  ;;  %v847_v49 = vrot.slane %v5343_v10, 7 }
 0x1d7   : > { %1359 = vrot.lane.b32.xlu0 %v1038_v6, %s6743_s17  ;;  %v2328_v55 = vsel %vm2312_vm2, %v2295_v42, %v1924_v23  ;;  %v5356_v23 = vpop.f32.mrf.mxu0 }
 0x1d8   : > { %v2051_v51 = vpop.permute.xlu2 %2050  ;;  %v5393_v62 = vsel %vm799_vm1, %v845_v22, %v847_v49 }
 0x1d9   : > { %v2049_v43 = vpop.permute.xlu0 %2048  ;;  %v1149_v42 = vmul.f32 %v5376_v28, %v5393_v62 }
 0x1da   : > { %v2361_v13 = vsel %vm2345_vm3, %v2328_v55, %v2049_v43  ;;  %v536_v55 = vadd.s32 184, %v4476_v2 }
 0x1db   : > { %4010 = vmatmul.msk.f32.gmra.mxu0 %vm2381_vm4, %v2361_v13  ;;  %1487 = vrot.lane.b32.xlu1 %v5267_v20, %s6745_s16 }
 0x1dd   : > { %v1223_v58 = vpop.permute.xlu1 %1222 }
 0x1de   : > { %1583 = vrot.lane.b32.xlu2 %v5225_v24, %s6744_s28  ;;  %v2131_v50 = vsel %vm2114_vm9, %v906_v14, %v1223_v58 }
 0x1df   : > { %1711 = vrot.lane.b32.xlu0 %v1114_v52, %s6723_s29  ;;  %v2164_v31 = vsel %vm2147_vm12, %v2131_v50, %v1350_v30  ;;  %v5372_v39 = vpop.f32.mrf.mxu0 }
 0x1e0   : > { %v1480_v5 = vpop.permute.xlu2 %1479 }
 0x1e1   : > { %v1478_v27 = vpop.permute.xlu0 %1477 }
 0x1e2   : > { %v2197_v11 = vsel %vm2180_vm11, %v2164_v31, %v1478_v27 }
 0x1e3   : > { %1839 = vrot.lane.b32.xlu1 %v5365_v16, %s6747_s18 }
 0x1e5   : > { %v1574_v44 = vpop.permute.xlu1 %1573 }
 0x1e6   : > { %1935 = vrot.lane.b32.xlu2 %v5316_v46, %s6746_s26  ;;  %v2230_v7 = vsel %vm2213_vm13, %v2197_v11, %v1574_v44 }
 0x1e7   : > { %2060 = vrot.lane.b32.xlu0 %v1180_v32, %s4351_s19  ;;  %v2263_v29 = vsel %vm2246_vm14, %v2230_v7, %v1702_v53  ;;  %v5389_v6 = vpop.f32.mrf.mxu0 }
 0x1e8   : > { %v1832_v47 = vpop.permute.xlu2 %1831 }
 0x1e9   : > { %v1830_v30 = vpop.permute.xlu0 %1829 }
 0x1ea   : > { %v2296_v40 = vsel %vm2279_vm15, %v2263_v29, %v1830_v30  ;;  %v5440_v29 = vld [vmem:[%s4485_s20 + $0xd0] sm:$0xff] }
 0x1eb   : > { %1234 = vrot.lane.b32.xlu1 %v5181_v25, %s6725_s15 }
 0x1ed   : > { %v1926_v60 = vpop.permute.xlu1 %1925 }
 0x1ee   : > { %v2329_v35 = vsel %vm2312_vm2, %v2296_v40, %v1926_v60  ;;  %1361 = vrot.lane.b32.xlu2 %v5241_v56, %s6743_s17  ;;  %v568_v56 = vand.u32 15, %v536_v55 }
 0x1ef   : > { %1489 = vrot.lane.b32.xlu0 %v1078_v18, %s6745_s16  ;;  %v2362_v38 = vsel %vm2345_vm3, %v2329_v35, %v2051_v51  ;;  %v5407_v52 = vpop.f32.mrf.mxu0  ;;  %v5412_v51 = vld [vmem:[%s4485_s20 + $0xc8] sm:$0xff]  ;;  %v908_v18 = vmul.f32 %v5209_v63, %v5062_v34  ;;  %v975_v35 = vrot.slane %v5440_v29, 1  ;;  %v537_v63 = vadd.s32 192, %v4476_v2 }
 0x1f0   : > { %4011 = vmatmul.msk.f32.gmra.mxu0 %vm2381_vm4, %v2362_v38  ;;  %v1227_v25 = vpop.permute.xlu2 %1226  ;;  %vm600_vm5 = vcmp.ne.s32.totalorder %v568_v56, 15  ;;  %v973_v58 = vrot.slane %v5412_v51, 1  ;;  %v849_v34 = vrot.slane %v5412_v51, 7 }
 0x1f1   : > { %v1225_v53 = vpop.permute.xlu0 %1224  ;;  %v3973_v0 = vsel %vm600_vm5, 1.0, %v4343_v1  ;;  %v2133_v38 = vsel %vm2114_vm9, %v908_v18, %v1227_v25  ;;  %v569_v56 = vand.u32 15, %v537_v63 }
 0x1f2   : > { %v2132_v43 = vsel %vm2114_vm9, %v5018_v33, %v1225_v53  ;;  %v5420_v27 = vsel %vm923_vm0, %v971_v21, %v973_v58  ;;  %v1040_v21 = vmul.f32 %v3973_v0, %v5282_v19  ;;  %v1116_v60 = vmul.f32 %v3973_v0, %v5359_v36 }
 0x1f3   : > { %1585 = vrot.lane.b32.xlu1 %v5271_v61, %s6744_s28  ;;  %vm697_vm6 = vcmp.ne.s32.totalorder %v569_v56, 0 }
 0x1f5   : > { %v1352_v13 = vpop.permute.xlu1 %1351 }
 0x1f6   : > { %1713 = vrot.lane.b32.xlu2 %v5330_v37, %s6723_s29  ;;  %v2165_v14 = vsel %vm2147_vm12, %v2132_v43, %v1352_v13  ;;  %v5459_v43 = vsel %vm923_vm0, %v973_v58, %v975_v35 }
 0x1f7   : > { %1841 = vrot.lane.b32.xlu0 %v1149_v42, %s6747_s18  ;;  %v2198_v33 = vsel %vm2180_vm11, %v2165_v14, %v1480_v5  ;;  %v5425_v32 = vpop.f32.mrf.mxu0  ;;  %v5455_v42 = vsel %vm799_vm1, %v847_v49, %v849_v34  ;;  %v1182_v49 = vmul.f32 %v3973_v0, %v5459_v43 }
 0x1f8   : > { %v1578_v22 = vpop.permute.xlu2 %1577 }
 0x1f9   : > { %v1576_v59 = vpop.permute.xlu0 %1575 }
 0x1fa   : > { %v2231_v31 = vsel %vm2213_vm13, %v2198_v33, %v1576_v59 }
 0x1fb   : > { %1937 = vrot.lane.b32.xlu1 %v5343_v10, %s6746_s26 }
 0x1fd   : > { %v1704_v50 = vpop.permute.xlu1 %1703 }
 0x1fe   : > { %2062 = vrot.lane.b32.xlu2 %v5420_v27, %s4351_s19  ;;  %v2264_v5 = vsel %vm2246_vm14, %v2231_v31, %v1704_v50  ;;  %v5472_v50 = vsel %vm697_vm6, 1.0, %v4343_v1 }
 0x1ff   : > { %1236 = vrot.lane.b32.xlu0 %v5225_v24, %s6725_s15  ;;  %v2297_v7 = vsel %vm2279_vm15, %v2264_v5, %v1832_v47  ;;  %v5442_v40 = vpop.f32.mrf.mxu0 }
 0x200   : > { %v1930_v11 = vpop.permute.xlu2 %1929 }
 0x201   : > { %v1928_v44 = vpop.permute.xlu0 %1927 }
 0x202   : > { %v2330_v30 = vsel %vm2312_vm2, %v2297_v7, %v1928_v44  ;;  %v1080_v7 = vmul.f32 %v5472_v50, %v5393_v62 }
 0x203   : > { %1363 = vrot.lane.b32.xlu1 %v1040_v21, %s6743_s17 }
 0x205   : > { %v2053_v24 = vpop.permute.xlu1 %2052 }
 0x206   : > { %v2363_v19 = vsel %vm2345_vm3, %v2330_v30, %v2053_v24  ;;  %1491 = vrot.lane.b32.xlu2 %v5365_v16, %s6745_s16  ;;  %v851_v24 = vrot.slane %v5440_v29, 7 }
 0x207   : > { %1587 = vrot.lane.b32.xlu0 %v5316_v46, %s6744_s28  ;;  %4012 = vmatmul.msk.f32.gmra.mxu0 %vm2381_vm4, %v2363_v19  ;;  %v5463_v25 = vpop.f32.mrf.mxu0 }
 0x208   : > { %v1356_v53 = vpop.permute.xlu2 %1355  ;;  %v5493_v19 = vsel %vm799_vm1, %v849_v34, %v851_v24 }
 0x209   : > { %v1354_v47 = vpop.permute.xlu0 %1353  ;;  %v1151_v63 = vmul.f32 %v5472_v50, %v5493_v19 }
 0x20a   : > { %v2166_v55 = vsel %vm2147_vm12, %v2133_v38, %v1354_v47 }
 0x20b   : > { %1715 = vrot.lane.b32.xlu1 %v1116_v60, %s6723_s29 }
 0x20d   : > { %v1482_v13 = vpop.permute.xlu1 %1481 }
 0x20e   : > { %1843 = vrot.lane.b32.xlu2 %v5455_v42, %s6747_s18  ;;  %v2199_v59 = vsel %vm2180_vm11, %v2166_v55, %v1482_v13 }
 0x20f   : > { %1939 = vrot.lane.b32.xlu0 %v5412_v51, %s6746_s26  ;;  %v2232_v58 = vsel %vm2213_vm13, %v2199_v59, %v1578_v22  ;;  %v5477_v44 = vpop.f32.mrf.mxu0 }
 0x210   : > { %v1708_v33 = vpop.permute.xlu2 %1707 }
 0x211   : > { %v1706_v14 = vpop.permute.xlu0 %1705 }
 0x212   : > { %v2265_v31 = vsel %vm2246_vm14, %v2232_v58, %v1706_v14 }
 0x213   : > { %2064 = vrot.lane.b32.xlu1 %v1182_v49, %s4351_s19 }
 0x215   : > { %v1834_v5 = vpop.permute.xlu1 %1833 }
 0x216   : > { %v2298_v0 = vsel %vm2279_vm15, %v2265_v31, %v1834_v5  ;;  %1238 = vrot.lane.b32.xlu2 %v5271_v61, %s6725_s15  ;;  %v538_v61 = vadd.s32 200, %v4476_v2 }
 0x217   : > { %1365 = vrot.lane.b32.xlu0 %v5330_v37, %s6743_s17  ;;  %v2331_v22 = vsel %vm2312_vm2, %v2298_v0, %v1930_v11  ;;  %v5490_v37 = vld [vmem:[%s4485_s20 + $0xd8] sm:$0xff]  ;;  %v5498_v47 = vpop.f32.mrf.mxu0 }
 0x218   : > { %v2057_v18 = vpop.permute.xlu2 %2056  ;;  %v977_v60 = vrot.slane %v5490_v37, 1  ;;  %v570_v13 = vand.u32 15, %v538_v61  ;;  %v853_v61 = vrot.slane %v5490_v37, 7 }
 0x219   : > { %v2055_v21 = vpop.permute.xlu0 %2054 }
 0x21a   : > { %v2364_v30 = vsel %vm2345_vm3, %v2331_v22, %v2055_v21  ;;  %v5508_v56 = vsel %vm923_vm0, %v975_v35, %v977_v60  ;;  %vm602_vm8 = vcmp.ne.s32.totalorder %v570_v13, 15 }
 0x21b   : > { %4013 = vmatmul.msk.f32.gmra.mxu0 %vm2381_vm4, %v2364_v30  ;;  %1493 = vrot.lane.b32.xlu1 %v1080_v7, %s6745_s16  ;;  %v3974_v31 = vsel %vm602_vm8, 1.0, %v4343_v1 }
 0x21c   : > { %v1042_v0 = vmul.f32 %v3974_v31, %v5359_v36 }
 0x21d   : > { %v1229_v11 = vpop.permute.xlu1 %1228 }
 0x21e   : > { %1589 = vrot.lane.b32.xlu2 %v5343_v10, %s6744_s28  ;;  %v2134_v34 = vsel %vm2114_vm9, %v5114_v15, %v1229_v11  ;;  %v910_v11 = vmul.f32 %v5295_v8, %v5138_v9 }
 0x21f   : > { %1717 = vrot.lane.b32.xlu0 %v5420_v27, %s6723_s29  ;;  %v2167_v59 = vsel %vm2147_vm12, %v2134_v34, %v1356_v53  ;;  %v5514_v49 = vpop.f32.mrf.mxu0  ;;  %v5542_v34 = vld [vmem:[%s4485_s20 + $0xe0] sm:$0xff] }
 0x220   : > { %v1486_v55 = vpop.permute.xlu2 %1485  ;;  %v979_v13 = vrot.slane %v5542_v34, 1 }
 0x221   : > { %v1484_v38 = vpop.permute.xlu0 %1483 }
 0x222   : > { %v2200_v58 = vsel %vm2180_vm11, %v2167_v59, %v1484_v38  ;;  %v5538_v38 = vsel %vm799_vm1, %v851_v24, %v853_v61  ;;  %v5555_v24 = vsel %vm923_vm0, %v977_v60, %v979_v13 }
 0x223   : > { %1845 = vrot.lane.b32.xlu1 %v1151_v63, %s6747_s18  ;;  %v1118_v63 = vmul.f32 %v3974_v31, %v5459_v43 }
 0x225   : > { %v1580_v14 = vpop.permute.xlu1 %1579 }
 0x226   : > { %1941 = vrot.lane.b32.xlu2 %v5440_v29, %s6746_s26  ;;  %v2233_v15 = vsel %vm2213_vm13, %v2200_v58, %v1580_v14 }
 0x227   : > { %2066 = vrot.lane.b32.xlu0 %v5508_v56, %s4351_s19  ;;  %v2266_v5 = vsel %vm2246_vm14, %v2233_v15, %v1708_v33  ;;  %v5528_v7 = vpop.f32.mrf.mxu0 }
 0x228   : > { %v1838_v53 = vpop.permute.xlu2 %1837 }
 0x229   : > { %v1836_v35 = vpop.permute.xlu0 %1835 }
 0x22a   : > { %v2299_v22 = vsel %vm2279_vm15, %v2266_v5, %v1836_v35  ;;  %v1184_v5 = vmul.f32 %v3974_v31, %v5555_v24 }
 0x22b   : > { %1240 = vrot.lane.b32.xlu1 %v5316_v46, %s6725_s15 }
 0x22d   : > { %v1932_v21 = vpop.permute.xlu1 %1931 }
 0x22e   : > { %v2332_v30 = vsel %vm2312_vm2, %v2299_v22, %v1932_v21  ;;  %1367 = vrot.lane.b32.xlu2 %v1042_v0, %s6743_s17 }
 0x22f   : > { %1495 = vrot.lane.b32.xlu0 %v5455_v42, %s6745_s16  ;;  %v2365_v36 = vsel %vm2345_vm3, %v2332_v30, %v2057_v18  ;;  %v539_v18 = vadd.s32 208, %v4476_v2  ;;  %v5551_v9 = vpop.f32.mrf.mxu0 }
 0x230   : > { %4014 = vmatmul.msk.f32.gmra.mxu0 %vm2381_vm4, %v2365_v36  ;;  %v1233_v46 = vpop.permute.xlu2 %1232 }
 0x231   : > { %v1231_v33 = vpop.permute.xlu0 %1230  ;;  %v571_v35 = vand.u32 15, %v539_v18 }
 0x232   : > { %v2135_v59 = vsel %vm2114_vm9, %v910_v11, %v1231_v33 }
 0x233   : > { %1591 = vrot.lane.b32.xlu1 %v5412_v51, %s6744_s28  ;;  %vm699_vm10 = vcmp.ne.s32.totalorder %v571_v35, 0 }
 0x234   : > { %v5568_v31 = vsel %vm699_vm10, 1.0, %v4343_v1 }
 0x235   : > { %v1358_v14 = vpop.permute.xlu1 %1357  ;;  %v1082_v11 = vmul.f32 %v5568_v31, %v5493_v19 }
 0x236   : > { %1719 = vrot.lane.b32.xlu2 %v1118_v63, %s6723_s29  ;;  %v2168_v58 = vsel %vm2147_vm12, %v2135_v59, %v1358_v14  ;;  %v855_v63 = vrot.slane %v5542_v34, 7 }
 0x237   : > { %1847 = vrot.lane.b32.xlu0 %v5538_v38, %s6747_s18  ;;  %v2201_v0 = vsel %vm2180_vm11, %v2168_v58, %v1486_v55  ;;  %v2535_v21 = vpop.f32.mrf.mxu0 }
 0x238   : > { %v1584_v15 = vpop.permute.xlu2 %1583 }
 0x239   : > { %v1582_v8 = vpop.permute.xlu0 %1581 }
 0x23a   : > { %v2234_v60 = vsel %vm2213_vm13, %v2201_v0, %v1582_v8  ;;  %v5593_v0 = vld [vmem:[%s4485_s20 + $0xe8] sm:$0xff] }
 0x23b   : > { %1943 = vrot.lane.b32.xlu1 %v5490_v37, %s6746_s26 }
 0x23d   : > { %v1710_v22 = vpop.permute.xlu1 %1709 }
 0x23e   : > { %2068 = vrot.lane.b32.xlu2 %v1184_v5, %s4351_s19  ;;  %v2267_v30 = vsel %vm2246_vm14, %v2234_v60, %v1710_v22  ;;  %v2136_v5 = vsel %vm2114_vm9, %v5194_v48, %v1233_v46 }
 0x23f   : > { %1242 = vrot.lane.b32.xlu0 %v5343_v10, %s6725_s15  ;;  %v2300_v36 = vsel %vm2279_vm15, %v2267_v30, %v1838_v53  ;;  %v540_v10 = vadd.s32 216, %v4476_v2  ;;  %v2538_v14 = vpop.f32.mrf.mxu0  ;;  %v981_v30 = vrot.slane %v5593_v0, 1  ;;  %s6749_s15 = smov 15  }
 0x240   : > { %v1936_v55 = vpop.permute.xlu2 %1935 }
 0x241   : > { %v1934_v33 = vpop.permute.xlu0 %1933  ;;  %v572_v58 = vand.u32 15, %v540_v10 }
 0x242   : > { %v2333_v18 = vsel %vm2312_vm2, %v2300_v36, %v1934_v33 }
 0x243   : > { %1369 = vrot.lane.b32.xlu1 %v5420_v27, %s6743_s17  ;;  %v5586_v27 = vsel %vm799_vm1, %v853_v61, %v855_v63  ;;  %vm604_vm5 = vcmp.ne.s32.totalorder %v572_v58, 15 }
 0x244   : > { %v1153_v22 = vmul.f32 %v5568_v31, %v5586_v27  ;;  %v3975_v48 = vsel %vm604_vm5, 1.0, %v4343_v1 }
 0x245   : > { %v2059_v59 = vpop.permute.xlu1 %2058 }
 0x246   : > { %v2366_v53 = vsel %vm2345_vm3, %v2333_v18, %v2059_v59  ;;  %1497 = vrot.lane.b32.xlu2 %v1082_v11, %s6745_s16  ;;  %v5607_v11 = vsel %vm923_vm0, %v979_v13, %v981_v30  ;;  %v1044_v18 = vmul.f32 %v3975_v48, %v5459_v43 }
 0x247   : > { %1593 = vrot.lane.b32.xlu0 %v5440_v29, %s6744_s28  ;;  %4015 = vmatmul.msk.f32.gmra.mxu0 %vm2381_vm4, %v2366_v53  ;;  %v2541_v33 = vpop.f32.mrf.mxu0  ;;  %v5618_v53 = vld [vmem:[%s6702_s2] ss:$0 sm:$0xff] }
 0x248   : > { %v5588_v35 = vpop.permute.xlu2 %1361  ;;  %v2542_v43 = vadd.f32 %v5618_v53, %v2541_v33 }
 0x249   : > { %v1360_v8 = vpop.permute.xlu0 %1359 }
 0x24a   : > { %v2169_v60 = vsel %vm2147_vm12, %v2136_v5, %v1360_v8 }
 0x24b   : > { %1721 = vrot.lane.b32.xlu1 %v5508_v56, %s6723_s29  ;;  %s6733_s29 = smov 112  }
 0x24d   : > { %v1488_v61 = vpop.permute.xlu1 %1487 }
 0x24e   : > { %1849 = vrot.lane.b32.xlu2 %v1153_v22, %s6747_s18  ;;  %v2202_v46 = vsel %vm2180_vm11, %v2169_v60, %v1488_v61  ;;  %v5629_v61 = vld [vmem:[%s4485_s20 + $0xf0] sm:$0xff] }
 0x24f   : > { %1945 = vrot.lane.b32.xlu0 %v5542_v34, %s6746_s26  ;;  %v2235_v59 = vsel %vm2213_vm13, %v2202_v46, %v1584_v15  ;;  %v983_v33 = vrot.slane %v5629_v61, 1 }
 0x250   : > { %v5609_v10 = vpop.permute.xlu2 %1713 }
 0x251   : > { %v1712_v36 = vpop.permute.xlu0 %1711 }
 0x252   : > { %v2268_v8 = vsel %vm2246_vm14, %v2235_v59, %v1712_v36 }
 0x253   : > { %2070 = vrot.lane.b32.xlu1 %v5607_v11, %s4351_s19 }
 0x255   : > { %v1840_v58 = vpop.permute.xlu1 %1839 }
 0x256   : > { %v2301_v13 = vsel %vm2279_vm15, %v2268_v8, %v1840_v58  ;;  %1244 = vrot.lane.b32.xlu2 %v5412_v51, %s6748_s0  ;;  %v1120_v51 = vmul.f32 %v3975_v48, %v5555_v24  ;;  %v2609_v8 = vmax.f32 %v2542_v43, 0.0  ;;  %v541_v58 = vadd.s32 224, %v4476_v2 }
 0x257   : > { %1371 = vrot.lane.b32.xlu0 %v1044_v18, %s6743_s17  ;;  %v2334_v15 = vsel %vm2312_vm2, %v2301_v13, %v1936_v55  ;;  %v2539_v18 = vadd.f32 %v5618_v53, %v2538_v14  ;;  %v2536_v55 = vadd.f32 %v5618_v53, %v2535_v21  ;;  %v912_v13 = vmul.f32 %v5376_v28, %v5228_v17 }
 0x258   : > { %v2544_v5 = vpop.f32.mrf.mxu0  ;;  %v5632_v36 = vpop.permute.xlu2 %2062  ;;  %v857_v14 = vrot.slane %v5593_v0, 7  ;;  %v5651_v21 = vsel %vm923_vm0, %v981_v30, %v983_v33  ;;  %v2530_v17 = vadd.f32 %v5618_v53, %v5528_v7  ;;  %v2527_v30 = vadd.f32 %v5618_v53, %v5514_v49 }
 0x259   : > { %v2061_v22 = vpop.permute.xlu0 %2060  ;;  %v2545_v60 = vadd.f32 %v5618_v53, %v2544_v5  ;;  %v2533_v5 = vadd.f32 %v5618_v53, %v5551_v9  ;;  %v2607_v28 = vmax.f32 %v2536_v55, 0.0  ;;  %v573_v9 = vand.u32 15, %v541_v58 }
 0x25a   : > { %v2367_v46 = vsel %vm2345_vm3, %v2334_v15, %v2061_v22  ;;  %v2608_v15 = vmax.f32 %v2539_v18, 0.0  ;;  %v1186_v7 = vmul.f32 %v3975_v48, %v5651_v21  ;;  %v2604_v48 = vmax.f32 %v2527_v30, 0.0 }
 0x25b   : > { %4016 = vmatmul.msk.f32.gmra.mxu0 %vm2381_vm4, %v2367_v46  ;;  %v2610_v59 = vmax.f32 %v2545_v60, 0.0  ;;  %1499 = vrot.lane.b32.xlu1 %v5538_v38, %s6745_s16  ;;  %v5661_v46 = vsel %vm799_vm1, %v855_v63, %v857_v14  ;;  %v2605_v63 = vmax.f32 %v2530_v17, 0.0  ;;  %vm701_vm6 = vcmp.ne.s32.totalorder %v573_v9, 0 }
 0x25c   : > { %v2512_v9 = vadd.f32 %v5618_v53, %v5425_v32 }
 0x25d   : > { %2627 = vmatpush.msra.mxu1 %v2610_v59  ;;  %v1235_v22 = vpop.permute.xlu1 %1234  ;;  %v2606_v59 = vmax.f32 %v2533_v5, 0.0 }
 0x25e   : > { %1595 = vrot.lane.b32.xlu2 %v5490_v37, %s6744_s28  ;;  %v2137_v60 = vsel %vm2114_vm9, %v912_v13, %v1235_v22  ;;  %v2515_v22 = vadd.f32 %v5618_v53, %v5442_v40  ;;  %v2509_v40 = vadd.f32 %v5618_v53, %v5407_v52  ;;  %v2506_v52 = vadd.f32 %v5618_v53, %v5389_v6 }
 0x25f   : > { %1723 = vrot.lane.b32.xlu0 %v1120_v51, %s6749_s15  ;;  %2628 = vmatpush.msra.mxu1 %v2609_v8  ;;  %v2524_v51 = vadd.f32 %v5618_v53, %v5498_v47  ;;  %v2170_v55 = vsel %vm2147_vm12, %v2137_v60, %v5588_v35  ;;  %v2521_v8 = vadd.f32 %v5618_v53, %v5477_v44  ;;  %v5679_v47 = vsel %vm701_vm6, 1.0, %v4343_v1 }
 0x260   : > { %v5663_v18 = vpop.permute.xlu2 %1491  ;;  %v2518_v35 = vadd.f32 %v5618_v53, %v5463_v25  ;;  %v1050_v25 = vrot.slane %v5629_v61, 7  ;;  %v542_v6 = vadd.s32 232, %v4476_v2 }
 0x261   : > { %v1490_v43 = vpop.permute.xlu0 %1489  ;;  %2629 = vmatpush.msra.mxu1 %v2608_v15  ;;  %v2603_v44 = vmax.f32 %v2524_v51, 0.0  ;;  %v2602_v17 = vmax.f32 %v2521_v8, 0.0  ;;  %v2503_v8 = vadd.f32 %v5618_v53, %v5372_v39 }
 0x262   : > { %v2203_v58 = vsel %vm2180_vm11, %v2170_v55, %v1490_v43  ;;  %v2601_v60 = vmax.f32 %v2518_v35, 0.0  ;;  %v5707_v32 = vsel %vm799_vm1, %v857_v14, %v1050_v25  ;;  %v2599_v55 = vmax.f32 %v2512_v9, 0.0 }
 0x263   : > { %2630 = vmatpush.msra.mxu1 %v2607_v28  ;;  %1851 = vrot.lane.b32.xlu1 %v5661_v46, %s6747_s18  ;;  %v1084_v28 = vmul.f32 %v5679_v47, %v5586_v27  ;;  %v2598_v14 = vmax.f32 %v2509_v40, 0.0  ;;  %v574_v35 = vand.u32 15, %v542_v6 }
 0x265   : > { %2631 = vmatpush.msra.mxu1 %v2606_v59  ;;  %v1586_v49 = vpop.permute.xlu1 %1585  ;;  %vm606_vm8 = vcmp.ne.s32.totalorder %v574_v35, 15 }
 0x266   : > { %1947 = vrot.lane.b32.xlu2 %v5593_v0, %s6746_s26  ;;  %v2236_v13 = vsel %vm2213_vm13, %v2203_v58, %v1586_v49  ;;  %v2500_v49 = vadd.f32 %v5618_v53, %v5356_v23  ;;  %v2596_v58 = vmax.f32 %v2503_v8, 0.0  ;;  %v543_v8 = vadd.s32 240, %v4476_v2 }
 0x267   : > { %2072 = vrot.lane.b32.xlu0 %v1186_v7, %s4351_s19  ;;  %2632 = vmatpush.msra.mxu1 %v2605_v63  ;;  %v2269_v43 = vsel %vm2246_vm14, %v2236_v13, %v5609_v10  ;;  %v2600_v10 = vmax.f32 %v2515_v22, 0.0  ;;  %v5731_v13 = vld [vmem:[%s4485_s20 + $0xf8] sm:$0xff]  ;;  %s6729_s20 = smov 48  }
 0x268   : > { %v5686_v15 = vpop.permute.xlu2 %1843  ;;  %v575_v6 = vand.u32 15, %v543_v8 }
 0x269   : > { %v1842_v5 = vpop.permute.xlu0 %1841  ;;  %2633 = vmatpush.msra.mxu1 %v2604_v48 }
 0x26a   : > { %v2302_v30 = vsel %vm2279_vm15, %v2269_v43, %v1842_v5  ;;  %v2595_v5 = vmax.f32 %v2500_v49, 0.0  ;;  %v3976_v43 = vsel %vm606_vm8, 1.0, %v4343_v1  ;;  %vm703_vm10 = vcmp.ne.s32.totalorder %v575_v6, 0 }
 0x26b   : > { %2634 = vmatpush.msra.mxu1 %v2603_v44  ;;  %1246 = vrot.lane.b32.xlu1 %v5440_v29, %s6748_s0 }
 0x26d   : > { %2635 = vmatpush.msra.mxu1 %v2602_v17  ;;  %v1938_v59 = vpop.permute.xlu1 %1937 }
 0x26e   : > { %v2335_v7 = vsel %vm2312_vm2, %v2302_v30, %v1938_v59  ;;  %1373 = vrot.lane.b32.xlu2 %v5508_v56, %s6743_s17  ;;  %v1155_v56 = vmul.f32 %v5679_v47, %v5707_v32  ;;  %v1046_v30 = vmul.f32 %v3976_v43, %v5555_v24 }
 0x26f   : > { %1501 = vrot.lane.b32.xlu0 %v1084_v28, %s6745_s16  ;;  %2636 = vmatpush.msra.mxu1 %v2601_v60  ;;  %v2368_v51 = vsel %vm2345_vm3, %v2335_v7, %v5632_v36  ;;  %v2597_v36 = vmax.f32 %v2506_v52, 0.0 }
 0x270   : > { %4017 = vmatmul.msk.f32.gmra.mxu0 %vm2381_vm4, %v2368_v51  ;;  %v1239_v63 = vpop.permute.xlu2 %1238 }
 0x271   : > { %v1237_v29 = vpop.permute.xlu0 %1236  ;;  %2637 = vmatpush.msra.mxu1 %v2600_v10 }
 0x272   : > { %v2138_v48 = vsel %vm2114_vm9, %v5267_v20, %v1237_v29  ;;  %v1088_v20 = vrot.slane %v5731_v13, 1 }
 0x273   : > { %2638 = vmatpush.msra.mxu1 %v2599_v55  ;;  %1597 = vrot.lane.b32.xlu1 %v5542_v34, %s6744_s28  ;;  %v1052_v55 = vrot.slane %v5731_v13, 7 }
 0x274   : > { %v1089_v28 = vsel %vm923_vm0, %v983_v33, %v1088_v20 }
 0x275   : > { %2639 = vmatpush.msra.mxu1 %v2598_v14  ;;  %v1364_v39 = vpop.permute.xlu1 %1363  ;;  %v1092_v14 = vsel %vm923_vm0, %v1088_v20, 0.0 }
 0x276   : > { %1725 = vrot.lane.b32.xlu2 %v5607_v11, %s6749_s15  ;;  %v2171_v44 = vsel %vm2147_vm12, %v2138_v48, %v1364_v39 }
 0x277   : > { %1853 = vrot.lane.b32.xlu0 %v1155_v56, %s6747_s18  ;;  %2640 = vmatpush.msra.mxu1 %v2597_v36  ;;  %v2204_v17 = vsel %vm2180_vm11, %v2171_v44, %v5663_v18  ;;  %v1188_v36 = vmul.f32 %v3976_v43, %v1092_v14 }
 0x278   : > { %v1590_v22 = vpop.permute.xlu2 %1589 }
 0x279   : > { %v1588_v23 = vpop.permute.xlu0 %1587  ;;  %2641 = vmatpush.msra.mxu1 %v2596_v58 }
 0x27a   : > { %v2237_v60 = vsel %vm2213_vm13, %v2204_v17, %v1588_v23 }
 0x27b   : > { %2642 = vmatpush.msra.mxu1 %v2595_v5  ;;  %1949 = vrot.lane.b32.xlu1 %v5629_v61, %s6746_s26 }
 0x27d   : > { %v1716_v9 = vpop.permute.xlu1 %1715 }
 0x27e   : > { %2074 = vrot.lane.b32.xlu2 %v1089_v28, %s4351_s19  ;;  %v2270_v40 = vsel %vm2246_vm14, %v2237_v60, %v1716_v9 }
 0x27f   : > { %1248 = vrot.lane.b32.xlu0 %v5490_v37, %s6748_s0  ;;  %v2303_v10 = vsel %vm2279_vm15, %v2270_v40, %v5686_v15  ;;  %v914_v37 = vmul.f32 %v5472_v50, %v5311_v45  ;;  %v1122_v15 = vmul.f32 %v3976_v43, %v5651_v21  ;;  %v1053_v45 = vsel %vm799_vm1, %v1050_v25, %v1052_v55 }
 0x280   : > { %v1942_v59 = vpop.permute.xlu2 %1941  ;;  %v5778_v25 = vsel %vm703_vm10, 1.0, %v4343_v1 }
 0x281   : > { %v1940_v18 = vpop.permute.xlu0 %1939  ;;  %v2139_v51 = vsel %vm2114_vm9, %v914_v37, %v1239_v63 }
 0x282   : > { %v2336_v33 = vsel %vm2312_vm2, %v2303_v10, %v1940_v18 }
 0x283   : > { %1375 = vrot.lane.b32.xlu1 %v1046_v30, %s6743_s17 }
 0x285   : > { %v2065_v7 = vpop.permute.xlu1 %2064 }
 0x286   : > { %v2369_v52 = vsel %vm2345_vm3, %v2336_v33, %v2065_v7  ;;  %1503 = vrot.lane.b32.xlu2 %v5661_v46, %s6745_s16 }
 0x287   : > { %1599 = vrot.lane.b32.xlu0 %v5593_v0, %s6744_s28  ;;  %4018 = vmatmul.msk.f32.gmra.mxu0 %vm2381_vm4, %v2369_v52 }
 0x288   : > { %v1368_v29 = vpop.permute.xlu2 %1367 }
 0x289   : > { %v1366_v24 = vpop.permute.xlu0 %1365 }
 0x28a   : > { %v2172_v50 = vsel %vm2147_vm12, %v2139_v51, %v1366_v24 }
 0x28b   : > { %1727 = vrot.lane.b32.xlu1 %v1122_v15, %s6749_s15 }
 0x28d   : > { %v1494_v56 = vpop.permute.xlu1 %1493 }
 0x28e   : > { %1855 = vrot.lane.b32.xlu2 %v1053_v45, %s6747_s18  ;;  %v2205_v63 = vsel %vm2180_vm11, %v2172_v50, %v1494_v56 }
 0x28f   : > { %1951 = vrot.lane.b32.xlu0 %v5731_v13, %s6746_s26  ;;  %v2238_v39 = vsel %vm2213_vm13, %v2205_v63, %v1590_v22  ;;  %v1086_v22 = vmul.f32 %v5778_v25, %v5707_v32 }
 0x290   : > { %v1720_v48 = vpop.permute.xlu2 %1719 }
 0x291   : > { %v1718_v49 = vpop.permute.xlu0 %1717 }
 0x292   : > { %v2271_v58 = vsel %vm2246_vm14, %v2238_v39, %v1718_v49 }
 0x293   : > { %2076 = vrot.lane.b32.xlu1 %v1188_v36, %s4351_s19 }
 0x295   : > { %v1846_v35 = vpop.permute.xlu1 %1845 }
 0x296   : > { %v2304_v23 = vsel %vm2279_vm15, %v2271_v58, %v1846_v35  ;;  %1250 = vrot.lane.b32.xlu2 %v5542_v34, %s6748_s0  ;;  %v544_v34 = vadd.s32 248, %v4476_v2 }
 0x297   : > { %1377 = vrot.lane.b32.xlu0 %v5607_v11, %s6743_s17  ;;  %v2337_v5 = vsel %vm2312_vm2, %v2304_v23, %v1942_v59  ;;  %v1126_v11 = vsel %vm799_vm1, %v1052_v55, 0.0 }
 0x298   : > { %v2069_v17 = vpop.permute.xlu2 %2068  ;;  %v1157_v32 = vmul.f32 %v5778_v25, %v1126_v11  ;;  %v576_v18 = vand.u32 15, %v544_v34 }
 0x299   : > { %v2067_v44 = vpop.permute.xlu0 %2066 }
 0x29a   : > { %v2370_v20 = vsel %vm2345_vm3, %v2337_v5, %v2067_v44  ;;  %vm608_vm5 = vcmp.ne.s32.totalorder %v576_v18, 15 }
 0x29b   : > { %4019 = vmatmul.msk.f32.gmra.mxu0 %vm2381_vm4, %v2370_v20  ;;  %1505 = vrot.lane.b32.xlu1 %v1086_v22, %s6745_s16  ;;  %v3977_v33 = vsel %vm608_vm5, 1.0, %v4343_v1 }
 0x29c   : > { %v1048_v37 = vmul.f32 %v3977_v33, %v5651_v21  ;;  %v916_v21 = vmul.f32 %v5568_v31, %v5393_v62  ;;  %v1124_v8 = vmul.f32 %v3977_v33, %v1092_v14  ;;  %v1190_v56 = vmul.f32 0.0, %v3977_v33 }
 0x29d   : > { %v1241_v43 = vpop.permute.xlu1 %1240 }
 0x29e   : > { %1601 = vrot.lane.b32.xlu2 %v5629_v61, %s6744_s28  ;;  %v2140_v60 = vsel %vm2114_vm9, %v5365_v16, %v1241_v43 }
 0x29f   : > { %1729 = vrot.lane.b32.xlu0 %v1089_v28, %s6749_s15  ;;  %v2173_v30 = vsel %vm2147_vm12, %v2140_v60, %v1368_v29 }
 0x2a0   : > { %v1498_v40 = vpop.permute.xlu2 %1497 }
 0x2a1   : > { %v1496_v9 = vpop.permute.xlu0 %1495 }
 0x2a2   : > { %v2206_v61 = vsel %vm2180_vm11, %v2173_v30, %v1496_v9  ;;  %v918_v30 = vmul.f32 %v5679_v47, %v5493_v19 }
 0x2a3   : > { %1857 = vrot.lane.b32.xlu1 %v1157_v32, %s6747_s18 }
 0x2a5   : > { %v1592_v59 = vpop.permute.xlu1 %1591 }
 0x2a6   : > { %1953 = vrot.lane.b32.xlu2 %v4343_v1, %s6746_s26  ;;  %v2239_v28 = vsel %vm2213_vm13, %v2206_v61, %v1592_v59  ;;  %s4299_s26 = scalar_lea.hbm %s6712_s12, 2 }
 0x2a7   : > { %2078 = vrot.lane.b32.xlu0 %v4343_v1, %s4351_s19  ;;  %v2272_v7 = vsel %vm2246_vm14, %v2239_v28, %v1720_v48 }
 0x2a8   : > { %v1850_v16 = vpop.permute.xlu2 %1849 }
 0x2a9   : > { %v1848_v10 = vpop.permute.xlu0 %1847 }
 0x2aa   : > { %v2305_v52 = vsel %vm2279_vm15, %v2272_v7, %v1848_v10 }
 0x2ab   : > { %1252 = vrot.lane.b32.xlu1 %v5593_v0, %s6748_s0  ;;  %s6728_s0 = smov 32  }
 0x2ad   : > { %v1944_v24 = vpop.permute.xlu1 %1943 }
 0x2ae   : > { %v2338_v15 = vsel %vm2312_vm2, %v2305_v52, %v1944_v24  ;;  %1379 = vrot.lane.b32.xlu2 %v1048_v37, %s6743_s17  ;;  %s6730_s17 = smov 96  }
 0x2af   : > { %1507 = vrot.lane.b32.xlu0 %v1053_v45, %s6745_s16  ;;  %v2371_v29 = vsel %vm2345_vm3, %v2338_v15, %v2069_v17  ;;  %s6753_s16 = smov 16  }
 0x2b0   : > { %4020 = vmatmul.msk.f32.gmra.mxu0 %vm2381_vm4, %v2371_v29  ;;  %v1245_v55 = vpop.permute.xlu2 %1244 }
 0x2b1   : > { %v1243_v51 = vpop.permute.xlu0 %1242  ;;  %v2142_v5 = vsel %vm2114_vm9, %v5455_v42, %v1245_v55 }
 0x2b2   : > { %v2141_v0 = vsel %vm2114_vm9, %v916_v21, %v1243_v51 }
 0x2b3   : > { %1603 = vrot.lane.b32.xlu1 %v5731_v13, %s6744_s28  ;;  %s6750_s28 = smov 64  }
 0x2b5   : > { %v1370_v45 = vpop.permute.xlu1 %1369 }
 0x2b6   : > { %1731 = vrot.lane.b32.xlu2 %v1124_v8, %s6749_s15  ;;  %v2174_v6 = vsel %vm2147_vm12, %v2141_v0, %v1370_v45  ;;  %s6732_s15 = smov 64  }
 0x2b7   : > { %1859 = vrot.lane.b32.xlu0 %v4343_v1, %s6747_s18  ;;  %v2207_v49 = vsel %vm2180_vm11, %v2174_v6, %v1498_v40  ;;  %s6727_s18 = smov 16  }
 0x2b8   : > { %v1596_v63 = vpop.permute.xlu2 %1595 }
 0x2b9   : > { %v1594_v50 = vpop.permute.xlu0 %1593 }
 0x2ba   : > { %v2240_v31 = vsel %vm2213_vm13, %v2207_v49, %v1594_v50 }
 0x2bb   : > { %2080 = vrot.lane.b32.xlu1 %v1190_v56, %s4351_s19  ;;  %s6735_s19 = smov 80  }
 0x2bd   : > { %v1722_v62 = vpop.permute.xlu1 %1721 }
 0x2be   : > { %v2273_v13 = vsel %vm2246_vm14, %v2240_v31, %v1722_v62 }
 0x2bf   : > { %v2306_v48 = vsel %vm2279_vm15, %v2273_v13, %v1850_v16 }
 0x2c0   : > { %v1948_v36 = vpop.permute.xlu2 %1947 }
 0x2c1   : > { %v1946_v14 = vpop.permute.xlu0 %1945 }
 0x2c2   : > { %v2339_v39 = vsel %vm2312_vm2, %v2306_v48, %v1946_v14 }
 0x2c5   : > { %v2071_v58 = vpop.permute.xlu1 %2070 }
 0x2c6   : > { %v2372_v35 = vsel %vm2345_vm3, %v2339_v39, %v2071_v58 }
 0x2c7   : > { %4021 = vmatmul.msk.f32.gmra.mxu0 %vm2381_vm4, %v2372_v35 }
 0x2c8   : > { %v1374_v44 = vpop.permute.xlu2 %1373 }
 0x2c9   : > { %v1372_v23 = vpop.permute.xlu0 %1371 }
 0x2ca   : > { %v2175_v22 = vsel %vm2147_vm12, %v2142_v5, %v1372_v23 }
 0x2cd   : > { %v1500_v20 = vpop.permute.xlu1 %1499 }
 0x2ce   : > { %v2208_v17 = vsel %vm2180_vm11, %v2175_v22, %v1500_v20 }
 0x2cf   : > { %v2241_v43 = vsel %vm2213_vm13, %v2208_v17, %v1596_v63 }
 0x2d0   : > { %v1726_v34 = vpop.permute.xlu2 %1725 }
 0x2d1   : > { %v1724_v11 = vpop.permute.xlu0 %1723 }
 0x2d2   : > { %v2274_v9 = vsel %vm2246_vm14, %v2241_v43, %v1724_v11 }
 0x2d5   : > { %v1852_v32 = vpop.permute.xlu1 %1851 }
 0x2d6   : > { %v2307_v60 = vsel %vm2279_vm15, %v2274_v9, %v1852_v32 }
 0x2d7   : > { %v2340_v40 = vsel %vm2312_vm2, %v2307_v60, %v1948_v36 }
 0x2d8   : > { %v2075_v61 = vpop.permute.xlu2 %2074 }
 0x2d9   : > { %v2073_v18 = vpop.permute.xlu0 %2072 }
 0x2da   : > { %v2373_v42 = vsel %vm2345_vm3, %v2340_v40, %v2073_v18 }
 0x2db   : > { %4022 = vmatmul.msk.f32.gmra.mxu0 %vm2381_vm4, %v2373_v42 }
 0x2dd   : > { %v1247_v59 = vpop.permute.xlu1 %1246 }
 0x2de   : > { %v2143_v10 = vsel %vm2114_vm9, %v918_v30, %v1247_v59 }
 0x2df   : > { %v2176_v16 = vsel %vm2147_vm12, %v2143_v10, %v1374_v44 }
 0x2e0   : > { %v1504_v24 = vpop.permute.xlu2 %1503 }
 0x2e1   : > { %v1502_v28 = vpop.permute.xlu0 %1501 }
 0x2e2   : > { %v2209_v7 = vsel %vm2180_vm11, %v2176_v16, %v1502_v28 }
 0x2e5   : > { %v1598_v33 = vpop.permute.xlu1 %1597 }
 0x2e6   : > { %v2242_v37 = vsel %vm2213_vm13, %v2209_v7, %v1598_v33 }
 0x2e7   : > { %v2275_v15 = vsel %vm2246_vm14, %v2242_v37, %v1726_v34 }
 0x2e8   : > { %v1856_v21 = vpop.permute.xlu2 %1855 }
 0x2e9   : > { %v1854_v52 = vpop.permute.xlu0 %1853 }
 0x2ea   : > { %v2308_v29 = vsel %vm2279_vm15, %v2275_v15, %v1854_v52 }
 0x2ed   : > { %v1950_v51 = vpop.permute.xlu1 %1949 }
 0x2ee   : > { %v2341_v19 = vsel %vm2312_vm2, %v2308_v29, %v1950_v51 }
 0x2ef   : > { %v2374_v47 = vsel %vm2345_vm3, %v2341_v19, %v2075_v61 }
 0x2f0   : > { %4023 = vmatmul.msk.f32.gmra.mxu0 %vm2381_vm4, %v2374_v47  ;;  %v1251_v6 = vpop.permute.xlu2 %1250 }
 0x2f1   : > { %v1249_v55 = vpop.permute.xlu0 %1248 }
 0x2f2   : > { %v2144_v8 = vsel %vm2114_vm9, %v5538_v38, %v1249_v55  ;;  %v920_v38 = vmul.f32 %v5778_v25, %v5586_v27 }
 0x2f4   : > { %v2145_v35 = vsel %vm2114_vm9, %v920_v38, %v1251_v6 }
 0x2f5   : > { %v1376_v0 = vpop.permute.xlu1 %1375 }
 0x2f6   : > { %v2177_v50 = vsel %vm2147_vm12, %v2144_v8, %v1376_v0 }
 0x2f7   : > { %v2210_v56 = vsel %vm2180_vm11, %v2177_v50, %v1504_v24 }
 0x2f8   : > { %v1602_v39 = vpop.permute.xlu2 %1601 }
 0x2f9   : > { %v1600_v45 = vpop.permute.xlu0 %1599 }
 0x2fa   : > { %v2243_v49 = vsel %vm2213_vm13, %v2210_v56, %v1600_v45 }
 0x2fd   : > { %v1728_v63 = vpop.permute.xlu1 %1727 }
 0x2fe   : > { %v2276_v62 = vsel %vm2246_vm14, %v2243_v49, %v1728_v63 }
 0x2ff   : > { %v2309_v13 = vsel %vm2279_vm15, %v2276_v62, %v1856_v21 }
 0x300   : > { %v1954_v20 = vpop.permute.xlu2 %1953 }
 0x301   : > { %v1952_v31 = vpop.permute.xlu0 %1951 }
 0x302   : > { %v2342_v14 = vsel %vm2312_vm2, %v2309_v13, %v1952_v31 }
 0x305   : > { %v2077_v36 = vpop.permute.xlu1 %2076 }
 0x306   : > { %v2375_v48 = vsel %vm2345_vm3, %v2342_v14, %v2077_v36  ;;  %v448_v14 = vld [vmem:[%s6703_s3] sm:$0xff] }
 0x307   : > { %4024 = vmatmul.msk.f32.gmra.mxu0 %vm2381_vm4, %v2375_v48  ;;  %2643 = vmatmul.f32.vlgmr.msra.gmra.mxu1 %v448_v14  ;;  %v478_v14 = vld [vmem:[%s6703_s3 + $0xf0] sm:$0xff] }
 0x308   : > { %v1380_v32 = vpop.permute.xlu2 %1379 }
 0x309   : > { %v1378_v58 = vpop.permute.xlu0 %1377 }
 0x30a   : > { %v2178_v23 = vsel %vm2147_vm12, %v2145_v35, %v1378_v58 }
 0x30d   : > { %v1506_v5 = vpop.permute.xlu1 %1505 }
 0x30e   : > { %v2211_v44 = vsel %vm2180_vm11, %v2178_v23, %v1506_v5 }
 0x30f   : > { %v2244_v17 = vsel %vm2213_vm13, %v2211_v44, %v1602_v39  ;;  %v450_v44 = vld [vmem:[%s6703_s3 + $0x10] sm:$0xff] }
 0x310   : > { %v1732_v30 = vpop.permute.xlu2 %1731  ;;  %2646 = vmatmul.f32.gmra.mxu1 %v450_v44  ;;  %v484_v44 = vld [vmem:[%s6703_s3 + $0x120] sm:$0xff] }
 0x311   : > { %v1730_v22 = vpop.permute.xlu0 %1729 }
 0x312   : > { %v2277_v11 = vsel %vm2246_vm14, %v2244_v17, %v1730_v22 }
 0x315   : > { %v1858_v27 = vpop.permute.xlu1 %1857 }
 0x316   : > { %v2310_v25 = vsel %vm2279_vm15, %v2277_v11, %v1858_v27 }
 0x317   : > { %v2343_v43 = vsel %vm2312_vm2, %v2310_v25, %v1954_v20 }
 0x319   : > { %v2079_v34 = vpop.permute.xlu0 %2078 }
 0x31a   : > { %v2376_v9 = vsel %vm2345_vm3, %v2343_v43, %v2079_v34 }
 0x31b   : > { %4025 = vmatmul.msk.f32.gmra.mxu0 %vm2381_vm4, %v2376_v9  ;;  %v452_v9 = vld [vmem:[%s6703_s3 + $0x20] sm:$0xff] }
 0x31c   : > { %2649 = vmatmul.f32.gmra.mxu1 %v452_v9  ;;  %v483_v9 = vld [vmem:[%s6703_s3 + $0x118] sm:$0xff] }
 0x31d   : > { %v1253_v60 = vpop.permute.xlu1 %1252 }
 0x31e   : > { %v2146_v40 = vsel %vm2114_vm9, %v5661_v46, %v1253_v60  ;;  %v5888_v46 = vpop.f32.mrf.mxu0 }
 0x31f   : > { %v2179_v42 = vsel %vm2147_vm12, %v2146_v40, %v1380_v32 }
 0x321   : > { %v1508_v18 = vpop.permute.xlu0 %1507 }
 0x322   : > { %v2212_v59 = vsel %vm2180_vm11, %v2179_v42, %v1508_v18 }
 0x325   : > { %v1604_v61 = vpop.permute.xlu1 %1603 }
 0x326   : > { %v2245_v28 = vsel %vm2213_vm13, %v2212_v59, %v1604_v61  ;;  %v2550_v24 = vpop.f32.mrf.mxu0 }
 0x327   : > { %v2278_v10 = vsel %vm2246_vm14, %v2245_v28, %v1732_v30  ;;  %v2551_v59 = vadd.f32 %v5618_v53, %v2550_v24  ;;  %v454_v28 = vld [vmem:[%s6703_s3 + $0x30] sm:$0xff]  ;;  %v453_v24 = vld [vmem:[%s6703_s3 + $0x28] sm:$0xff] }
 0x328   : > { %2652 = vmatmul.f32.gmra.mxu1 %v454_v28  ;;  %v492_v28 = vld [vmem:[%s6703_s3 + $0x160] sm:$0xff] }
 0x329   : > { %v1860_v16 = vpop.permute.xlu0 %1859 }
 0x32a   : > { %v2311_v33 = vsel %vm2279_vm15, %v2278_v10, %v1860_v16  ;;  %v2548_v10 = vadd.f32 %v5618_v53, %v5888_v46  ;;  %v458_v46 = vld [vmem:[%s6703_s3 + $0x50] sm:$0xff] }
 0x32b   : > { %v2344_v37 = vsel %vm2312_vm2, %v2311_v33, %v1954_v20  ;;  %v2612_v33 = vmax.f32 %v2551_v59, 0.0 }
 0x32d   : > { %v2081_v7 = vpop.permute.xlu1 %2080 }
 0x32e   : > { %v2377_v52 = vsel %vm2345_vm3, %v2344_v37, %v2081_v7  ;;  %v2553_v15 = vpop.f32.mrf.mxu0  ;;  %v2611_v7 = vmax.f32 %v2548_v10, 0.0  ;;  %v449_v37 = vld [vmem:[%s6703_s3 + $0x8] sm:$0xff]  ;;  %v487_v10 = vld [vmem:[%s6703_s3 + $0x138] sm:$0xff] }
 0x32f   : > { %4026 = vmatmul.msk.f32.gmra.mxu0 %vm2381_vm4, %v2377_v52  ;;  %v2554_v42 = vadd.f32 %v5618_v53, %v2553_v15  ;;  %v456_v52 = vld [vmem:[%s6703_s3 + $0x40] sm:$0xff] }
 0x330   : > { %2655 = vmatmul.f32.gmra.mxu1 %v456_v52  ;;  %v460_v15 = vld [vmem:[%s6703_s3 + $0x60] sm:$0xff]  ;;  %v489_v52 = vld [vmem:[%s6703_s3 + $0x148] sm:$0xff] }
 0x331   : > { %v2613_v16 = vmax.f32 %v2554_v42, 0.0  ;;  %v485_v42 = vld [vmem:[%s6703_s3 + $0x128] sm:$0xff] }
 0x336   : > { %v2556_v29 = vpop.f32.mrf.mxu0 }
 0x337   : > { %v2557_v40 = vadd.f32 %v5618_v53, %v2556_v29  ;;  %v455_v29 = vld [vmem:[%s6703_s3 + $0x38] sm:$0xff] }
 0x338   : > { %2658 = vmatmul.f32.gmra.mxu1 %v458_v46 }
 0x339   : > { %v2614_v61 = vmax.f32 %v2557_v40, 0.0 }
 0x33e   : > { %v2559_v51 = vpop.f32.mrf.mxu0 }
 0x33f   : > { %v2560_v32 = vadd.f32 %v5618_v53, %v2559_v51  ;;  %v462_v51 = vld [vmem:[%s6703_s3 + $0x70] sm:$0xff] }
 0x340   : > { %2661 = vmatmul.f32.gmra.mxu1 %v460_v15  ;;  %v491_v15 = vld [vmem:[%s6703_s3 + $0x158] sm:$0xff] }
 0x341   : > { %v2615_v30 = vmax.f32 %v2560_v32, 0.0 }
 0x346   : > { %v2562_v19 = vpop.f32.mrf.mxu0 }
 0x347   : > { %v2563_v43 = vadd.f32 %v5618_v53, %v2562_v19  ;;  %v457_v19 = vld [vmem:[%s6703_s3 + $0x48] sm:$0xff] }
 0x348   : > { %2664 = vmatmul.f32.gmra.mxu1 %v462_v51 }
 0x349   : > { %v2616_v18 = vmax.f32 %v2563_v43, 0.0 }
 0x34e   : > { %v2565_v47 = vpop.f32.mrf.mxu0 }
 0x34f   : > { %v2566_v27 = vadd.f32 %v5618_v53, %v2565_v47  ;;  %v464_v47 = vld [vmem:[%s6703_s3 + $0x80] sm:$0xff] }
 0x350   : > { %2667 = vmatmul.f32.gmra.mxu1 %v464_v47 }
 0x351   : > { %v2617_v60 = vmax.f32 %v2566_v27, 0.0 }
 0x356   : > { %v2568_v55 = vpop.f32.mrf.mxu0 }
 0x357   : > { %v2569_v17 = vadd.f32 %v5618_v53, %v2568_v55  ;;  %v459_v55 = vld [vmem:[%s6703_s3 + $0x58] sm:$0xff] }
 0x359   : > { %v2618_v34 = vmax.f32 %v2569_v17, 0.0  ;;  %v486_v17 = vld [vmem:[%s6703_s3 + $0x130] sm:$0xff] }
 0x35e   : > { %v2571_v21 = vpop.f32.mrf.mxu0 }
 0x35f   : > { %v2572_v22 = vadd.f32 %v5618_v53, %v2571_v21  ;;  %v466_v21 = vld [vmem:[%s6703_s3 + $0x90] sm:$0xff] }
 0x360   : > { %2670 = vmatmul.f32.gmra.mxu1 %v466_v21  ;;  %v498_v21 = vld [vmem:[%s6703_s3 + $0x190] sm:$0xff] }
 0x361   : > { %v2619_v25 = vmax.f32 %v2572_v22, 0.0  ;;  %v479_v22 = vld [vmem:[%s6703_s3 + $0xf8] sm:$0xff] }
 0x366   : > { %v2574_v8 = vpop.f32.mrf.mxu0 }
 0x367   : > { %v2575_v23 = vadd.f32 %v5618_v53, %v2574_v8  ;;  %v461_v8 = vld [vmem:[%s6703_s3 + $0x68] sm:$0xff] }
 0x369   : > { %v2620_v11 = vmax.f32 %v2575_v23, 0.0  ;;  %v477_v23 = vld [vmem:[%s6703_s3 + $0xe8] sm:$0xff] }
 0x36e   : > { %v2577_v0 = vpop.f32.mrf.mxu0 }
 0x36f   : > { %v2578_v58 = vadd.f32 %v5618_v53, %v2577_v0  ;;  %v468_v0 = vld [vmem:[%s6703_s3 + $0xa0] sm:$0xff] }
 0x370   : > { %2673 = vmatmul.f32.gmra.mxu1 %v468_v0 }
 0x371   : > { %v2621_v20 = vmax.f32 %v2578_v58, 0.0 }
 0x376   : > { %v2580_v45 = vpop.f32.mrf.mxu0 }
 0x377   : > { %v2581_v48 = vadd.f32 %v5618_v53, %v2580_v45  ;;  %v463_v45 = vld [vmem:[%s6703_s3 + $0x78] sm:$0xff] }
 0x379   : > { %v2622_v5 = vmax.f32 %v2581_v48, 0.0  ;;  %v480_v48 = vld [vmem:[%s6703_s3 + $0x100] sm:$0xff] }
 0x37e   : > { %v2583_v50 = vpop.f32.mrf.mxu0 }
 0x37f   : > { %v2584_v36 = vadd.f32 %v5618_v53, %v2583_v50  ;;  %v470_v50 = vld [vmem:[%s6703_s3 + $0xb0] sm:$0xff] }
 0x380   : > { %2676 = vmatmul.f32.gmra.mxu1 %v470_v50  ;;  %v495_v50 = vld [vmem:[%s6703_s3 + $0x178] sm:$0xff] }
 0x381   : > { %v2623_v35 = vmax.f32 %v2584_v36, 0.0  ;;  %v473_v36 = vld [vmem:[%s6703_s3 + $0xc8] sm:$0xff] }
 0x386   : > { %v2586_v56 = vpop.f32.mrf.mxu0 }
 0x387   : > { %v2587_v31 = vadd.f32 %v5618_v53, %v2586_v56  ;;  %v465_v56 = vld [vmem:[%s6703_s3 + $0x88] sm:$0xff] }
 0x389   : > { %v2624_v39 = vmax.f32 %v2587_v31, 0.0  ;;  %v476_v31 = vld [vmem:[%s6703_s3 + $0xe0] sm:$0xff] }
 0x398   : > { %v2589_v6 = vpop.f32.mrf.mxu0 }
 0x399   : > { %v2590_v49 = vadd.f32 %v5618_v53, %v2589_v6  ;;  %v472_v6 = vld [vmem:[%s6703_s3 + $0xc0] sm:$0xff] }
 0x39a   : > { %2679 = vmatmul.f32.gmra.mxu1 %v472_v6 }
 0x39b   : > { %v2625_v38 = vmax.f32 %v2590_v49, 0.0  ;;  %v474_v49 = vld [vmem:[%s6703_s3 + $0xd0] sm:$0xff] }
 0x3a2   : > { %2682 = vmatmul.f32.gmra.mxu1 %v474_v49 }
 0x3aa   : > { %2685 = vmatmul.f32.gmra.mxu1 %v476_v31  ;;  %v502_v31 = vld [vmem:[%s6703_s3 + $0x1b0] sm:$0xff] }
 0x3ac   : > { %v2592_v63 = vpop.f32.mrf.mxu0 }
 0x3ad   : > { %v2593_v62 = vadd.f32 %v5618_v53, %v2592_v63  ;;  %v451_v53 = vld [vmem:[%s6703_s3 + $0x18] sm:$0xff] }
 0x3ae   : > { %v467_v63 = vld [vmem:[%s6703_s3 + $0x98] sm:$0xff] }
 0x3af   : > { %v2626_v13 = vmax.f32 %v2593_v62, 0.0  ;;  %v469_v62 = vld [vmem:[%s6703_s3 + $0xa8] sm:$0xff] }
 0x3b1   : > { %2740 = vmatpush.msra.mxu2 %v2626_v13  ;;  %v471_v13 = vld [vmem:[%s6703_s3 + $0xb8] sm:$0xff] }
 0x3b2   : > { %2688 = vmatmul.f32.gmra.mxu1 %v478_v14 }
 0x3b3   : > { %2741 = vmatpush.msra.mxu2 %v2625_v38  ;;  %v2644_v38 = vpop.f32.mrf.mxu1 }
 0x3b5   : > { %2742 = vmatpush.msra.mxu2 %v2624_v39  ;;  %v475_v39 = vld [vmem:[%s6703_s3 + $0xd8] sm:$0xff] }
 0x3b7   : > { %2743 = vmatpush.msra.mxu2 %v2623_v35  ;;  %v482_v35 = vld [vmem:[%s6703_s3 + $0x110] sm:$0xff] }
 0x3b9   : > { %2744 = vmatpush.msra.mxu2 %v2622_v5 }
 0x3ba   : > { %2691 = vmatmul.f32.gmra.mxu1 %v480_v48  ;;  %v504_v48 = vld [vmem:[%s6703_s3 + $0x1c0] sm:$0xff] }
 0x3bb   : > { %2745 = vmatpush.msra.mxu2 %v2621_v20  ;;  %v2647_v58 = vpop.f32.mrf.mxu1 }
 0x3bd   : > { %2746 = vmatpush.msra.mxu2 %v2620_v11  ;;  %v481_v11 = vld [vmem:[%s6703_s3 + $0x108] sm:$0xff] }
 0x3bf   : > { %2747 = vmatpush.msra.mxu2 %v2619_v25 }
 0x3c1   : > { %2748 = vmatpush.msra.mxu2 %v2618_v34  ;;  %v488_v34 = vld [vmem:[%s6703_s3 + $0x140] sm:$0xff] }
 0x3c2   : > { %2694 = vmatmul.f32.gmra.mxu1 %v482_v35 }
 0x3c3   : > { %2749 = vmatpush.msra.mxu2 %v2617_v60  ;;  %v2650_v5 = vpop.f32.mrf.mxu1 }
 0x3c5   : > { %2750 = vmatpush.msra.mxu2 %v2616_v18  ;;  %v490_v18 = vld [vmem:[%s6703_s3 + $0x150] sm:$0xff] }
 0x3c7   : > { %2751 = vmatpush.msra.mxu2 %v2615_v30 }
 0x3c9   : > { %2752 = vmatpush.msra.mxu2 %v2614_v61 }
 0x3ca   : > { %2697 = vmatmul.f32.gmra.mxu1 %v484_v44  ;;  %v506_v44 = vld [vmem:[%s6703_s3 + $0x1d0] sm:$0xff] }
 0x3cb   : > { %2753 = vmatpush.msra.mxu2 %v2613_v16  ;;  %v2653_v20 = vpop.f32.mrf.mxu1 }
 0x3cd   : > { %2754 = vmatpush.msra.mxu2 %v2612_v33 }
 0x3cf   : > { %2755 = vmatpush.msra.mxu2 %v2611_v7 }
 0x3d0   : > { %2756 = vmatmul.f32.vlgmr.msra.gmra.mxu2 %v449_v37  ;;  %v494_v37 = vld [vmem:[%s6703_s3 + $0x170] sm:$0xff] }
 0x3d2   : > { %2700 = vmatmul.f32.gmra.mxu1 %v486_v17 }
 0x3d3   : > { %v2656_v27 = vpop.f32.mrf.mxu1 }
 0x3d8   : > { %2759 = vmatmul.f32.gmra.mxu2 %v451_v53 }
 0x3da   : > { %2703 = vmatmul.f32.gmra.mxu1 %v488_v34 }
 0x3db   : > { %v2659_v32 = vpop.f32.mrf.mxu1 }
 0x3e0   : > { %2762 = vmatmul.f32.gmra.mxu2 %v453_v24 }
 0x3e2   : > { %2706 = vmatmul.f32.gmra.mxu1 %v490_v18  ;;  %v505_v18 = vld [vmem:[%s6703_s3 + $0x1c8] sm:$0xff] }
 0x3e3   : > { %v2662_v30 = vpop.f32.mrf.mxu1 }
 0x3e8   : > { %2765 = vmatmul.f32.gmra.mxu2 %v455_v29  ;;  %v496_v29 = vld [vmem:[%s6703_s3 + $0x180] sm:$0xff] }
 0x3ea   : > { %2709 = vmatmul.f32.gmra.mxu1 %v492_v28 }
 0x3eb   : > { %v2665_v16 = vpop.f32.mrf.mxu1 }
 0x3f0   : > { %2768 = vmatmul.f32.gmra.mxu2 %v457_v19 }
 0x3f2   : > { %2712 = vmatmul.f32.gmra.mxu1 %v494_v37 }
 0x3f3   : > { %v2668_v53 = vpop.f32.mrf.mxu1 }
 0x3f8   : > { %2771 = vmatmul.f32.gmra.mxu2 %v459_v55  ;;  %v493_v55 = vld [vmem:[%s6703_s3 + $0x168] sm:$0xff] }
 0x3fa   : > { %2715 = vmatmul.f32.gmra.mxu1 %v496_v29 }
 0x3fb   : > { %v2671_v51 = vpop.f32.mrf.mxu1 }
 0x400   : > { %2774 = vmatmul.f32.gmra.mxu2 %v461_v8 }
 0x402   : > { %2718 = vmatmul.f32.gmra.mxu1 %v498_v21 }
 0x403   : > { %v2674_v8 = vpop.f32.mrf.mxu1 }
 0x408   : > { %2777 = vmatmul.f32.gmra.mxu2 %v463_v45 }
 0x40b   : > { %v2677_v6 = vpop.f32.mrf.mxu1 }
 0x410   : > { %2780 = vmatmul.f32.gmra.mxu2 %v465_v56  ;;  %v500_v56 = vld [vmem:[%s6703_s3 + $0x1a0] sm:$0xff] }
 0x411   : > { %2721 = vmatmul.f32.gmra.mxu1 %v500_v56 }
 0x418   : > { %2783 = vmatmul.f32.gmra.mxu2 %v467_v63 }
 0x419   : > { %2724 = vmatmul.f32.gmra.mxu1 %v502_v31 }
 0x420   : > { %2786 = vmatmul.f32.gmra.mxu2 %v469_v62  ;;  %v497_v62 = vld [vmem:[%s6703_s3 + $0x188] sm:$0xff] }
 0x421   : > { %2727 = vmatmul.f32.gmra.mxu1 %v504_v48 }
 0x428   : > { %2789 = vmatmul.f32.gmra.mxu2 %v471_v13  ;;  %v2680_v13 = vpop.f32.mrf.mxu1 }
 0x429   : > { %2730 = vmatmul.f32.gmra.mxu1 %v506_v44 }
 0x430   : > { %2792 = vmatmul.f32.gmra.mxu2 %v473_v36 }
 0x438   : > { %2795 = vmatmul.f32.gmra.mxu2 %v475_v39 }
 0x440   : > { %2798 = vmatmul.f32.gmra.mxu2 %v477_v23 }
 0x448   : > { %2801 = vmatmul.f32.gmra.mxu2 %v479_v22 }
 0x450   : > { %2804 = vmatmul.f32.gmra.mxu2 %v481_v11 }
 0x453   : > { %v2757_v25 = vpop.f32.mrf.mxu2 }
 0x454   : > { %v6018_v43 = vadd.f32 %v2757_v25, %v2644_v38  ;;  %v499_v38 = vld [vmem:[%s6703_s3 + $0x198] sm:$0xff]  ;;  %v508_v25 = vld [vmem:[%s6703_s3 + $0x1e0] sm:$0xff] }
 0x455   : > { %2733 = vmatmul.f32.gmra.mxu1 %v508_v25 }
 0x458   : > { %2807 = vmatmul.f32.gmra.mxu2 %v483_v9 }
 0x45b   : > { %v2760_v60 = vpop.f32.mrf.mxu2 }
 0x45c   : > { %v6026_v40 = vadd.f32 %v2760_v60, %v2647_v58  ;;  %v2683_v58 = vpop.f32.mrf.mxu1 }
 0x460   : > { %2810 = vmatmul.f32.gmra.mxu2 %v485_v42  ;;  %v510_v42 = vld [vmem:[%s6703_s3 + $0x1f0] sm:$0xff] }
 0x461   : > { %2736 = vmatmul.f32.gmra.mxu1 %v510_v42 }
 0x463   : > { %v2763_v59 = vpop.f32.mrf.mxu2 }
 0x464   : > { %v6034_v61 = vadd.f32 %v2763_v59, %v2650_v5  ;;  %v501_v5 = vld [vmem:[%s6703_s3 + $0x1a8] sm:$0xff] }
 0x468   : > { %2813 = vmatmul.f32.gmra.mxu2 %v487_v10 }
 0x46b   : > { %v2766_v33 = vpop.f32.mrf.mxu2 }
 0x46c   : > { %v6042_v7 = vadd.f32 %v2766_v33, %v2653_v20  ;;  %v2686_v20 = vpop.f32.mrf.mxu1 }
 0x470   : > { %2816 = vmatmul.f32.gmra.mxu2 %v489_v52 }
 0x473   : > { %v2769_v46 = vpop.f32.mrf.mxu2 }
 0x474   : > { %v6050_v24 = vadd.f32 %v2769_v46, %v2656_v27  ;;  %v503_v27 = vld [vmem:[%s6703_s3 + $0x1b8] sm:$0xff]  ;;  %v2689_v9 = vpop.f32.mrf.mxu1 }
 0x478   : > { %2819 = vmatmul.f32.gmra.mxu2 %v491_v15 }
 0x47b   : > { %v2772_v19 = vpop.f32.mrf.mxu2 }
 0x47c   : > { %v6058_v47 = vadd.f32 %v2772_v19, %v2659_v32  ;;  %v2692_v28 = vpop.f32.mrf.mxu1  ;;  %v511_v19 = vld [vmem:[%s6703_s3 + $0x1f8] sm:$0xff] }
 0x480   : > { %2822 = vmatmul.f32.gmra.mxu2 %v493_v55 }
 0x483   : > { %v2775_v0 = vpop.f32.mrf.mxu2 }
 0x484   : > { %v6066_v45 = vadd.f32 %v2775_v0, %v2662_v30  ;;  %v2695_v46 = vpop.f32.mrf.mxu1 }
 0x488   : > { %2825 = vmatmul.f32.gmra.mxu2 %v495_v50 }
 0x48b   : > { %v2778_v63 = vpop.f32.mrf.mxu2 }
 0x48c   : > { %v6074_v49 = vadd.f32 %v2778_v63, %v2665_v16  ;;  %v507_v16 = vld [vmem:[%s6703_s3 + $0x1d8] sm:$0xff]  ;;  %v2698_v21 = vpop.f32.mrf.mxu1 }
 0x490   : > { %2828 = vmatmul.f32.gmra.mxu2 %v497_v62 }
 0x493   : > { %v2781_v14 = vpop.f32.mrf.mxu2 }
 0x494   : > { %v6082_v36 = vadd.f32 %v2781_v14, %v2668_v53  ;;  %v509_v53 = vld [vmem:[%s6703_s3 + $0x1e8] sm:$0xff]  ;;  %v2701_v56 = vpop.f32.mrf.mxu1 }
 0x496   : > { %v2853_v39 = vmax.f32 %v6018_v43, %v6082_v36 }
 0x498   : > { %2831 = vmatmul.f32.gmra.mxu2 %v499_v38 }
 0x49b   : > { %v2784_v35 = vpop.f32.mrf.mxu2 }
 0x49c   : > { %v6092_v23 = vadd.f32 %v2784_v35, %v2671_v51  ;;  %v2704_v31 = vpop.f32.mrf.mxu1 }
 0x49e   : > { %v2854_v22 = vmax.f32 %v6026_v40, %v6092_v23  ;;  %v2907_v40 = vand.u32 7, %v4567_v41 }
 0x4a0   : > { %2834 = vmatmul.f32.gmra.mxu2 %v501_v5  ;;  %vm2939_vm2 = vcmp.ne.s32.totalorder %v2907_v40, 0  ;;  %vm2915_vm3 = vcmp.ne.s32.totalorder %v2907_v40, 7 }
 0x4a3   : > { %v2787_v17 = vpop.f32.mrf.mxu2 }
 0x4a4   : > { %v6102_v11 = vadd.f32 %v2787_v17, %v2674_v8  ;;  %v2707_v48 = vpop.f32.mrf.mxu1 }
 0x4a6   : > { %v2855_v34 = vmax.f32 %v6034_v61, %v6102_v11  ;;  %v2908_v61 = vand.u32 7, %v4604_v54 }
 0x4a8   : > { %2837 = vmatmul.f32.gmra.mxu2 %v503_v27  ;;  %vm2940_vm4 = vcmp.ne.s32.totalorder %v2908_v61, 0  ;;  %vm2916_vm6 = vcmp.ne.s32.totalorder %v2908_v61, 7 }
 0x4ab   : > { %v2790_v32 = vpop.f32.mrf.mxu2 }
 0x4ac   : > { %v6112_v60 = vadd.f32 %v2790_v32, %v2677_v6  ;;  %v2710_v5 = vpop.f32.mrf.mxu1 }
 0x4ae   : > { %v2856_v30 = vmax.f32 %v6042_v7, %v6112_v60 }
 0x4b0   : > { %2840 = vmatmul.f32.gmra.mxu2 %v505_v18 }
 0x4b3   : > { %v2793_v59 = vpop.f32.mrf.mxu2 }
 0x4b4   : > { %v6122_v10 = vadd.f32 %v2793_v59, %v2680_v13  ;;  %v2713_v17 = vpop.f32.mrf.mxu1 }
 0x4b6   : > { %v2857_v33 = vmax.f32 %v6050_v24, %v6122_v10 }
 0x4b8   : > { %2843 = vmatmul.f32.gmra.mxu2 %v507_v16 }
 0x4bb   : > { %v2796_v37 = vpop.f32.mrf.mxu2 }
 0x4bc   : > { %v6129_v52 = vadd.f32 %v2796_v37, %v2683_v58  ;;  %v2716_v32 = vpop.f32.mrf.mxu1 }
 0x4be   : > { %v2858_v15 = vmax.f32 %v6058_v47, %v6129_v52 }
 0x4c0   : > { %2846 = vmatmul.f32.gmra.mxu2 %v509_v53  ;;  %v2905_v53 = vand.u32 7, %v4498_v12 }
 0x4c2   : > { %vm2937_vm9 = vcmp.ne.s32.totalorder %v2905_v53, 0  ;;  %vm2913_vm13 = vcmp.ne.s32.totalorder %v2905_v53, 7 }
 0x4c3   : > { %v2799_v29 = vpop.f32.mrf.mxu2 }
 0x4c4   : > { %v6136_v51 = vadd.f32 %v2799_v29, %v2686_v20 }
 0x4c6   : > { %v2859_v55 = vmax.f32 %v6066_v45, %v6136_v51 }
 0x4c8   : > { %2849 = vmatmul.f32.gmra.mxu2 %v511_v19 }
 0x4cb   : > { %v2802_v8 = vpop.f32.mrf.mxu2 }
 0x4cc   : > { %v6143_v0 = vadd.f32 %v2802_v8, %v2689_v9 }
 0x4ce   : > { %v2860_v50 = vmax.f32 %v6074_v49, %v6143_v0 }
 0x4d3   : > { %v2805_v6 = vpop.f32.mrf.mxu2 }
 0x4d4   : > { %v2806_v63 = vadd.f32 %v2805_v6, %v2692_v28  ;;  %v2719_v28 = vpop.f32.mrf.mxu1 }
 0x4db   : > { %v2808_v62 = vpop.f32.mrf.mxu2 }
 0x4dc   : > { %v2809_v13 = vadd.f32 %v2808_v62, %v2695_v46  ;;  %v2722_v29 = vpop.f32.mrf.mxu1  ;;  %v4036_v62 = vsel %vm2937_vm9, 1.0, %v4343_v1 }
 0x4e3   : > { %v2811_v14 = vpop.f32.mrf.mxu2 }
 0x4e4   : > { %v6147_v38 = vadd.f32 %v2811_v14, %v2698_v21  ;;  %v2904_v21 = vand.u32 7, %v4476_v2 }
 0x4e6   : > { %vm2912_vm11 = vcmp.ne.s32.totalorder %v2904_v21, 7  ;;  %vm2936_vm12 = vcmp.ne.s32.totalorder %v2904_v21, 0 }
 0x4eb   : > { %v2814_v58 = vpop.f32.mrf.mxu2 }
 0x4ec   : > { %v6149_v35 = vadd.f32 %v2814_v58, %v2701_v56  ;;  %v6176_v58 = vsel %vm2913_vm13, 1.0, %v4343_v1  ;;  %vm3268_vm13 = vcmask 130048  }
 0x4f3   : > { %v2817_v44 = vpop.f32.mrf.mxu2 }
 0x4f4   : > { %v6151_v20 = vadd.f32 %v2817_v44, %v2704_v31  ;;  %v2906_v31 = vand.u32 7, %v4479_v3  ;;  %v4027_v3 = vsel %vm2912_vm11, 1.0, %v4343_v1  ;;  %v2725_v44 = vpop.f32.mrf.mxu1 }
 0x4f6   : > { %vm2938_vm14 = vcmp.ne.s32.totalorder %v2906_v31, 0  ;;  %vm2914_vm15 = vcmp.ne.s32.totalorder %v2906_v31, 7 }
 0x4fb   : > { %v2820_v27 = vpop.f32.mrf.mxu2 }
 0x4fc   : > { %v6153_v25 = vadd.f32 %v2820_v27, %v2707_v48 }
 0x503   : > { %v2823_v9 = vpop.f32.mrf.mxu2 }
 0x504   : > { %v6155_v18 = vadd.f32 %v2823_v9, %v2710_v5  ;;  %v6179_v5 = vsel %vm2936_vm12, 1.0, %v4343_v1 }
 0x50b   : > { %v2826_v42 = vpop.f32.mrf.mxu2 }
 0x50c   : > { %v6157_v59 = vadd.f32 %v2826_v42, %v2713_v17  ;;  %v6183_v42 = vsel %vm2938_vm14, 1.0, %v4343_v1  ;;  %vm3277_vm14 = vcmask 261120  }
 0x513   : > { %v2829_v16 = vpop.f32.mrf.mxu2 }
 0x514   : > { %v2830_v37 = vadd.f32 %v2829_v16, %v2716_v32 }
 0x516   : > { %v2861_v46 = vmax.f32 %v2806_v63, %v2830_v37 }
 0x518   : > { %v2869_v19 = vmax.f32 %v2853_v39, %v2861_v46 }
 0x51a   : > { %v4129_v8 = vpack.i.bf16 %v2869_v19, %v4343_v1  ;;  %v2967_v56 = vrot.slane %v2869_v19, 7  ;;  %v2997_v36 = vrot.slane %v2869_v19, 1 }
 0x51b   : > { %v2832_v6 = vpop.f32.mrf.mxu2 }
 0x51c   : > { %v2833_v14 = vadd.f32 %v2832_v6, %v2719_v28  ;;  %4130 = vrot.lane.b32.xlu2 %v4129_v8, %s6727_s18  ;;  %v2987_v63 = vsel %vm799_vm1, 0.0, %v2967_v56  ;;  %v3020_v27 = vsel %vm923_vm0, 0.0, %v2997_v36 }
 0x51d   : > { %v6169_v39 = vmul.f32 %v4036_v62, %v2987_v63  ;;  %v3021_v16 = vmul.f32 %v4027_v3, %v3020_v27  ;;  %v3032_v53 = vmul.f32 %v6179_v5, %v2987_v63  ;;  %v4038_v63 = vsel %vm2939_vm2, 1.0, %v4343_v1 }
 0x51e   : > { %v2862_v43 = vmax.f32 %v2809_v13, %v2833_v14  ;;  %v2728_v14 = vpop.f32.mrf.mxu1  ;;  %vm3295_vm2 = vcmask 523264  }
 0x520   : > { %v2870_v48 = vmax.f32 %v2854_v22, %v2862_v43 }
 0x522   : > { %v4134_v17 = vpack.i.bf16 %v2870_v48, %v2869_v19  ;;  %v2998_v13 = vrot.slane %v2870_v48, 1  ;;  %v2968_v9 = vrot.slane %v2870_v48, 7 }
 0x523   : > { %v2835_v32 = vpop.f32.mrf.mxu2 }
 0x524   : > { %v2836_v23 = vadd.f32 %v2835_v32, %v2722_v29  ;;  %4135 = vrot.lane.b32.xlu2 %v4134_v17, %s6732_s15  ;;  %v2999_v22 = vsel %vm923_vm0, %v2997_v36, %v2998_v13  ;;  %v2969_v28 = vsel %vm799_vm1, %v2967_v56, %v2968_v9 }
 0x525   : > { %v3022_v37 = vmul.f32 %v6176_v58, %v2999_v22  ;;  %v3033_v46 = vmul.f32 %v4036_v62, %v2969_v28  ;;  %v6193_v21 = vmul.f32 %v6183_v42, %v2969_v28  ;;  %v3042_v17 = vmul.f32 %v4027_v3, %v2999_v22 }
 0x526   : > { %v2863_v19 = vmax.f32 %v6147_v38, %v2836_v23  ;;  %v6203_v38 = vsel %vm2914_vm15, 1.0, %v4343_v1  ;;  %vm3286_vm15 = vcmask 392192  }
 0x527   : > { %v4139_v41 = vpack.i.bf16 %v3022_v37, %v3021_v16  ;;  %v4144_v29 = vpack.i.bf16 %v3033_v46, %v3032_v53  ;;  %v2909_v46 = vand.u32 7, %v4640_v4 }
 0x528   : > { %v6198_v8 = vmax.f32 %v2855_v34, %v2863_v19  ;;  %v3052_v34 = vmul.f32 %v6179_v5, %v2969_v28 }
 0x529   : > { %4140 = vrot.lane.b32.xlu0 %v4139_v41, %s6728_s0  ;;  %4145 = vrot.lane.b32.xlu1 %v4144_v29, %s6729_s20  ;;  %v2731_v29 = vpop.f32.mrf.mxu1  ;;  %vm2941_vm8 = vcmp.ne.s32.totalorder %v2909_v46, 0  ;;  %vm2917_vm10 = vcmp.ne.s32.totalorder %v2909_v46, 7 }
 0x52a   : > { %v4149_v56 = vpack.i.bf16 %v6198_v8, %v2870_v48  ;;  %v2970_v6 = vrot.slane %v6198_v8, 7  ;;  %v3000_v31 = vrot.slane %v6198_v8, 1  ;;  %v4040_v10 = vsel %vm2941_vm8, 1.0, %v4343_v1 }
 0x52b   : > { %v2838_v11 = vpop.f32.mrf.mxu2 }
 0x52c   : > { %v2839_v43 = vadd.f32 %v2838_v11, %v2725_v44  ;;  %4150 = vrot.lane.b32.xlu2 %v4149_v56, %s6733_s29  ;;  %v2971_v36 = vsel %vm799_vm1, %v2968_v9, %v2970_v6  ;;  %v3001_v48 = vsel %vm923_vm0, %v2998_v13, %v3000_v31 }
 0x52d   : > { %v3053_v27 = vmul.f32 %v4036_v62, %v2971_v36  ;;  %v3043_v32 = vmul.f32 %v6176_v58, %v3001_v48  ;;  %v3023_v54 = vmul.f32 %v6203_v38, %v3001_v48  ;;  %v3034_v23 = vmul.f32 %v6183_v42, %v2971_v36 }
 0x52e   : > { %v2864_v28 = vmax.f32 %v6149_v35, %v2839_v43  ;;  %v6218_v16 = vmul.f32 %v4038_v63, %v2971_v36  ;;  %v6220_v53 = vmul.f32 %v4027_v3, %v3001_v48  ;;  %v6228_v62 = vsel %vm2915_vm3, 1.0, %v4343_v1 }
 0x52f   : > { %v4164_v44 = vpack.i.bf16 %v3053_v27, %v3052_v34  ;;  %v4159_v37 = vpack.i.bf16 %v3043_v32, %v3042_v17  ;;  %v4039_v3 = vsel %vm2940_vm4, 1.0, %v4343_v1  ;;  %vm3304_vm3 = vcmask 654336  }
 0x530   : > { %v2872_v13 = vmax.f32 %v2856_v30, %v2864_v28  ;;  %vm3313_vm4 = vcmask 785408  }
 0x531   : > { %4155 = vrot.lane.b32.xlu0 %v4149_v56, %s6727_s18  ;;  %4165 = vrot.lane.b32.xlu1 %v4164_v44, %s6730_s17 }
 0x532   : > { %v3002_v35 = vrot.slane %v2872_v13, 1  ;;  %v2972_v9 = vrot.slane %v2872_v13, 7  ;;  %v4169_v22 = vpack.i.bf16 %v2872_v13, %v6198_v8 }
 0x533   : > { %v2841_v40 = vpop.f32.mrf.mxu2 }
 0x534   : > { %v2842_v7 = vadd.f32 %v2841_v40, %v2728_v14  ;;  %v3003_v60 = vsel %vm923_vm0, %v3000_v31, %v3002_v35  ;;  %v2973_v30 = vsel %vm799_vm1, %v2970_v6, %v2972_v9 }
 0x535   : > { %v3024_v19 = vmul.f32 %v6228_v62, %v3003_v60  ;;  %v3035_v41 = vmul.f32 %v4038_v63, %v2973_v30  ;;  %v3044_v56 = vmul.f32 %v6203_v38, %v3003_v60  ;;  %v3054_v11 = vmul.f32 %v6183_v42, %v2973_v30 }
 0x536   : > { %v2865_v8 = vmax.f32 %v6151_v20, %v2842_v7  ;;  %v6239_v34 = vmul.f32 %v4039_v3, %v2973_v30  ;;  %v6242_v4 = vmul.f32 %v6176_v58, %v3003_v60  ;;  %v6252_v20 = vsel %vm2916_vm6, 1.0, %v4343_v1 }
 0x537   : > { %v4174_v14 = vpack.i.bf16 %v3024_v19, %v3023_v54  ;;  %v4179_v31 = vpack.i.bf16 %v3035_v41, %v3034_v23  ;;  %v2911_v7 = vand.u32 7, %v4729_v57  ;;  %vm3322_vm6 = vcmask 916480  }
 0x538   : > { %v6247_v6 = vmax.f32 %v2857_v33, %v2865_v8  ;;  %v2910_v33 = vand.u32 7, %v4687_v26 }
 0x539   : > { %4160 = vrot.lane.b32.xlu0 %v4159_v37, %s6735_s19  ;;  %4175 = vrot.lane.b32.xlu1 %v4174_v14, %s6728_s0  ;;  %vm2943_vm11 = vcmp.ne.s32.totalorder %v2911_v7, 0  ;;  %vm2919_vm12 = vcmp.ne.s32.totalorder %v2911_v7, 7 }
 0x53a   : > { %4180 = vrot.lane.b32.xlu2 %v4179_v31, %s6729_s20  ;;  %v3004_v58 = vrot.slane %v6247_v6, 1  ;;  %v2974_v42 = vrot.slane %v6247_v6, 7  ;;  %v4184_v61 = vpack.i.bf16 %v6247_v6, %v2872_v13  ;;  %v2734_v13 = vpop.f32.mrf.mxu1  ;;  %vm2942_vm5 = vcmp.ne.s32.totalorder %v2910_v33, 0 }
 0x53b   : > { %v2844_v24 = vpop.f32.mrf.mxu2  ;;  %v4041_v46 = vsel %vm2942_vm5, 1.0, %v4343_v1  ;;  %vm2918_vm9 = vcmp.ne.s32.totalorder %v2910_v33, 7 }
 0x53c   : > { %v2845_v43 = vadd.f32 %v2844_v24, %v2731_v29  ;;  %v3005_v36 = vsel %vm923_vm0, %v3002_v35, %v3004_v58  ;;  %v2975_v48 = vsel %vm799_vm1, %v2972_v9, %v2974_v42 }
 0x53d   : > { %v3045_v17 = vmul.f32 %v6228_v62, %v3005_v36  ;;  %v3055_v27 = vmul.f32 %v4038_v63, %v2975_v48  ;;  %v3025_v32 = vmul.f32 %v6252_v20, %v3005_v36  ;;  %v3036_v54 = vmul.f32 %v4039_v3, %v2975_v48 }
 0x53e   : > { %v2866_v23 = vmax.f32 %v6153_v25, %v2845_v43  ;;  %v6265_v28 = vmul.f32 %v4040_v10, %v2975_v48  ;;  %v6268_v44 = vmul.f32 %v6203_v38, %v3005_v36  ;;  %v4032_v25 = vsel %vm2917_vm10, 1.0, %v4343_v1 }
 0x53f   : > { %v4189_v37 = vpack.i.bf16 %v3045_v17, %v3044_v56  ;;  %v4199_v26 = vpack.i.bf16 %v3055_v27, %v3054_v11  ;;  %vm3556_vm10 = vcmask 1044480  }
 0x540   : > { %v2874_v35 = vmax.f32 %v2858_v15, %v2866_v23  ;;  %v6312_v23 = vsel %vm2919_vm12, 1.0, %v4343_v1  ;;  %vm3565_vm12 = vcmask 1043456  }
 0x541   : > { %4170 = vrot.lane.b32.xlu0 %v4169_v22, %s6732_s15  ;;  %4190 = vrot.lane.b32.xlu1 %v4189_v37, %s6735_s19 }
 0x542   : > { %4200 = vrot.lane.b32.xlu2 %v4199_v26, %s6730_s17  ;;  %v3006_v63 = vrot.slane %v2874_v35, 1  ;;  %v4204_v38 = vpack.i.bf16 %v2874_v35, %v6247_v6  ;;  %v2976_v9 = vrot.slane %v2874_v35, 7 }
 0x543   : > { %v2847_v40 = vpop.f32.mrf.mxu2 }
 0x544   : > { %v2848_v47 = vadd.f32 %v2847_v40, %v2734_v13  ;;  %v3007_v52 = vsel %vm923_vm0, %v3004_v58, %v3006_v63  ;;  %v2977_v15 = vsel %vm799_vm1, %v2974_v42, %v2976_v9  ;;  %v4042_v58 = vsel %vm2943_vm11, 1.0, %v4343_v1 }
 0x545   : > { %v3026_v22 = vmul.f32 %v4032_v25, %v3007_v52  ;;  %v3037_v60 = vmul.f32 %v4040_v10, %v2977_v15  ;;  %v3046_v30 = vmul.f32 %v6252_v20, %v3007_v52  ;;  %v3056_v19 = vmul.f32 %v4039_v3, %v2977_v15  ;;  %v2737_v3 = vpop.f32.mrf.mxu1 }
 0x546   : > { %v2867_v41 = vmax.f32 %v6155_v18, %v2848_v47  ;;  %v6284_v29 = vmul.f32 %v4041_v46, %v2977_v15  ;;  %v6287_v56 = vmul.f32 %v6228_v62, %v3007_v52  ;;  %v4033_v18 = vsel %vm2918_vm9, 1.0, %v4343_v1  ;;  %v2891_v47 = vld [vmem:[%s6704_s4 + $0x70] sm:$0xff]  ;;  %v2890_v52 = vld [vmem:[%s6704_s4 + $0x68] sm:$0xff]  ;;  %v2889_v15 = vld [vmem:[%s6704_s4 + $0x60] sm:$0xff] }
 0x547   : > { %v4209_v11 = vpack.i.bf16 %v3026_v22, %v3025_v32  ;;  %v4214_v57 = vpack.i.bf16 %v3037_v60, %v3036_v54  ;;  %v2888_v22 = vld [vmem:[%s6704_s4 + $0x58] sm:$0xff]  ;;  %v2887_v60 = vld [vmem:[%s6704_s4 + $0x50] sm:$0xff] }
 0x548   : > { %v2875_v8 = vmax.f32 %v2859_v55, %v2867_v41  ;;  %v2884_v41 = vld [vmem:[%s6704_s4 + $0x38] sm:$0xff] }
 0x549   : > { %4185 = vrot.lane.b32.xlu0 %v4184_v61, %s6733_s29  ;;  %4195 = vrot.lane.b32.xlu1 %v4184_v61, %s6727_s18 }
 0x54a   : > { %4210 = vrot.lane.b32.xlu2 %v4209_v11, %s6728_s0  ;;  %v3008_v14 = vrot.slane %v2875_v8, 1  ;;  %v4219_v31 = vpack.i.bf16 %v2875_v8, %v2874_v35  ;;  %v2978_v62 = vrot.slane %v2875_v8, 7 }
 0x54b   : > { %v2850_v6 = vpop.f32.mrf.mxu2 }
 0x54c   : > { %v2851_v42 = vadd.f32 %v2850_v6, %v2737_v3  ;;  %v3009_v45 = vsel %vm923_vm0, %v3006_v63, %v3008_v14  ;;  %v2979_v51 = vsel %vm799_vm1, %v2976_v9, %v2978_v62  ;;  %v2881_v3 = vld [vmem:[%s6704_s4 + $0x20] sm:$0xff] }
 0x54d   : > { %v3047_v55 = vmul.f32 %v4032_v25, %v3009_v45  ;;  %v3057_v24 = vmul.f32 %v4040_v10, %v2979_v51  ;;  %v3038_v33 = vmul.f32 %v4041_v46, %v2979_v51  ;;  %v3027_v61 = vmul.f32 %v4033_v18, %v3009_v45  ;;  %v2877_v6 = vld [vmem:[%s6704_s4] sm:$0xff] }
 0x54e   : > { %v2868_v43 = vmax.f32 %v6157_v59, %v2851_v42  ;;  %v6300_v36 = vmul.f32 %v4042_v58, %v2979_v51  ;;  %v6303_v48 = vmul.f32 %v6252_v20, %v3009_v45 }
 0x54f   : > { %v4224_v17 = vpack.i.bf16 %v3047_v55, %v3046_v30  ;;  %v4234_v27 = vpack.i.bf16 %v3057_v24, %v3056_v19  ;;  %v2886_v30 = vld [vmem:[%s6704_s4 + $0x48] sm:$0xff]  ;;  %v2885_v19 = vld [vmem:[%s6704_s4 + $0x40] sm:$0xff]  ;;  %v2988_v55 = vmul.f32 0.0, %v6179_v5 }
 0x550   : > { %v2876_v32 = vmax.f32 %v2860_v50, %v2868_v43 }
 0x551   : > { %4205 = vrot.lane.b32.xlu1 %v4204_v38, %s6732_s15  ;;  %4215 = vrot.lane.b32.xlu0 %v4214_v57, %s6729_s20  ;;  %v2883_v57 = vld [vmem:[%s6704_s4 + $0x30] sm:$0xff] }
 0x552   : > { %v3010_v10 = vrot.slane %v2876_v32, 1  ;;  %v3029_v54 = vrot.slane %v2876_v32, 7  ;;  %4225 = vrot.lane.b32.xlu2 %v4224_v17, %s6735_s19  ;;  %v4239_v59 = vpack.i.bf16 %v2876_v32, %v2875_v8  ;;  %v2882_v8 = vld [vmem:[%s6704_s4 + $0x28] sm:$0xff] }
 0x554   : > { %v3030_v20 = vsel %vm799_vm1, %v2978_v62, %v3029_v54  ;;  %v3011_v37 = vsel %vm923_vm0, %v3008_v14, %v3010_v10  ;;  %v3051_v26 = vsel %vm799_vm1, %v3029_v54, 0.0  ;;  %v3041_v49 = vsel %vm923_vm0, %v3010_v10, 0.0  ;;  %v2879_v14 = vld [vmem:[%s6704_s4 + $0x10] sm:$0xff]  ;;  %v2878_v62 = vld [vmem:[%s6704_s4 + $0x8] sm:$0xff] }
 0x555   : > { %v3039_v0 = vmul.f32 %v4042_v58, %v3030_v20  ;;  %v3028_v50 = vmul.f32 %v6312_v23, %v3011_v37  ;;  %v3058_v13 = vmul.f32 %v4041_v46, %v3030_v20  ;;  %v3048_v35 = vmul.f32 %v4033_v18, %v3011_v37 }
 0x556   : > { %v3059_v63 = vmul.f32 %v4042_v58, %v3051_v26  ;;  %v6319_v38 = vmul.f32 %v4032_v25, %v3011_v37  ;;  %v6321_v9 = vmul.f32 %v4033_v18, %v3041_v49  ;;  %v2892_v25 = vld [vmem:[%s6704_s4 + $0x78] sm:$0xff]  ;;  %v3049_v46 = vmul.f32 %v6312_v23, %v3041_v49 }
 0x557   : > { %v4249_v40 = vpack.i.bf16 %v3039_v0, %v3038_v33  ;;  %v4244_v7 = vpack.i.bf16 %v3028_v50, %v3027_v61  ;;  %3358 = vmatpush.msra.mxu3 %v2892_v25  ;;  %v2880_v18 = vld [vmem:[%s6704_s4 + $0x18] sm:$0xff] }
 0x559   : > { %4220 = vrot.lane.b32.xlu1 %v4219_v31, %s6733_s29  ;;  %4235 = vrot.lane.b32.xlu0 %v4234_v27, %s6730_s17 }
 0x55a   : > { %4230 = vrot.lane.b32.xlu2 %v4219_v31, %s6727_s18  ;;  %3359 = vmatpush.msra.mxu3 %v2891_v47 }
 0x55c   : > { %3360 = vmatpush.msra.mxu3 %v2890_v52 }
 0x55e   : > { %3361 = vmatpush.msra.mxu3 %v2889_v15 }
 0x560   : > { %3362 = vmatpush.msra.mxu3 %v2888_v22 }
 0x561   : > { %4250 = vrot.lane.b32.xlu1 %v4249_v40, %s6729_s20  ;;  %4245 = vrot.lane.b32.xlu0 %v4244_v7, %s6728_s0  ;;  %s6751_s0 = smov 48   ;;  %s6752_s20 = smov 32  }
 0x562   : > { %4240 = vrot.lane.b32.xlu2 %v4239_v59, %s6732_s15  ;;  %3363 = vmatpush.msra.mxu3 %v2887_v60  ;;  %s6754_s15 = smov 80  }
 0x564   : > { %3364 = vmatpush.msra.mxu3 %v2886_v30 }
 0x566   : > { %3365 = vmatpush.msra.mxu3 %v2885_v19 }
 0x568   : > { %3366 = vmatpush.msra.mxu3 %v2884_v41 }
 0x569   : > { %3232 = vrot.lane.b32.xlu1 %v3058_v13, %s6730_s17  ;;  %3200 = vrot.lane.b32.xlu0 %v3048_v35, %s6735_s19 }
 0x56a   : > { %3256 = vrot.lane.b32.xlu2 %v2876_v32, %s6733_s29  ;;  %3367 = vmatpush.msra.mxu3 %v2883_v57 }
 0x56c   : > { %3368 = vmatpush.msra.mxu3 %v2882_v8 }
 0x56e   : > { %3369 = vmatpush.msra.mxu3 %v2881_v3 }
 0x570   : > { %3370 = vmatpush.msra.mxu3 %v2880_v18 }
 0x571   : > { %3234 = vrot.lane.b32.xlu1 %v3059_v63, %s6730_s17  ;;  %3202 = vrot.lane.b32.xlu0 %v3049_v46, %s6735_s19  ;;  %s6756_s17 = smov 112   ;;  %s404_s19 = sand.u32 1, %s4333_s22  }
 0x572   : > { %3258 = vrot.lane.b32.xlu2 %v4343_v1, %s6733_s29  ;;  %3371 = vmatpush.msra.mxu3 %v2879_v14  ;;  %s6755_s29 = smov 96  }
 0x574   : > { %3372 = vmatpush.msra.mxu3 %v2878_v62 }
 0x576   : > { %v4131_v11 = vpop.permute.xlu2 %4130  ;;  %3373 = vmatpush.msra.mxu3 %v2877_v6 }
 0x577   : > { %v4132_v24 = vunpack.i.l.bf16 %v4131_v11  ;;  %v4133_v17 = vunpack.i.h.bf16 %v4131_v11 }
 0x579   : > { %v3269_v27 = vsel %vm3268_vm13, %v2988_v55, %v4132_v24  ;;  %v3270_v59 = vsel %vm3268_vm13, %v6169_v39, %v4133_v17 }
 0x57e   : > { %v4136_v31 = vpop.permute.xlu2 %4135 }
 0x57f   : > { %v4137_v26 = vunpack.i.l.bf16 %v4136_v31  ;;  %v4138_v46 = vunpack.i.h.bf16 %v4136_v31 }
 0x586   : > { %v4151_v58 = vpop.permute.xlu2 %4150 }
 0x587   : > { %v4152_v40 = vunpack.i.l.bf16 %v4151_v58  ;;  %v4153_v31 = vunpack.i.h.bf16 %v4151_v58 }
 0x594   : > { %v6385_v51 = vpop.permute.xlu2 %4180 }
 0x595   : > { %v4182_v62 = vunpack.i.l.bf16 %v6385_v51 }
 0x59b   : > { %v4141_v42 = vpop.permute.xlu0 %4140  ;;  %v4146_v45 = vpop.permute.xlu1 %4145 }
 0x59c   : > { %v4142_v33 = vunpack.i.l.bf16 %v4141_v42  ;;  %v4147_v32 = vunpack.i.l.bf16 %v4146_v45  ;;  %v4143_v10 = vunpack.i.h.bf16 %v4141_v42  ;;  %v4148_v20 = vunpack.i.h.bf16 %v4146_v45  ;;  %v6393_v37 = vpop.permute.xlu2 %4200 }
 0x59e   : > { %v3278_v54 = vsel %vm3277_vm14, %v3269_v27, %v4142_v33  ;;  %v3279_v49 = vsel %vm3277_vm14, %v3270_v59, %v4143_v10 }
 0x59f   : > { %v3287_v5 = vsel %vm3286_vm15, %v3278_v54, %v4147_v32  ;;  %v3288_v39 = vsel %vm3286_vm15, %v3279_v49, %v4148_v20  ;;  %v4202_v32 = vunpack.i.l.bf16 %v6393_v37  ;;  %v4183_v54 = vunpack.i.h.bf16 %v6385_v51 }
 0x5a0   : > { %v3296_v63 = vsel %vm3295_vm2, %v3287_v5, %v4137_v26  ;;  %v3297_v60 = vsel %vm3295_vm2, %v3288_v39, %v4138_v46 }
 0x5a3   : > { %v4156_v61 = vpop.permute.xlu0 %4155  ;;  %v4166_v43 = vpop.permute.xlu1 %4165 }
 0x5a4   : > { %v4167_v35 = vunpack.i.l.bf16 %v4166_v43  ;;  %v4157_v52 = vunpack.i.l.bf16 %v4156_v61  ;;  %v4168_v19 = vunpack.i.h.bf16 %v4166_v43  ;;  %v4211_v8 = vpop.permute.xlu2 %4210  ;;  %v4158_v6 = vunpack.i.h.bf16 %v4156_v61 }
 0x5a6   : > { %v3271_v57 = vsel %vm3268_vm13, %v6193_v21, %v4157_v52  ;;  %v3272_v17 = vsel %vm3268_vm13, %v6218_v16, %v4158_v6 }
 0x5ab   : > { %v4161_v0 = vpop.permute.xlu0 %4160  ;;  %v4176_v50 = vpop.permute.xlu1 %4175 }
 0x5ac   : > { %v4162_v13 = vunpack.i.l.bf16 %v4161_v0  ;;  %v4163_v7 = vunpack.i.h.bf16 %v4161_v0  ;;  %v4177_v22 = vunpack.i.l.bf16 %v4176_v50  ;;  %v4178_v24 = vunpack.i.h.bf16 %v4176_v50  ;;  %v4226_v59 = vpop.permute.xlu2 %4225  ;;  %v2894_v50 = vld [vmem:[%s6704_s4 + $0x88] sm:$0xff] }
 0x5ad   : > { %3413 = vmatpush.msrb.mxu3 %v2894_v50 }
 0x5ae   : > { %v3305_v25 = vsel %vm3304_vm3, %v3296_v63, %v4162_v13  ;;  %v3306_v30 = vsel %vm3304_vm3, %v3297_v60, %v4163_v7  ;;  %v3280_v3 = vsel %vm3277_vm14, %v3271_v57, %v4177_v22  ;;  %v3281_v61 = vsel %vm3277_vm14, %v3272_v17, %v4178_v24 }
 0x5af   : > { %v3314_v47 = vsel %vm3313_vm4, %v3305_v25, %v4167_v35  ;;  %v3315_v14 = vsel %vm3313_vm4, %v3306_v30, %v4168_v19  ;;  %v3289_v42 = vsel %vm3286_vm15, %v3280_v3, %v4182_v62  ;;  %v3290_v26 = vsel %vm3286_vm15, %v3281_v61, %v4183_v54  ;;  %v2893_v30 = vld [vmem:[%s6704_s4 + $0x80] sm:$0xff] }
 0x5b0   : > { %v3323_v15 = vsel %vm3322_vm6, %v3314_v47, %v4152_v40  ;;  %v3324_v55 = vsel %vm3322_vm6, %v3315_v14, %v4153_v31  ;;  %v4212_v63 = vunpack.i.l.bf16 %v4211_v8  ;;  %v4203_v25 = vunpack.i.h.bf16 %v6393_v37  ;;  %3414 = vmatpush.msrb.mxu3 %v2893_v30 }
 0x5b1   : > { %3374 = vmatmul.f32.vlgmr.msra.gmra.mxu3 %v3323_v15  ;;  %v4227_v57 = vunpack.i.l.bf16 %v4226_v59 }
 0x5b3   : > { %v4171_v41 = vpop.permute.xlu0 %4170  ;;  %v4191_v11 = vpop.permute.xlu1 %4190 }
 0x5b4   : > { %v4172_v18 = vunpack.i.l.bf16 %v4171_v41  ;;  %v4192_v45 = vunpack.i.l.bf16 %v4191_v11  ;;  %v4173_v10 = vunpack.i.h.bf16 %v4171_v41  ;;  %v4193_v49 = vunpack.i.h.bf16 %v4191_v11  ;;  %v4231_v60 = vpop.permute.xlu2 %4230 }
 0x5b5   : > { %v4213_v11 = vunpack.i.h.bf16 %v4211_v8  ;;  %v4232_v24 = vunpack.i.l.bf16 %v4231_v60 }
 0x5b6   : > { %v3298_v33 = vsel %vm3295_vm2, %v3289_v42, %v4172_v18  ;;  %v3299_v16 = vsel %vm3295_vm2, %v3290_v26, %v4173_v10  ;;  %v4233_v26 = vunpack.i.h.bf16 %v4231_v60 }
 0x5b7   : > { %v3307_v58 = vsel %vm3304_vm3, %v3298_v33, %v4192_v45  ;;  %v3308_v7 = vsel %vm3304_vm3, %v3299_v16, %v4193_v49  ;;  %v3275_v54 = vsel %vm3268_vm13, %v6284_v29, %v4232_v24 }
 0x5b8   : > { %v3316_v5 = vsel %vm3313_vm4, %v3307_v58, %v4202_v32  ;;  %v3317_v22 = vsel %vm3313_vm4, %v3308_v7, %v4203_v25 }
 0x5b9   : > { %3377 = vmatmul.f32.gmra.mxu3 %v3324_v55 }
 0x5bb   : > { %v4186_v21 = vpop.permute.xlu0 %4185  ;;  %v4196_v43 = vpop.permute.xlu1 %4195 }
 0x5bc   : > { %v4187_v27 = vunpack.i.l.bf16 %v4186_v21  ;;  %v4197_v20 = vunpack.i.l.bf16 %v4196_v43  ;;  %v4188_v40 = vunpack.i.h.bf16 %v4186_v21  ;;  %v4198_v46 = vunpack.i.h.bf16 %v4196_v43  ;;  %v4241_v43 = vpop.permute.xlu2 %4240 }
 0x5bd   : > { %v4228_v21 = vunpack.i.h.bf16 %v4226_v59 }
 0x5be   : > { %v3325_v0 = vsel %vm3322_vm6, %v3316_v5, %v4187_v27  ;;  %v3273_v51 = vsel %vm3268_vm13, %v6239_v34, %v4197_v20  ;;  %v3326_v34 = vsel %vm3322_vm6, %v3317_v22, %v4188_v40  ;;  %v3274_v19 = vsel %vm3268_vm13, %v6265_v28, %v4198_v46 }
 0x5bf   : > { %v3282_v52 = vsel %vm3277_vm14, %v3273_v51, %v4212_v63  ;;  %v3283_v6 = vsel %vm3277_vm14, %v3274_v19, %v4213_v11 }
 0x5c1   : > { %3380 = vmatmul.f32.gmra.mxu3 %v3325_v0  ;;  %v4242_v0 = vunpack.i.l.bf16 %v4241_v43 }
 0x5c3   : > { %v4206_v13 = vpop.permute.xlu1 %4205  ;;  %v4216_v35 = vpop.permute.xlu0 %4215 }
 0x5c4   : > { %v4217_v39 = vunpack.i.l.bf16 %v4216_v35  ;;  %v4207_v47 = vunpack.i.l.bf16 %v4206_v13  ;;  %v4218_v37 = vunpack.i.h.bf16 %v4216_v35  ;;  %v4208_v62 = vunpack.i.h.bf16 %v4206_v13  ;;  %v3257_v40 = vpop.permute.xlu2 %3256 }
 0x5c5   : > { %v3276_v35 = vsel %vm3268_vm13, %v6300_v36, %v4233_v26 }
 0x5c6   : > { %v3291_v15 = vsel %vm3286_vm15, %v3282_v52, %v4217_v39  ;;  %v3292_v45 = vsel %vm3286_vm15, %v3283_v6, %v4218_v37 }
 0x5c7   : > { %v3300_v41 = vsel %vm3295_vm2, %v3291_v15, %v4207_v47  ;;  %v3301_v8 = vsel %vm3295_vm2, %v3292_v45, %v4208_v62  ;;  %v4243_v47 = vunpack.i.h.bf16 %v4241_v43 }
 0x5c8   : > { %v3309_v42 = vsel %vm3304_vm3, %v3300_v41, %v4227_v57  ;;  %v3310_v10 = vsel %vm3304_vm3, %v3301_v8, %v4228_v21 }
 0x5c9   : > { %3383 = vmatmul.f32.gmra.mxu3 %v3326_v34 }
 0x5cb   : > { %v4221_v3 = vpop.permute.xlu1 %4220  ;;  %v4236_v18 = vpop.permute.xlu0 %4235 }
 0x5cc   : > { %v4222_v14 = vunpack.i.l.bf16 %v4221_v3  ;;  %v4237_v31 = vunpack.i.l.bf16 %v4236_v18  ;;  %v4238_v33 = vunpack.i.h.bf16 %v4236_v18  ;;  %v4223_v58 = vunpack.i.h.bf16 %v4221_v3  ;;  %v3259_v60 = vpop.permute.xlu2 %3258 }
 0x5ce   : > { %v3318_v55 = vsel %vm3313_vm4, %v3309_v42, %v4237_v31  ;;  %v3319_v20 = vsel %vm3313_vm4, %v3310_v10, %v4238_v33 }
 0x5cf   : > { %v3327_v28 = vsel %vm3322_vm6, %v3318_v55, %v4222_v14  ;;  %v3328_v49 = vsel %vm3322_vm6, %v3319_v20, %v4223_v58 }
 0x5d1   : > { %3386 = vmatmul.f32.gmra.mxu3 %v3327_v28 }
 0x5d3   : > { %v4251_v17 = vpop.permute.xlu1 %4250  ;;  %v4246_v27 = vpop.permute.xlu0 %4245 }
 0x5d4   : > { %v4252_v32 = vunpack.i.l.bf16 %v4251_v17  ;;  %v4247_v61 = vunpack.i.l.bf16 %v4246_v27  ;;  %v4248_v16 = vunpack.i.h.bf16 %v4246_v27  ;;  %v4253_v29 = vunpack.i.h.bf16 %v4251_v17 }
 0x5d6   : > { %v3284_v5 = vsel %vm3277_vm14, %v3275_v54, %v4247_v61  ;;  %v3285_v39 = vsel %vm3277_vm14, %v3276_v35, %v4248_v16  ;;  %v2899_v35 = vld [vmem:[%s6706_s6 + $0x18] sm:$0xff] }
 0x5d7   : > { %v3293_v59 = vsel %vm3286_vm15, %v3284_v5, %v4252_v32  ;;  %v3294_v46 = vsel %vm3286_vm15, %v3285_v39, %v4253_v29  ;;  %v2900_v29 = vld [vmem:[%s6706_s6 + $0x20] sm:$0xff]  ;;  %v2903_v39 = vld [vmem:[%s6706_s6 + $0x38] sm:$0xff] }
 0x5d8   : > { %v3302_v13 = vsel %vm3295_vm2, %v3293_v59, %v4242_v0  ;;  %v3303_v22 = vsel %vm3295_vm2, %v3294_v46, %v4243_v47 }
 0x5d9   : > { %3389 = vmatmul.f32.gmra.mxu3 %v3328_v49 }
 0x5db   : > { %v3233_v50 = vpop.permute.xlu1 %3232  ;;  %v3201_v51 = vpop.permute.xlu0 %3200 }
 0x5dc   : > { %v3311_v63 = vsel %vm3304_vm3, %v3302_v13, %v3201_v51  ;;  %v2897_v51 = vld [vmem:[%s6706_s6 + $0x8] sm:$0xff]  ;;  %v2898_v13 = vld [vmem:[%s6706_s6 + $0x10] sm:$0xff] }
 0x5dd   : > { %v3320_v7 = vsel %vm3313_vm4, %v3311_v63, %v3233_v50  ;;  %v2896_v50 = vld [vmem:[%s6706_s6] sm:$0xff]  ;;  %v2901_v63 = vld [vmem:[%s6706_s6 + $0x28] sm:$0xff] }
 0x5de   : > { %v3329_v25 = vsel %vm3322_vm6, %v3320_v7, %v3257_v40  ;;  %v2902_v40 = vld [vmem:[%s6706_s6 + $0x30] sm:$0xff] }
 0x5e1   : > { %3392 = vmatmul.f32.gmra.mxu3 %v3329_v25 }
 0x5e3   : > { %v3235_v52 = vpop.permute.xlu1 %3234  ;;  %v3203_v15 = vpop.permute.xlu0 %3202 }
 0x5e4   : > { %v3312_v36 = vsel %vm3304_vm3, %v3303_v22, %v3203_v15  ;;  %v3540_v22 = vand.u32 3, %v4476_v2 }
 0x5e5   : > { %v3321_v34 = vsel %vm3313_vm4, %v3312_v36, %v3235_v52 }
 0x5e6   : > { %v3330_v30 = vsel %vm3322_vm6, %v3321_v34, %v3259_v60  ;;  %vm3548_vm8 = vcmp.ne.s32.totalorder %v3540_v22, 0  ;;  %vm3542_vm5 = vcmp.ne.s32.totalorder %v3540_v22, 3  ;;  %v3523_v22 = vld [vmem:[%s6707_s7 + $0x20] sm:$0xff] }
 0x5e9   : > { %3395 = vmatmul.f32.gmra.mxu3 %v3330_v30 }
 0x5f1   : > { %4043 = vmatmul.msk.f32.vlgmr.msrb.gmra.mxu3 %vm3268_vm13, %v6220_v53  ;;  %v3067_v53 = vmul.f32 0.0, %v6312_v23  ;;  %v4275_v23 = vld [vmem:[%s6705_s5] ss:$0 sm:$0xff] }
 0x5f9   : > { %4044 = vmatmul.msk.f32.gmra.mxu3 %vm3268_vm13, %v6242_v4 }
 0x601   : > { %4045 = vmatmul.msk.f32.gmra.mxu3 %vm3268_vm13, %v6268_v44 }
 0x609   : > { %4046 = vmatmul.msk.f32.gmra.mxu3 %vm3268_vm13, %v6287_v56 }
 0x611   : > { %4047 = vmatmul.msk.f32.gmra.mxu3 %vm3268_vm13, %v6303_v48 }
 0x619   : > { %4048 = vmatmul.msk.f32.gmra.mxu3 %vm3268_vm13, %v6319_v38 }
 0x621   : > { %4049 = vmatmul.msk.f32.gmra.mxu3 %vm3268_vm13, %v6321_v9 }
 0x629   : > { %4050 = vmatmul.msk.f32.gmra.mxu3 %vm3268_vm13, %v3067_v53  ;;  %v3541_v53 = vand.u32 3, %v4498_v12 }
 0x62b   : > { %vm3549_vm9 = vcmp.ne.s32.totalorder %v3541_v53, 0  ;;  %vm3543_vm11 = vcmp.ne.s32.totalorder %v3541_v53, 3  ;;  %v3536_v53 = vld [vmem:[%s6707_s7 + $0x88] sm:$0xff] }
 0x634   : > { %v3375_v4 = vpop.f32.mrf.mxu3 }
 0x635   : > { %v3376_v20 = vadd.f32 %v4275_v23, %v3375_v4  ;;  %v4061_v4 = vsel %vm3548_vm8, 1.0, %v4343_v1 }
 0x63c   : > { %v3378_v19 = vpop.f32.mrf.mxu3 }
 0x63d   : > { %v3379_v61 = vadd.f32 %v4275_v23, %v3378_v19 }
 0x644   : > { %v3381_v37 = vpop.f32.mrf.mxu3 }
 0x645   : > { %v3382_v27 = vadd.f32 %v4275_v23, %v3381_v37 }
 0x64c   : > { %v3384_v44 = vpop.f32.mrf.mxu3 }
 0x64d   : > { %v3385_v21 = vadd.f32 %v4275_v23, %v3384_v44 }
 0x654   : > { %v3387_v41 = vpop.f32.mrf.mxu3 }
 0x655   : > { %v3388_v24 = vadd.f32 %v4275_v23, %v3387_v41 }
 0x65c   : > { %v3390_v11 = vpop.f32.mrf.mxu3 }
 0x65d   : > { %v3391_v45 = vadd.f32 %v4275_v23, %v3390_v11 }
 0x664   : > { %v3393_v56 = vpop.f32.mrf.mxu3 }
 0x665   : > { %v3394_v9 = vadd.f32 %v4275_v23, %v3393_v56 }
 0x66c   : > { %v3396_v57 = vpop.f32.mrf.mxu3 }
 0x66d   : > { %v3397_v6 = vadd.f32 %v4275_v23, %v3396_v57 }
 0x674   : > { %v3416_v3 = vpop.f32.mrf.mxu3 }
 0x675   : > { %v3417_v49 = vadd.f32 %v3416_v3, %v3376_v20 }
 0x677   : > { %v3440_v16 = vmax.f32 %v3417_v49, 0.0 }
 0x67c   : > { %v3419_v48 = vpop.f32.mrf.mxu3 }
 0x67d   : > { %v3420_v5 = vadd.f32 %v3419_v48, %v3379_v61  ;;  %v4062_v48 = vsel %vm3549_vm9, 1.0, %v4343_v1 }
 0x67f   : > { %v3441_v0 = vmax.f32 %v3420_v5, 0.0 }
 0x684   : > { %v3422_v18 = vpop.f32.mrf.mxu3 }
 0x685   : > { %v3423_v10 = vadd.f32 %v3422_v18, %v3382_v27  ;;  %v4059_v18 = vsel %vm3542_vm5, 1.0, %v4343_v1 }
 0x687   : > { %v3442_v59 = vmax.f32 %v3423_v10, 0.0 }
 0x68c   : > { %v3425_v14 = vpop.f32.mrf.mxu3 }
 0x68d   : > { %v3426_v58 = vadd.f32 %v3425_v14, %v3385_v21  ;;  %v4060_v14 = vsel %vm3543_vm11, 1.0, %v4343_v1 }
 0x68f   : > { %v3443_v26 = vmax.f32 %v3426_v58, 0.0 }
 0x694   : > { %v3428_v38 = vpop.f32.mrf.mxu3 }
 0x695   : > { %v3429_v43 = vadd.f32 %v3428_v38, %v3388_v24 }
 0x697   : > { %v3444_v54 = vmax.f32 %v3429_v43, 0.0 }
 0x69c   : > { %v3431_v31 = vpop.f32.mrf.mxu3 }
 0x69d   : > { %v3432_v33 = vadd.f32 %v3431_v31, %v3391_v45 }
 0x69f   : > { %v3445_v32 = vmax.f32 %v3432_v33, 0.0 }
 0x6a4   : > { %v3434_v62 = vpop.f32.mrf.mxu3 }
 0x6a5   : > { %v3435_v55 = vadd.f32 %v3434_v62, %v3394_v9 }
 0x6a7   : > { %v3446_v17 = vmax.f32 %v3435_v55, 0.0 }
 0x6ac   : > { %v3437_v42 = vpop.f32.mrf.mxu3 }
 0x6ad   : > { %v3438_v28 = vadd.f32 %v3437_v42, %v3397_v6 }
 0x6af   : > { %v3447_v8 = vmax.f32 %v3438_v28, 0.0 }
 0x6b1   : > { %3480 = vmatpush.msra.mxu3 %v3447_v8 }
 0x6b3   : > { %3481 = vmatpush.msra.mxu3 %v3446_v17 }
 0x6b5   : > { %3482 = vmatpush.msra.mxu3 %v3445_v32 }
 0x6b7   : > { %3483 = vmatpush.msra.mxu3 %v3444_v54 }
 0x6b9   : > { %3484 = vmatpush.msra.mxu3 %v3443_v26 }
 0x6bb   : > { %3485 = vmatpush.msra.mxu3 %v3442_v59 }
 0x6bd   : > { %3486 = vmatpush.msra.mxu3 %v3441_v0 }
 0x6bf   : > { %3487 = vmatpush.msra.mxu3 %v3440_v16 }
 0x6c0   : > { %4051 = vmatmul.msk.f32.vlgmr.msra.gmra.mxu3 %vm3295_vm2, %v2896_v50 }
 0x6c8   : > { %4052 = vmatmul.msk.f32.gmra.mxu3 %vm3295_vm2, %v2897_v51 }
 0x6d0   : > { %4053 = vmatmul.msk.f32.gmra.mxu3 %vm3295_vm2, %v2898_v13 }
 0x6d8   : > { %4054 = vmatmul.msk.f32.gmra.mxu3 %vm3295_vm2, %v2899_v35  ;;  %v3534_v35 = vld [vmem:[%s6707_s7 + $0x78] sm:$0xff] }
 0x6d9   : > { %3680 = vmatpush.msrb.mxu3 %v3534_v35  ;;  %v3539_v35 = vld [vmem:[%s6709_s9 + $0x8] sm:$0xff] }
 0x6e0   : > { %4055 = vmatmul.msk.f32.gmra.mxu3 %vm3295_vm2, %v2900_v29  ;;  %v3533_v29 = vld [vmem:[%s6707_s7 + $0x70] sm:$0xff] }
 0x6e1   : > { %3681 = vmatpush.msrb.mxu3 %v3533_v29  ;;  %v3769_v29 = vld [vmem:[%s6710_s10 + $0x18] sm:$0xff] }
 0x6e8   : > { %4056 = vmatmul.msk.f32.gmra.mxu3 %vm3295_vm2, %v2901_v63  ;;  %v3532_v63 = vld [vmem:[%s6707_s7 + $0x68] sm:$0xff] }
 0x6e9   : > { %3682 = vmatpush.msrb.mxu3 %v3532_v63  ;;  %v3771_v63 = vld [vmem:[%s6710_s10 + $0x28] sm:$0xff] }
 0x6f0   : > { %4057 = vmatmul.msk.f32.gmra.mxu3 %vm3295_vm2, %v2902_v40  ;;  %v3531_v40 = vld [vmem:[%s6707_s7 + $0x60] sm:$0xff] }
 0x6f1   : > { %3683 = vmatpush.msrb.mxu3 %v3531_v40  ;;  %v3768_v40 = vld [vmem:[%s6710_s10 + $0x10] sm:$0xff] }
 0x6f8   : > { %4058 = vmatmul.msk.f32.gmra.mxu3 %vm3295_vm2, %v2903_v39  ;;  %v3530_v39 = vld [vmem:[%s6707_s7 + $0x58] sm:$0xff] }
 0x6f9   : > { %3684 = vmatpush.msrb.mxu3 %v3530_v39  ;;  %v3770_v39 = vld [vmem:[%s6710_s10 + $0x20] sm:$0xff] }
 0x743   : > { %v3489_v7 = vpop.f32.mrf.mxu3 }
 0x74b   : > { %v3492_v25 = vpop.f32.mrf.mxu3 }
 0x753   : > { %v3495_v46 = vpop.f32.mrf.mxu3 }
 0x754   : > { %v3513_v60 = vmax.f32 %v3489_v7, %v3495_v46  ;;  %v3529_v7 = vld [vmem:[%s6707_s7 + $0x50] sm:$0xff]  ;;  %v3527_v46 = vld [vmem:[%s6707_s7 + $0x40] sm:$0xff] }
 0x755   : > { %3685 = vmatpush.msrb.mxu3 %v3529_v7 }
 0x75b   : > { %v3498_v47 = vpop.f32.mrf.mxu3 }
 0x75c   : > { %v3514_v37 = vmax.f32 %v3492_v25, %v3498_v47  ;;  %v3528_v25 = vld [vmem:[%s6707_s7 + $0x48] sm:$0xff]  ;;  %v3526_v47 = vld [vmem:[%s6707_s7 + $0x38] sm:$0xff] }
 0x75d   : > { %3686 = vmatpush.msrb.mxu3 %v3528_v25 }
 0x75f   : > { %3687 = vmatpush.msrb.mxu3 %v3527_v46 }
 0x761   : > { %3688 = vmatpush.msrb.mxu3 %v3526_v47 }
 0x763   : > { %v3501_v52 = vpop.f32.mrf.mxu3 }
 0x76b   : > { %v3504_v15 = vpop.f32.mrf.mxu3 }
 0x773   : > { %v3507_v36 = vpop.f32.mrf.mxu3 }
 0x774   : > { %v3515_v34 = vmax.f32 %v3501_v52, %v3507_v36  ;;  %v3525_v52 = vld [vmem:[%s6707_s7 + $0x30] sm:$0xff]  ;;  %v3522_v36 = vld [vmem:[%s6707_s7 + $0x18] sm:$0xff] }
 0x775   : > { %3689 = vmatpush.msrb.mxu3 %v3525_v52 }
 0x776   : > { %v3517_v30 = vmax.f32 %v3513_v60, %v3515_v34  ;;  %v3521_v60 = vld [vmem:[%s6707_s7 + $0x10] sm:$0xff]  ;;  %v3520_v34 = vld [vmem:[%s6707_s7 + $0x8] sm:$0xff] }
 0x778   : > { %v3557_v19 = vrot.slane %v3517_v30, 3  ;;  %v3579_v41 = vrot.slane %v3517_v30, 7  ;;  %v3571_v2 = vrot.slane %v3517_v30, 5  ;;  %v3566_v28 = vrot.slane %v3517_v30, 4 }
 0x779   : > { %v3587_v5 = vrot.slane %v3517_v30, 1 }
 0x77a   : > { %v3562_v11 = vsel %vm3556_vm10, 0.0, %v3557_v19  ;;  %v3584_v12 = vsel %vm799_vm1, 0.0, %v3579_v41  ;;  %v3576_v23 = vsel %vm2478_vm7, 0.0, %v3571_v2  ;;  %v3570_v10 = vsel %vm3565_vm12, 0.0, %v3566_v28 }
 0x77b   : > { %v3510_v44 = vpop.f32.mrf.mxu3  ;;  %v6518_v57 = vmul.f32 %v4061_v4, %v3562_v11  ;;  %v3585_v45 = vmul.f32 %v4061_v4, %v3584_v12  ;;  %v3577_v33 = vmul.f32 %v4059_v18, %v3576_v23 }
 0x77c   : > { %v3516_v56 = vmax.f32 %v3504_v15, %v3510_v44  ;;  %v3524_v15 = vld [vmem:[%s6707_s7 + $0x28] sm:$0xff] }
 0x77d   : > { %3690 = vmatpush.msrb.mxu3 %v3524_v15 }
 0x77e   : > { %v3518_v3 = vmax.f32 %v3514_v37, %v3516_v56 }
 0x77f   : > { %3691 = vmatpush.msrb.mxu3 %v3523_v22 }
 0x780   : > { %v4254_v38 = vpack.i.bf16 %v3518_v3, %v3517_v30  ;;  %v3580_v31 = vrot.slane %v3518_v3, 7  ;;  %v3572_v62 = vrot.slane %v3518_v3, 5  ;;  %v3567_v9 = vrot.slane %v3518_v3, 4  ;;  %v3519_v30 = vld [vmem:[%s6707_s7] sm:$0xff] }
 0x781   : > { %v3558_v6 = vrot.slane %v3518_v3, 3  ;;  %v3588_v58 = vrot.slane %v3518_v3, 1  ;;  %3692 = vmatpush.msrb.mxu3 %v3522_v36  ;;  %v3767_v3 = vld [vmem:[%s6710_s10 + $0x8] sm:$0xff]  ;;  %v3773_v36 = vld [vmem:[%s6710_s10 + $0x38] sm:$0xff] }
 0x782   : > { %4255 = vrot.lane.b32.xlu0 %v4254_v38, %s6750_s28  ;;  %v3581_v42 = vsel %vm799_vm1, %v3579_v41, %v3580_v31  ;;  %v3573_v55 = vsel %vm2478_vm7, %v3571_v2, %v3572_v62  ;;  %v3568_v27 = vsel %vm3565_vm12, %v3566_v28, %v3567_v9  ;;  %v3602_v61 = vsel %vm2478_vm7, %v3572_v62, 0.0  ;;  %3792 = vmatpush.msrb.mxu0 %v3767_v3  ;;  %s3897_s28 = scalar_lea.hbm %s6712_s12, %s4445_s25 }
 0x783   : > { %v3586_v24 = vmul.f32 %v4062_v48, %v3581_v42  ;;  %v3578_v8 = vmul.f32 %v4060_v14, %v3573_v55  ;;  %v6528_v21 = vmul.f32 %v4059_v18, %v3573_v55  ;;  %v3559_v1 = vsel %vm3556_vm10, %v3557_v19, %v3558_v6  ;;  %3693 = vmatpush.msrb.mxu3 %v3521_v60 }
 0x784   : > { %v6532_v32 = vmul.f32 %v4062_v48, %v3559_v1  ;;  %v6538_v54 = vmul.f32 %v4060_v14, %v3602_v61  ;;  %v4259_v20 = vpack.i.bf16 %v3568_v27, %v3570_v10  ;;  %v3589_v26 = vsel %vm923_vm0, %v3587_v5, %v3588_v58  ;;  %v3766_v5 = vld [vmem:[%s6710_s10] sm:$0xff] }
 0x785   : > { %v4269_v43 = vpack.i.bf16 %v3586_v24, %v3585_v45  ;;  %v4264_v17 = vpack.i.bf16 %v3578_v8, %v3577_v33  ;;  %v3593_v49 = vmul.f32 %v4059_v18, %v3589_v26  ;;  %v3597_v59 = vmul.f32 %v4061_v4, %v3559_v1  ;;  %3694 = vmatpush.msrb.mxu3 %v3520_v34  ;;  %v3535_v4 = vld [vmem:[%s6707_s7 + $0x80] sm:$0xff]  ;;  %v3772_v34 = vld [vmem:[%s6710_s10 + $0x30] sm:$0xff] }
 0x786   : > { %v3592_v0 = vsel %vm923_vm0, %v3588_v58, 0.0  ;;  %v3596_v16 = vsel %vm3556_vm10, %v3558_v6, 0.0  ;;  %v3600_v13 = vsel %vm3565_vm12, %v3567_v9, 0.0  ;;  %3793 = vmatpush.msrb.mxu0 %v3766_v5 }
 0x787   : > { %4270 = vrot.lane.b32.xlu2 %v4269_v43, %s6751_s0  ;;  %4265 = vrot.lane.b32.xlu1 %v4264_v17, %s6752_s20  ;;  %v3594_v50 = vmul.f32 %v4060_v14, %v3592_v0  ;;  %v3598_v51 = vmul.f32 %v4062_v48, %v3596_v16  ;;  %s405_s0 = scalar_lea.vmem [#allocation2], %s404_s19 }
 0x788   : > { %3695 = vmatpush.msrb.mxu3 %v3519_v30  ;;  %3816 = vmatpush.msra.mxu0 %v3769_v29  ;;  %s3899_s20 = sshll.u32 %s405_s0, 4  ;;  %s3900_s20 = int_to_ptr.vmem [resolvable:$true] %s3899_s20 }
 0x78a   : > { %4260 = vrot.lane.b32.xlu0 %v4259_v20, %s6753_s16  ;;  %3717 = vmatpush.msra.mxu3 %v3536_v53  ;;  %s3901_s16 = sshll.u32 %s3897_s28, 4  ;;  %s3902_s16 = int_to_ptr.hbm [resolvable:$true] %s3901_s16 }
 0x78b   : > { %3817 = vmatpush.msra.mxu0 %v3768_v40 }
 0x78c   : > { %3718 = vmatpush.msra.mxu3 %v3535_v4 }
 0x78f   : > { %3636 = vrot.lane.b32.xlu1 %v3593_v49, %s6754_s15  ;;  %3644 = vrot.lane.b32.xlu2 %v3597_v59, %s6755_s29  ;;  %v4276_v49 = vld [vmem:[%s6708_s8] ss:$0 sm:$0xff] }
 0x792   : > { %3651 = vrot.lane.b32.xlu0 %v3568_v27, %s6756_s17 }
 0x797   : > { %3638 = vrot.lane.b32.xlu1 %v3594_v50, %s6754_s15  ;;  %3646 = vrot.lane.b32.xlu2 %v3598_v51, %s6755_s29  ;;  %s3889_s15 = scalar_lea.sflag [#allocation3], %s404_s19  ;;  %s4293_s29 = sshra.s32 %s3902_s16, 4  ;;  %s4294_s29 = int_to_ptr.hbm [resolvable:$true] %s4293_s29 }
 0x798   : > { %p4300_p0 = scmp.lt.s32.totalorder %s4294_s29, %s6712_s12 }
 0x79a   : > { %3653 = vrot.lane.b32.xlu0 %v3600_v13, %s6756_s17  ;;  %s4295_s17 = scalar_lea.hbm %s4294_s29, 1 }
 0x79b   : > { %p4296_p11 = scmp.ne.s32.totalorder %s4294_s29, %s4295_s17  ;;  %p4301_p1 = scmp.lt.s32.totalorder %s4299_s26, %s4295_s17 }
 0x79d   : > { %p4297_p12 = pnand %p4296_p11, %p4462_p5  ;;  %p4302_p2 = por %p4301_p1, %p4300_p0 }
 0x79f   : > { %p4298_p13 = pneg %p4297_p12 }
 0x7a1   : > { %p4303_p3 = pnand %p4302_p2, %p4298_p13 }
 0x7e1   : > { %v4271_v37 = vpop.permute.xlu2 %4270 }
 0x7e2   : > { %v4272_v48 = vunpack.i.l.bf16 %v4271_v37  ;;  %v4273_v55 = vunpack.i.h.bf16 %v4271_v37 }
 0x7e9   : > { %v3645_v18 = vpop.permute.xlu2 %3644 }
 0x7f1   : > { %v3647_v17 = vpop.permute.xlu2 %3646 }
 0x7f4   : > { %v4256_v19 = vpop.permute.xlu0 %4255 }
 0x7f5   : > { %v4257_v14 = vunpack.i.l.bf16 %v4256_v19  ;;  %v4258_v8 = vunpack.i.h.bf16 %v4256_v19  ;;  %v3774_v19 = vld [vmem:[%s6711_s11] sm:$0x1] }
 0x7f9   : > { %v4266_v44 = vpop.permute.xlu1 %4265 }
 0x7fa   : > { %v4267_v2 = vunpack.i.l.bf16 %v4266_v44  ;;  %v4268_v62 = vunpack.i.h.bf16 %v4266_v44 }
 0x7fc   : > { %v4261_v41 = vpop.permute.xlu0 %4260 }
 0x7fd   : > { %v4263_v11 = vunpack.i.h.bf16 %v4261_v41  ;;  %v4262_v56 = vunpack.i.l.bf16 %v4261_v41 }
 0x7ff   : > { %v3657_v12 = vsel %vm3268_vm13, %v6518_v57, %v4262_v56  ;;  %v3658_v38 = vsel %vm3268_vm13, %v6532_v32, %v4263_v11 }
 0x800   : > { %v3659_v31 = vsel %vm3277_vm14, %v3657_v12, %v4267_v2  ;;  %v3660_v45 = vsel %vm3277_vm14, %v3658_v38, %v4268_v62 }
 0x801   : > { %v3637_v23 = vpop.permute.xlu1 %3636  ;;  %v3661_v9 = vsel %vm3286_vm15, %v3659_v31, %v4272_v48  ;;  %v3662_v33 = vsel %vm3286_vm15, %v3660_v45, %v4273_v55 }
 0x802   : > { %v3663_v6 = vsel %vm3295_vm2, %v3661_v9, %v4257_v14  ;;  %v3664_v43 = vsel %vm3295_vm2, %v3662_v33, %v4258_v8 }
 0x803   : > { %v3665_v42 = vsel %vm3304_vm3, %v3663_v6, %v3637_v23 }
 0x804   : > { %v3652_v57 = vpop.permute.xlu0 %3651  ;;  %v3667_v28 = vsel %vm3313_vm4, %v3665_v42, %v3645_v18 }
 0x805   : > { %v3669_v24 = vsel %vm3322_vm6, %v3667_v28, %v3652_v57 }
 0x806   : > { %3696 = vmatmul.f32.vlgmr.msrb.gmra.mxu3 %v3669_v24 }
 0x809   : > { %v3639_v1 = vpop.permute.xlu1 %3638 }
 0x80a   : > { %v3666_v27 = vsel %vm3304_vm3, %v3664_v43, %v3639_v1 }
 0x80b   : > { %v3668_v58 = vsel %vm3313_vm4, %v3666_v27, %v3647_v17 }
 0x80c   : > { %v3654_v32 = vpop.permute.xlu0 %3653 }
 0x80d   : > { %v3670_v61 = vsel %vm3322_vm6, %v3668_v58, %v3654_v32 }
 0x80e   : > { %3699 = vmatmul.f32.gmra.mxu3 %v3670_v61 }
 0x816   : > { %4063 = vmatmul.msk.f32.vlgmr.msra.gmra.mxu3 %vm3268_vm13, %v6528_v21 }
 0x81e   : > { %4064 = vmatmul.msk.f32.gmra.mxu3 %vm3268_vm13, %v6538_v54  ;;  %v3538_v54 = vld [vmem:[%s6709_s9] sm:$0xff] }
 0x889   : > { %v3697_v10 = vpop.f32.mrf.mxu3 }
 0x88a   : > { %v3698_v59 = vadd.f32 %v4276_v49, %v3697_v10 }
 0x891   : > { %v3700_v20 = vpop.f32.mrf.mxu3 }
 0x892   : > { %v3701_v0 = vadd.f32 %v4276_v49, %v3700_v20 }
 0x899   : > { %v3720_v26 = vpop.f32.mrf.mxu3 }
 0x89a   : > { %v3721_v50 = vadd.f32 %v3720_v26, %v3698_v59 }
 0x89c   : > { %v3726_v13 = vmax.f32 %v3721_v50, 0.0 }
 0x8a1   : > { %v3723_v16 = vpop.f32.mrf.mxu3 }
 0x8a2   : > { %v3724_v21 = vadd.f32 %v3723_v16, %v3701_v0 }
 0x8a4   : > { %v3727_v51 = vmax.f32 %v3724_v21, 0.0 }
 0x8a6   : > { %3748 = vmatpush.msrb.mxu3 %v3727_v51 }
 0x8a8   : > { %3749 = vmatpush.msrb.mxu3 %v3726_v13 }
 0x8a9   : > { %4065 = vmatmul.msk.f32.vlgmr.msrb.gmra.mxu3 %vm3268_vm13, %v3538_v54 }
 0x8aa   : > { %3840 = vmatpush.msra.mxu3 %v3771_v63 }
 0x8ac   : > { %3841 = vmatpush.msra.mxu3 %v3770_v39 }
 0x8b1   : > { %4066 = vmatmul.msk.f32.gmra.mxu3 %vm3268_vm13, %v3539_v35 }
 0x92c   : > { %v3751_v7 = vpop.f32.mrf.mxu3 }
 0x92d   : > { %v3758_v25 = vrot.slane %v3751_v7, 4 }
 0x92f   : > { %v3760_v52 = vmax.f32 %v3751_v7, %v3758_v25 }
 0x934   : > { %v3754_v46 = vpop.f32.mrf.mxu3 }
 0x935   : > { %v3762_v47 = vrot.slane %v3754_v46, 4 }
 0x937   : > { %v3764_v15 = vmax.f32 %v3754_v46, %v3762_v47 }
 0x939   : > { %v3765_v22 = vmax.f32 %v3760_v52, %v3764_v15 }
 0x93b   : > { %v3823_v60 = vrot.slane %v3765_v22, 2  ;;  %4067 = vmatmul.msk.f32.vlgmr.msrb.gmra.mxu0 %vm3268_vm13, %v3765_v22  ;;  %v3799_v30 = vrot.slane %v3765_v22, 1  ;;  %v3847_v53 = vrot.slane %v3765_v22, 3 }
 0x93c   : > { %3864 = vmatpush.msrb.mxu0 %v3773_v36 }
 0x93d   : > { %4069 = vmatmul.msk.f32.vlgmr.msra.gmra.mxu3 %vm3268_vm13, %v3823_v60 }
 0x93e   : > { %3865 = vmatpush.msrb.mxu0 %v3772_v34 }
 0x943   : > { %4068 = vmatmul.msk.f32.vlgmr.msra.gmra.mxu0 %vm3268_vm13, %v3799_v30 }
 0x94b   : > { %4070 = vmatmul.msk.f32.vlgmr.msrb.gmra.mxu0 %vm3268_vm13, %v3847_v53 }
 0x9b8   : > { %v3795_v4 = vpop.f32.mrf.mxu0 }
 0x9b9   : > { %v3798_v44 = vadd.f32 %v3795_v4, %v3774_v19 }
 0x9c0   : > { %v3819_v37 = vpop.f32.mrf.mxu0  ;;  %v3843_v11 = vpop.f32.mrf.mxu3 }
 0x9c1   : > { %v3822_v41 = vadd.f32 %v3819_v37, %v3798_v44 }
 0x9c3   : > { %v3846_v56 = vadd.f32 %v3843_v11, %v3822_v41 }
 0x9c8   : > { %v3867_v2 = vpop.f32.mrf.mxu0 }
 0x9c9   : > { %v3870_v3 = vadd.f32 %v3867_v2, %v3846_v56 }
 0x9cb   : > { %v3871_v48 = vmul.f32 %v3870_v3, %v3870_v3 }
 0x9cd   : > { %v3872_v12 = vsel %vm799_vm1, %v3871_v48, 0.0 }
 0x9ce   : > { %3873 = vadd.xlane.f32.xlu1 %v3872_v12 }
 0xa41   : > { %v3874_v18 = vpop.xlane.xlu1 %3873 }
 0xa42   : > { %v3875_v14 = vmax.f32 %v3874_v18, 1e-24 }
 0xa44   : > { %4277 = vrsqrt.f32 %v3875_v14  ;;  %vm3882_vm7 = vweird.f32 %v3875_v14 }
 0xa4a   : > { %v4278_v38 = vpop.eup %4277 }
 0xa4b   : > { %v3877_v31 = vmul.f32 %v4278_v38, %v3875_v14  ;;  %vm3883_vm0 = vweird.f32 %v4278_v38 }
 0xa4c   : > { %vm3884_vm1 = vmor %vm3882_vm7, %vm3883_vm0 }
 0xa4d   : > { %v3878_v62 = vmul.f32 %v4278_v38, %v3877_v31 }
 0xa4f   : > { %v3879_v23 = vmul.f32 0.5, %v3878_v62 }
 0xa51   : > { %v3880_v9 = vsub.f32 1.5, %v3879_v23 }
 0xa53   : > { %v3881_v6 = vmul.f32 %v4278_v38, %v3880_v9 }
 0xa55   : > { %v3885_v42 = vsel %vm3884_vm1, %v4278_v38, %v3881_v6 }
 0xa56   : > { %v3886_v45 = vmul.f32 %v3885_v42, %v3870_v3 }
 0xa58   : > { %3887 = vst [vmem:[%s405_s0] sm:$0x1] %v3886_v45 }
 0xa59   : > { %4306 = shalt.err (!%p4303_p3)
}
 0xa5a   : > { %4074 = dma.vmem_to_hbm [thread:$0]  (%p4462_p5), %s3900_s20, 16, %s3902_s16, %s3889_s15  }
 0xa5b PF: > { %p4080_p4 = scmp.ge.s32.totalorder %s4341_s24, 2  ;;  %s3913_s19 = sand.u32 1, %s4329_s21  }
 0xa5c   : > { %s3914_s0 = scalar_lea.sflag [#allocation3], %s3913_s19 }
 0xa5d   : > { %p4077_p7 = pnand %p4080_p4, %p4466_p6 }
 0xa5f   : > { %p4078_p8 = pneg %p4077_p7 }
 0xa61   : > { %4324 = dma.done.wait (%p4078_p8), %s3914_s0, 16  }
 0xa62   : > { %4326 = vsyncadd (%p4078_p8), %s3914_s0, 4294967280  ;;  %p22_p9 = scmp.ge.s32.totalorder %s4449_s27, 4   ;;  %s6757_s21 = smov %s4333_s22 }
 0xa63   : > { %s6758_s22 = smov %s4337_s23  ;;  %s6759_s23 = smov %s4460_s30 }
 0xa64   : > { %s6760_s24 = smov %s4449_s27  ;;  %24 = sbr.rel (!%p22_p9) target bundleno = 6 (0x6), region = 103 }
 0xa69   :  { %3919 = vsyncpa [#allocation3], 1 }
 0xa6a   :  { %3921 = vsyncpa [#allocation3 + $0x1], 1 }

</bundles_post_ra>
